<compile_context>
chip_gen: v6e
topology: v6e:2x2x1
jax: 0.10.0
libtpu: 0.0.40
codegen_flags: <defaults>
</compile_context>

<pallas_src>
import functools

import jax
import jax.numpy as jnp
import numpy as np
from jax.experimental import pallas as pl
from jax.experimental.pallas import tpu as pltpu


def _residual_conv_kernel(w_ref, b_ref, x_ref, o_ref, *, K):
    # w_ref: SMEM (C*C*K*K,) f32, row-major (co, ci, kh, kw); residual identity
    #        already folded into the center tap by the wrapper.
    # b_ref: SMEM (C,) f32
    # x_ref: VMEM (C, TH + 2p, W + 2p) f32   replication-padded row strip
    # o_ref: VMEM (C, TH, W)
    C, TH, W = o_ref.shape
    for co in range(C):
        # Bias seeds the accumulator -> no epilogue bias pass.
        acc = jnp.full((TH, W), b_ref[co], dtype=jnp.float32)
        for ci in range(C):
            for kh in range(K):
                # One vector load per (ci, kh); kw shifts are static lane
                # sub-slices of the loaded value (XLU work, VALU-free slot).
                row = x_ref[ci, kh:kh + TH, :]                # (TH, W + 2p)
                for kw in range(K):
                    w_s = w_ref[((co * C + ci) * K + kh) * K + kw]
                    acc = acc + w_s * row[:, kw:kw + W]
        # non_linearity = Identity()
        o_ref[co] = acc.astype(o_ref.dtype)


def _pick_tile_rows(H, C, Wp, p, budget_bytes=2 << 20):
    """Largest strip height (full H, or a multiple of 8 dividing H) whose
    haloed f32 input strip fits the per-step VMEM budget."""
    candidates = [H] + [th for th in range(8, H, 8) if H % th == 0]
    fitting = [th for th in candidates if C * (th + 2 * p) * Wp * 4 <= budget_bytes]
    return max(fitting) if fitting else min(candidates)


def synthesis_residual_layer(x_nchw, weight_oihw, bias, *, tile_rows=None):
    """Pallas forward of SynthesisResidualLayer.

    Args:
      x_nchw:      (N, C, H, W) float32
      weight_oihw: (C, C, K, K) float32  (Conv2d weight, OIHW)
      bias:        (C,)         float32
      tile_rows:   optional output-row strip height (must divide H; either
                   H itself or a multiple of 8).  None -> auto.
    Returns:
      (N, C, H, W) float32
    """
    N, C, H, W = x_nchw.shape
    K = weight_oihw.shape[-1]
    p = (K - 1) // 2
    Wp = W + 2 * p

    TH = _pick_tile_rows(H, C, Wp, p) if tile_rows is None else tile_rows
    assert H % TH == 0 and (TH == H or TH % 8 == 0), (H, TH)
    S = H // TH
    THp = TH + 2 * p

    # ---- wrapper glue (plain JAX, all small because C stays at 4) ----------
    # Fold the residual into the center conv tap: y = conv(xpad) + b + x.
    w_folded = weight_oihw.astype(jnp.float32).at[:, :, p, p].add(
        jnp.eye(C, dtype=jnp.float32))
    w_flat = w_folded.reshape(C * C * K * K)          # SMEM scalar table
    b = bias.astype(jnp.float32)

    # Replication pad, then per-strip halo extraction (2p duplicated rows per
    # strip).  TODO(synk): for large images, manual-DMA the haloed strips from
    # an un-duplicated HBM tensor instead of materializing them here.
    xpad = jnp.pad(x_nchw, ((0, 0), (0, 0), (p, p), (p, p)), mode="edge")
    strips = jnp.stack(
        [xpad[:, :, i * TH:i * TH + THp, :] for i in range(S)], axis=1
    )  # (N, S, C, THp, Wp)

    kernel = functools.partial(_residual_conv_kernel, K=K)

    flops = 2 * N * C * C * K * K * H * W
    bytes_accessed = 4 * (strips.size + N * C * H * W + w_flat.size + b.size)

    out = pl.pallas_call(
        kernel,
        out_shape=jax.ShapeDtypeStruct((N, C, H, W), x_nchw.dtype),
        grid=(N, S),
        in_specs=[
            pl.BlockSpec(memory_space=pltpu.MemorySpace.SMEM),   # weights
            pl.BlockSpec(memory_space=pltpu.MemorySpace.SMEM),   # bias
            pl.BlockSpec((None, None, C, THp, Wp),
                         lambda n, s: (n, s, 0, 0, 0)),
        ],
        out_specs=pl.BlockSpec((None, C, TH, W), lambda n, s: (n, 0, s, 0)),
        compiler_params=pltpu.CompilerParams(
            dimension_semantics=("parallel", "parallel")),
        cost_estimate=pl.CostEstimate(
            flops=int(flops), transcendentals=0,
            bytes_accessed=int(bytes_accessed)),
    )(w_flat, b, strips)
    return out


def reference_forward(x_nchw, weight_oihw, bias):
    """Pure-JAX reference matching the PyTorch module."""
    K = weight_oihw.shape[-1]
    p = (K - 1) // 2
    xpad = jnp.pad(x_nchw, ((0, 0), (0, 0), (p, p), (p, p)), mode="edge")
    y = jax.lax.conv_general_dilated(
        xpad, weight_oihw, window_strides=(1, 1), padding="VALID",
        dimension_numbers=("NCHW", "OIHW", "NCHW"))
    return y + bias[None, :, None, None] + x_nchw


if __name__ == "__main__":
    # Small shapes consistent with the module: input_ft == output_ft == 4.
    N, C, H, W, K = 2, 4, 16, 16, 3

    key = jax.random.PRNGKey(0)
    kx, kwt, kb = jax.random.split(key, 3)
    x = jax.random.normal(kx, (N, C, H, W), dtype=jnp.float32)

    fwd_auto = jax.jit(synthesis_residual_layer)                              # S = 1
    fwd_strips = jax.jit(functools.partial(synthesis_residual_layer,
                                           tile_rows=8))                      # S = 2

    # Case 1: faithful to __init__ (zero weight / bias)  ->  output == input.
    w_zero = jnp.zeros((C, C, K, K), dtype=jnp.float32)
    b_zero = jnp.zeros((C,), dtype=jnp.float32)
    y_zero = jax.block_until_ready(fwd_auto(x, w_zero, b_zero))
    np.testing.assert_allclose(np.asarray(y_zero), np.asarray(x),
                               rtol=1e-6, atol=1e-6)

    # Case 2: deterministic non-zero weights to exercise the conv hot path,
    # checked on both the single-strip and the 2-strip (halo) paths.
    w_rand = 0.1 * jax.random.normal(kwt, (C, C, K, K), dtype=jnp.float32)
    b_rand = 0.1 * jax.random.normal(kb, (C,), dtype=jnp.float32)
    y_ref = jax.block_until_ready(reference_forward(x, w_rand, b_rand))

    y_auto = jax.block_until_ready(fwd_auto(x, w_rand, b_rand))
    np.testing.assert_allclose(np.asarray(y_auto), np.asarray(y_ref),
                               rtol=1e-5, atol=1e-5)

    y_strip = jax.block_until_ready(fwd_strips(x, w_rand, b_rand))
    np.testing.assert_allclose(np.asarray(y_strip), np.asarray(y_ref),
                               rtol=1e-5, atol=1e-5)

    print("KERNEL_OK")
</pallas_src>

<mosaic_0001>
module attributes {stable_mosaic.version = 11 : i64} {
  func.func @_residual_conv_kernel(%arg0: i32, %arg1: i32, %arg2: memref<144xf32, #tpu.memory_space<smem>>, %arg3: memref<4xf32, #tpu.memory_space<smem>>, %arg4: memref<1x1x4x18x18xf32, #tpu.memory_space<vmem>>, %arg5: memref<1x4x16x16xf32, #tpu.memory_space<vmem>>) attributes {dimension_semantics = [#tpu.dimension_semantics<parallel>, #tpu.dimension_semantics<parallel>], iteration_bounds = array<i64: 2, 1>, scalar_prefetch = 0 : i64, scratch_operands = 0 : i64, tpu.core_type = #tpu.core_type<tc>, window_params = [{transform_indices = @transform_0, window_bounds = array<i64: 144>}, {transform_indices = @transform_1, window_bounds = array<i64: 4>}, {transform_indices = @transform_2, window_bounds = array<i64: 1, 1, 4, 18, 18>}, {transform_indices = @transform_3, window_bounds = array<i64: 1, 4, 16, 16>}]} {
    %c0 = arith.constant 0 : index
    %0 = memref.load %arg3[%c0] : memref<4xf32, #tpu.memory_space<smem>>
    %1 = vector.broadcast %0 : f32 to vector<16x16xf32>
    %c0_0 = arith.constant 0 : index
    %c0_1 = arith.constant 0 : index
    %c0_2 = arith.constant 0 : index
    %c0_3 = arith.constant 0 : index
    %c0_4 = arith.constant 0 : index
    %2 = vector.load %arg4[%c0_0, %c0_1, %c0_2, %c0_3, %c0_4] : memref<1x1x4x18x18xf32, #tpu.memory_space<vmem>>, vector<1x1x1x16x18xf32>
    %3 = vector.shape_cast %2 : vector<1x1x1x16x18xf32> to vector<16x18xf32>
    %c0_5 = arith.constant 0 : index
    %4 = memref.load %arg2[%c0_5] : memref<144xf32, #tpu.memory_space<smem>>
    %5 = vector.extract_strided_slice %3 {offsets = [0, 0], sizes = [16, 16], strides = [1, 1]} : vector<16x18xf32> to vector<16x16xf32>
    %6 = vector.broadcast %4 : f32 to vector<16x16xf32>
    %7 = arith.mulf %6, %5 : vector<16x16xf32>
    %8 = arith.addf %1, %7 : vector<16x16xf32>
    %c1 = arith.constant 1 : index
    %9 = memref.load %arg2[%c1] : memref<144xf32, #tpu.memory_space<smem>>
    %10 = vector.extract_strided_slice %3 {offsets = [0, 1], sizes = [16, 16], strides = [1, 1]} : vector<16x18xf32> to vector<16x16xf32>
    %11 = vector.broadcast %9 : f32 to vector<16x16xf32>
    %12 = arith.mulf %11, %10 : vector<16x16xf32>
    %13 = arith.addf %8, %12 : vector<16x16xf32>
    %c2 = arith.constant 2 : index
    %14 = memref.load %arg2[%c2] : memref<144xf32, #tpu.memory_space<smem>>
    %15 = vector.extract_strided_slice %3 {offsets = [0, 2], sizes = [16, 16], strides = [1, 1]} : vector<16x18xf32> to vector<16x16xf32>
    %16 = vector.broadcast %14 : f32 to vector<16x16xf32>
    %17 = arith.mulf %16, %15 : vector<16x16xf32>
    %18 = arith.addf %13, %17 : vector<16x16xf32>
    %c0_6 = arith.constant 0 : index
    %c0_7 = arith.constant 0 : index
    %c0_8 = arith.constant 0 : index
    %c1_9 = arith.constant 1 : index
    %c0_10 = arith.constant 0 : index
    %19 = vector.load %arg4[%c0_6, %c0_7, %c0_8, %c1_9, %c0_10] : memref<1x1x4x18x18xf32, #tpu.memory_space<vmem>>, vector<1x1x1x16x18xf32>
    %20 = vector.shape_cast %19 : vector<1x1x1x16x18xf32> to vector<16x18xf32>
    %c3 = arith.constant 3 : index
    %21 = memref.load %arg2[%c3] : memref<144xf32, #tpu.memory_space<smem>>
    %22 = vector.extract_strided_slice %20 {offsets = [0, 0], sizes = [16, 16], strides = [1, 1]} : vector<16x18xf32> to vector<16x16xf32>
    %23 = vector.broadcast %21 : f32 to vector<16x16xf32>
    %24 = arith.mulf %23, %22 : vector<16x16xf32>
    %25 = arith.addf %18, %24 : vector<16x16xf32>
    %c4 = arith.constant 4 : index
    %26 = memref.load %arg2[%c4] : memref<144xf32, #tpu.memory_space<smem>>
    %27 = vector.extract_strided_slice %20 {offsets = [0, 1], sizes = [16, 16], strides = [1, 1]} : vector<16x18xf32> to vector<16x16xf32>
    %28 = vector.broadcast %26 : f32 to vector<16x16xf32>
    %29 = arith.mulf %28, %27 : vector<16x16xf32>
    %30 = arith.addf %25, %29 : vector<16x16xf32>
    %c5 = arith.constant 5 : index
    %31 = memref.load %arg2[%c5] : memref<144xf32, #tpu.memory_space<smem>>
    %32 = vector.extract_strided_slice %20 {offsets = [0, 2], sizes = [16, 16], strides = [1, 1]} : vector<16x18xf32> to vector<16x16xf32>
    %33 = vector.broadcast %31 : f32 to vector<16x16xf32>
    %34 = arith.mulf %33, %32 : vector<16x16xf32>
    %35 = arith.addf %30, %34 : vector<16x16xf32>
    %c0_11 = arith.constant 0 : index
    %c0_12 = arith.constant 0 : index
    %c0_13 = arith.constant 0 : index
    %c2_14 = arith.constant 2 : index
    %c0_15 = arith.constant 0 : index
    %36 = vector.load %arg4[%c0_11, %c0_12, %c0_13, %c2_14, %c0_15] : memref<1x1x4x18x18xf32, #tpu.memory_space<vmem>>, vector<1x1x1x16x18xf32>
    %37 = vector.shape_cast %36 : vector<1x1x1x16x18xf32> to vector<16x18xf32>
    %c6 = arith.constant 6 : index
    %38 = memref.load %arg2[%c6] : memref<144xf32, #tpu.memory_space<smem>>
    %39 = vector.extract_strided_slice %37 {offsets = [0, 0], sizes = [16, 16], strides = [1, 1]} : vector<16x18xf32> to vector<16x16xf32>
    %40 = vector.broadcast %38 : f32 to vector<16x16xf32>
    %41 = arith.mulf %40, %39 : vector<16x16xf32>
    %42 = arith.addf %35, %41 : vector<16x16xf32>
    %c7 = arith.constant 7 : index
    %43 = memref.load %arg2[%c7] : memref<144xf32, #tpu.memory_space<smem>>
    %44 = vector.extract_strided_slice %37 {offsets = [0, 1], sizes = [16, 16], strides = [1, 1]} : vector<16x18xf32> to vector<16x16xf32>
    %45 = vector.broadcast %43 : f32 to vector<16x16xf32>
    %46 = arith.mulf %45, %44 : vector<16x16xf32>
    %47 = arith.addf %42, %46 : vector<16x16xf32>
    %c8 = arith.constant 8 : index
    %48 = memref.load %arg2[%c8] : memref<144xf32, #tpu.memory_space<smem>>
    %49 = vector.extract_strided_slice %37 {offsets = [0, 2], sizes = [16, 16], strides = [1, 1]} : vector<16x18xf32> to vector<16x16xf32>
    %50 = vector.broadcast %48 : f32 to vector<16x16xf32>
    %51 = arith.mulf %50, %49 : vector<16x16xf32>
    %52 = arith.addf %47, %51 : vector<16x16xf32>
    %c0_16 = arith.constant 0 : index
    %c0_17 = arith.constant 0 : index
    %c1_18 = arith.constant 1 : index
    %c0_19 = arith.constant 0 : index
    %c0_20 = arith.constant 0 : index
    %53 = vector.load %arg4[%c0_16, %c0_17, %c1_18, %c0_19, %c0_20] : memref<1x1x4x18x18xf32, #tpu.memory_space<vmem>>, vector<1x1x1x16x18xf32>
    %54 = vector.shape_cast %53 : vector<1x1x1x16x18xf32> to vector<16x18xf32>
    %c9 = arith.constant 9 : index
    %55 = memref.load %arg2[%c9] : memref<144xf32, #tpu.memory_space<smem>>
    %56 = vector.extract_strided_slice %54 {offsets = [0, 0], sizes = [16, 16], strides = [1, 1]} : vector<16x18xf32> to vector<16x16xf32>
    %57 = vector.broadcast %55 : f32 to vector<16x16xf32>
    %58 = arith.mulf %57, %56 : vector<16x16xf32>
    %59 = arith.addf %52, %58 : vector<16x16xf32>
    %c10 = arith.constant 10 : index
    %60 = memref.load %arg2[%c10] : memref<144xf32, #tpu.memory_space<smem>>
    %61 = vector.extract_strided_slice %54 {offsets = [0, 1], sizes = [16, 16], strides = [1, 1]} : vector<16x18xf32> to vector<16x16xf32>
    %62 = vector.broadcast %60 : f32 to vector<16x16xf32>
    %63 = arith.mulf %62, %61 : vector<16x16xf32>
    %64 = arith.addf %59, %63 : vector<16x16xf32>
    %c11 = arith.constant 11 : index
    %65 = memref.load %arg2[%c11] : memref<144xf32, #tpu.memory_space<smem>>
    %66 = vector.extract_strided_slice %54 {offsets = [0, 2], sizes = [16, 16], strides = [1, 1]} : vector<16x18xf32> to vector<16x16xf32>
    %67 = vector.broadcast %65 : f32 to vector<16x16xf32>
    %68 = arith.mulf %67, %66 : vector<16x16xf32>
    %69 = arith.addf %64, %68 : vector<16x16xf32>
    %c0_21 = arith.constant 0 : index
    %c0_22 = arith.constant 0 : index
    %c1_23 = arith.constant 1 : index
    %c1_24 = arith.constant 1 : index
    %c0_25 = arith.constant 0 : index
    %70 = vector.load %arg4[%c0_21, %c0_22, %c1_23, %c1_24, %c0_25] : memref<1x1x4x18x18xf32, #tpu.memory_space<vmem>>, vector<1x1x1x16x18xf32>
    %71 = vector.shape_cast %70 : vector<1x1x1x16x18xf32> to vector<16x18xf32>
    %c12 = arith.constant 12 : index
    %72 = memref.load %arg2[%c12] : memref<144xf32, #tpu.memory_space<smem>>
    %73 = vector.extract_strided_slice %71 {offsets = [0, 0], sizes = [16, 16], strides = [1, 1]} : vector<16x18xf32> to vector<16x16xf32>
    %74 = vector.broadcast %72 : f32 to vector<16x16xf32>
    %75 = arith.mulf %74, %73 : vector<16x16xf32>
    %76 = arith.addf %69, %75 : vector<16x16xf32>
    %c13 = arith.constant 13 : index
    %77 = memref.load %arg2[%c13] : memref<144xf32, #tpu.memory_space<smem>>
    %78 = vector.extract_strided_slice %71 {offsets = [0, 1], sizes = [16, 16], strides = [1, 1]} : vector<16x18xf32> to vector<16x16xf32>
    %79 = vector.broadcast %77 : f32 to vector<16x16xf32>
    %80 = arith.mulf %79, %78 : vector<16x16xf32>
    %81 = arith.addf %76, %80 : vector<16x16xf32>
    %c14 = arith.constant 14 : index
    %82 = memref.load %arg2[%c14] : memref<144xf32, #tpu.memory_space<smem>>
    %83 = vector.extract_strided_slice %71 {offsets = [0, 2], sizes = [16, 16], strides = [1, 1]} : vector<16x18xf32> to vector<16x16xf32>
    %84 = vector.broadcast %82 : f32 to vector<16x16xf32>
    %85 = arith.mulf %84, %83 : vector<16x16xf32>
    %86 = arith.addf %81, %85 : vector<16x16xf32>
    %c0_26 = arith.constant 0 : index
    %c0_27 = arith.constant 0 : index
    %c1_28 = arith.constant 1 : index
    %c2_29 = arith.constant 2 : index
    %c0_30 = arith.constant 0 : index
    %87 = vector.load %arg4[%c0_26, %c0_27, %c1_28, %c2_29, %c0_30] : memref<1x1x4x18x18xf32, #tpu.memory_space<vmem>>, vector<1x1x1x16x18xf32>
    %88 = vector.shape_cast %87 : vector<1x1x1x16x18xf32> to vector<16x18xf32>
    %c15 = arith.constant 15 : index
    %89 = memref.load %arg2[%c15] : memref<144xf32, #tpu.memory_space<smem>>
    %90 = vector.extract_strided_slice %88 {offsets = [0, 0], sizes = [16, 16], strides = [1, 1]} : vector<16x18xf32> to vector<16x16xf32>
    %91 = vector.broadcast %89 : f32 to vector<16x16xf32>
    %92 = arith.mulf %91, %90 : vector<16x16xf32>
    %93 = arith.addf %86, %92 : vector<16x16xf32>
    %c16 = arith.constant 16 : index
    %94 = memref.load %arg2[%c16] : memref<144xf32, #tpu.memory_space<smem>>
    %95 = vector.extract_strided_slice %88 {offsets = [0, 1], sizes = [16, 16], strides = [1, 1]} : vector<16x18xf32> to vector<16x16xf32>
    %96 = vector.broadcast %94 : f32 to vector<16x16xf32>
    %97 = arith.mulf %96, %95 : vector<16x16xf32>
    %98 = arith.addf %93, %97 : vector<16x16xf32>
    %c17 = arith.constant 17 : index
    %99 = memref.load %arg2[%c17] : memref<144xf32, #tpu.memory_space<smem>>
    %100 = vector.extract_strided_slice %88 {offsets = [0, 2], sizes = [16, 16], strides = [1, 1]} : vector<16x18xf32> to vector<16x16xf32>
    %101 = vector.broadcast %99 : f32 to vector<16x16xf32>
    %102 = arith.mulf %101, %100 : vector<16x16xf32>
    %103 = arith.addf %98, %102 : vector<16x16xf32>
    %c0_31 = arith.constant 0 : index
    %c0_32 = arith.constant 0 : index
    %c2_33 = arith.constant 2 : index
    %c0_34 = arith.constant 0 : index
    %c0_35 = arith.constant 0 : index
    %104 = vector.load %arg4[%c0_31, %c0_32, %c2_33, %c0_34, %c0_35] : memref<1x1x4x18x18xf32, #tpu.memory_space<vmem>>, vector<1x1x1x16x18xf32>
    %105 = vector.shape_cast %104 : vector<1x1x1x16x18xf32> to vector<16x18xf32>
    %c18 = arith.constant 18 : index
    %106 = memref.load %arg2[%c18] : memref<144xf32, #tpu.memory_space<smem>>
    %107 = vector.extract_strided_slice %105 {offsets = [0, 0], sizes = [16, 16], strides = [1, 1]} : vector<16x18xf32> to vector<16x16xf32>
    %108 = vector.broadcast %106 : f32 to vector<16x16xf32>
    %109 = arith.mulf %108, %107 : vector<16x16xf32>
    %110 = arith.addf %103, %109 : vector<16x16xf32>
    %c19 = arith.constant 19 : index
    %111 = memref.load %arg2[%c19] : memref<144xf32, #tpu.memory_space<smem>>
    %112 = vector.extract_strided_slice %105 {offsets = [0, 1], sizes = [16, 16], strides = [1, 1]} : vector<16x18xf32> to vector<16x16xf32>
    %113 = vector.broadcast %111 : f32 to vector<16x16xf32>
    %114 = arith.mulf %113, %112 : vector<16x16xf32>
    %115 = arith.addf %110, %114 : vector<16x16xf32>
    %c20 = arith.constant 20 : index
    %116 = memref.load %arg2[%c20] : memref<144xf32, #tpu.memory_space<smem>>
    %117 = vector.extract_strided_slice %105 {offsets = [0, 2], sizes = [16, 16], strides = [1, 1]} : vector<16x18xf32> to vector<16x16xf32>
    %118 = vector.broadcast %116 : f32 to vector<16x16xf32>
    %119 = arith.mulf %118, %117 : vector<16x16xf32>
    %120 = arith.addf %115, %119 : vector<16x16xf32>
    %c0_36 = arith.constant 0 : index
    %c0_37 = arith.constant 0 : index
    %c2_38 = arith.constant 2 : index
    %c1_39 = arith.constant 1 : index
    %c0_40 = arith.constant 0 : index
    %121 = vector.load %arg4[%c0_36, %c0_37, %c2_38, %c1_39, %c0_40] : memref<1x1x4x18x18xf32, #tpu.memory_space<vmem>>, vector<1x1x1x16x18xf32>
    %122 = vector.shape_cast %121 : vector<1x1x1x16x18xf32> to vector<16x18xf32>
    %c21 = arith.constant 21 : index
    %123 = memref.load %arg2[%c21] : memref<144xf32, #tpu.memory_space<smem>>
    %124 = vector.extract_strided_slice %122 {offsets = [0, 0], sizes = [16, 16], strides = [1, 1]} : vector<16x18xf32> to vector<16x16xf32>
    %125 = vector.broadcast %123 : f32 to vector<16x16xf32>
    %126 = arith.mulf %125, %124 : vector<16x16xf32>
    %127 = arith.addf %120, %126 : vector<16x16xf32>
    %c22 = arith.constant 22 : index
    %128 = memref.load %arg2[%c22] : memref<144xf32, #tpu.memory_space<smem>>
    %129 = vector.extract_strided_slice %122 {offsets = [0, 1], sizes = [16, 16], strides = [1, 1]} : vector<16x18xf32> to vector<16x16xf32>
    %130 = vector.broadcast %128 : f32 to vector<16x16xf32>
    %131 = arith.mulf %130, %129 : vector<16x16xf32>
    %132 = arith.addf %127, %131 : vector<16x16xf32>
    %c23 = arith.constant 23 : index
    %133 = memref.load %arg2[%c23] : memref<144xf32, #tpu.memory_space<smem>>
    %134 = vector.extract_strided_slice %122 {offsets = [0, 2], sizes = [16, 16], strides = [1, 1]} : vector<16x18xf32> to vector<16x16xf32>
    %135 = vector.broadcast %133 : f32 to vector<16x16xf32>
    %136 = arith.mulf %135, %134 : vector<16x16xf32>
    %137 = arith.addf %132, %136 : vector<16x16xf32>
    %c0_41 = arith.constant 0 : index
    %c0_42 = arith.constant 0 : index
    %c2_43 = arith.constant 2 : index
    %c2_44 = arith.constant 2 : index
    %c0_45 = arith.constant 0 : index
    %138 = vector.load %arg4[%c0_41, %c0_42, %c2_43, %c2_44, %c0_45] : memref<1x1x4x18x18xf32, #tpu.memory_space<vmem>>, vector<1x1x1x16x18xf32>
    %139 = vector.shape_cast %138 : vector<1x1x1x16x18xf32> to vector<16x18xf32>
    %c24 = arith.constant 24 : index
    %140 = memref.load %arg2[%c24] : memref<144xf32, #tpu.memory_space<smem>>
    %141 = vector.extract_strided_slice %139 {offsets = [0, 0], sizes = [16, 16], strides = [1, 1]} : vector<16x18xf32> to vector<16x16xf32>
    %142 = vector.broadcast %140 : f32 to vector<16x16xf32>
    %143 = arith.mulf %142, %141 : vector<16x16xf32>
    %144 = arith.addf %137, %143 : vector<16x16xf32>
    %c25 = arith.constant 25 : index
    %145 = memref.load %arg2[%c25] : memref<144xf32, #tpu.memory_space<smem>>
    %146 = vector.extract_strided_slice %139 {offsets = [0, 1], sizes = [16, 16], strides = [1, 1]} : vector<16x18xf32> to vector<16x16xf32>
    %147 = vector.broadcast %145 : f32 to vector<16x16xf32>
    %148 = arith.mulf %147, %146 : vector<16x16xf32>
    %149 = arith.addf %144, %148 : vector<16x16xf32>
    %c26 = arith.constant 26 : index
    %150 = memref.load %arg2[%c26] : memref<144xf32, #tpu.memory_space<smem>>
    %151 = vector.extract_strided_slice %139 {offsets = [0, 2], sizes = [16, 16], strides = [1, 1]} : vector<16x18xf32> to vector<16x16xf32>
    %152 = vector.broadcast %150 : f32 to vector<16x16xf32>
    %153 = arith.mulf %152, %151 : vector<16x16xf32>
    %154 = arith.addf %149, %153 : vector<16x16xf32>
    %c0_46 = arith.constant 0 : index
    %c0_47 = arith.constant 0 : index
    %c3_48 = arith.constant 3 : index
    %c0_49 = arith.constant 0 : index
    %c0_50 = arith.constant 0 : index
    %155 = vector.load %arg4[%c0_46, %c0_47, %c3_48, %c0_49, %c0_50] : memref<1x1x4x18x18xf32, #tpu.memory_space<vmem>>, vector<1x1x1x16x18xf32>
    %156 = vector.shape_cast %155 : vector<1x1x1x16x18xf32> to vector<16x18xf32>
    %c27 = arith.constant 27 : index
    %157 = memref.load %arg2[%c27] : memref<144xf32, #tpu.memory_space<smem>>
    %158 = vector.extract_strided_slice %156 {offsets = [0, 0], sizes = [16, 16], strides = [1, 1]} : vector<16x18xf32> to vector<16x16xf32>
    %159 = vector.broadcast %157 : f32 to vector<16x16xf32>
    %160 = arith.mulf %159, %158 : vector<16x16xf32>
    %161 = arith.addf %154, %160 : vector<16x16xf32>
    %c28 = arith.constant 28 : index
    %162 = memref.load %arg2[%c28] : memref<144xf32, #tpu.memory_space<smem>>
    %163 = vector.extract_strided_slice %156 {offsets = [0, 1], sizes = [16, 16], strides = [1, 1]} : vector<16x18xf32> to vector<16x16xf32>
    %164 = vector.broadcast %162 : f32 to vector<16x16xf32>
    %165 = arith.mulf %164, %163 : vector<16x16xf32>
    %166 = arith.addf %161, %165 : vector<16x16xf32>
    %c29 = arith.constant 29 : index
    %167 = memref.load %arg2[%c29] : memref<144xf32, #tpu.memory_space<smem>>
    %168 = vector.extract_strided_slice %156 {offsets = [0, 2], sizes = [16, 16], strides = [1, 1]} : vector<16x18xf32> to vector<16x16xf32>
    %169 = vector.broadcast %167 : f32 to vector<16x16xf32>
    %170 = arith.mulf %169, %168 : vector<16x16xf32>
    %171 = arith.addf %166, %170 : vector<16x16xf32>
    %c0_51 = arith.constant 0 : index
    %c0_52 = arith.constant 0 : index
    %c3_53 = arith.constant 3 : index
    %c1_54 = arith.constant 1 : index
    %c0_55 = arith.constant 0 : index
    %172 = vector.load %arg4[%c0_51, %c0_52, %c3_53, %c1_54, %c0_55] : memref<1x1x4x18x18xf32, #tpu.memory_space<vmem>>, vector<1x1x1x16x18xf32>
    %173 = vector.shape_cast %172 : vector<1x1x1x16x18xf32> to vector<16x18xf32>
    %c30 = arith.constant 30 : index
    %174 = memref.load %arg2[%c30] : memref<144xf32, #tpu.memory_space<smem>>
    %175 = vector.extract_strided_slice %173 {offsets = [0, 0], sizes = [16, 16], strides = [1, 1]} : vector<16x18xf32> to vector<16x16xf32>
    %176 = vector.broadcast %174 : f32 to vector<16x16xf32>
    %177 = arith.mulf %176, %175 : vector<16x16xf32>
    %178 = arith.addf %171, %177 : vector<16x16xf32>
    %c31 = arith.constant 31 : index
    %179 = memref.load %arg2[%c31] : memref<144xf32, #tpu.memory_space<smem>>
    %180 = vector.extract_strided_slice %173 {offsets = [0, 1], sizes = [16, 16], strides = [1, 1]} : vector<16x18xf32> to vector<16x16xf32>
    %181 = vector.broadcast %179 : f32 to vector<16x16xf32>
    %182 = arith.mulf %181, %180 : vector<16x16xf32>
    %183 = arith.addf %178, %182 : vector<16x16xf32>
    %c32 = arith.constant 32 : index
    %184 = memref.load %arg2[%c32] : memref<144xf32, #tpu.memory_space<smem>>
    %185 = vector.extract_strided_slice %173 {offsets = [0, 2], sizes = [16, 16], strides = [1, 1]} : vector<16x18xf32> to vector<16x16xf32>
    %186 = vector.broadcast %184 : f32 to vector<16x16xf32>
    %187 = arith.mulf %186, %185 : vector<16x16xf32>
    %188 = arith.addf %183, %187 : vector<16x16xf32>
    %c0_56 = arith.constant 0 : index
    %c0_57 = arith.constant 0 : index
    %c3_58 = arith.constant 3 : index
    %c2_59 = arith.constant 2 : index
    %c0_60 = arith.constant 0 : index
    %189 = vector.load %arg4[%c0_56, %c0_57, %c3_58, %c2_59, %c0_60] : memref<1x1x4x18x18xf32, #tpu.memory_space<vmem>>, vector<1x1x1x16x18xf32>
    %190 = vector.shape_cast %189 : vector<1x1x1x16x18xf32> to vector<16x18xf32>
    %c33 = arith.constant 33 : index
    %191 = memref.load %arg2[%c33] : memref<144xf32, #tpu.memory_space<smem>>
    %192 = vector.extract_strided_slice %190 {offsets = [0, 0], sizes = [16, 16], strides = [1, 1]} : vector<16x18xf32> to vector<16x16xf32>
    %193 = vector.broadcast %191 : f32 to vector<16x16xf32>
    %194 = arith.mulf %193, %192 : vector<16x16xf32>
    %195 = arith.addf %188, %194 : vector<16x16xf32>
    %c34 = arith.constant 34 : index
    %196 = memref.load %arg2[%c34] : memref<144xf32, #tpu.memory_space<smem>>
    %197 = vector.extract_strided_slice %190 {offsets = [0, 1], sizes = [16, 16], strides = [1, 1]} : vector<16x18xf32> to vector<16x16xf32>
    %198 = vector.broadcast %196 : f32 to vector<16x16xf32>
    %199 = arith.mulf %198, %197 : vector<16x16xf32>
    %200 = arith.addf %195, %199 : vector<16x16xf32>
    %c35 = arith.constant 35 : index
    %201 = memref.load %arg2[%c35] : memref<144xf32, #tpu.memory_space<smem>>
    %202 = vector.extract_strided_slice %190 {offsets = [0, 2], sizes = [16, 16], strides = [1, 1]} : vector<16x18xf32> to vector<16x16xf32>
    %203 = vector.broadcast %201 : f32 to vector<16x16xf32>
    %204 = arith.mulf %203, %202 : vector<16x16xf32>
    %205 = arith.addf %200, %204 : vector<16x16xf32>
    %c0_61 = arith.constant 0 : index
    %c0_62 = arith.constant 0 : index
    %c0_63 = arith.constant 0 : index
    %c0_64 = arith.constant 0 : index
    %206 = vector.load %arg5[%c0_61, %c0_62, %c0_63, %c0_64] : memref<1x4x16x16xf32, #tpu.memory_space<vmem>>, vector<1x1x16x16xf32>
    %207 = vector.shape_cast %206 : vector<1x1x16x16xf32> to vector<16x16xf32>
    %208 = vector.shape_cast %205 : vector<16x16xf32> to vector<1x1x16x16xf32>
    tpu.vector_store %arg5[%c0_61, %c0_62, %c0_63, %c0_64], %208 {strides = array<i32>} : memref<1x4x16x16xf32, #tpu.memory_space<vmem>>, vector<1x1x16x16xf32>,
    %c1_65 = arith.constant 1 : index
    %209 = memref.load %arg3[%c1_65] : memref<4xf32, #tpu.memory_space<smem>>
    %210 = vector.broadcast %209 : f32 to vector<16x16xf32>
    %c0_66 = arith.constant 0 : index
    %c0_67 = arith.constant 0 : index
    %c0_68 = arith.constant 0 : index
    %c0_69 = arith.constant 0 : index
    %c0_70 = arith.constant 0 : index
    %211 = vector.load %arg4[%c0_66, %c0_67, %c0_68, %c0_69, %c0_70] : memref<1x1x4x18x18xf32, #tpu.memory_space<vmem>>, vector<1x1x1x16x18xf32>
    %212 = vector.shape_cast %211 : vector<1x1x1x16x18xf32> to vector<16x18xf32>
    %c36 = arith.constant 36 : index
    %213 = memref.load %arg2[%c36] : memref<144xf32, #tpu.memory_space<smem>>
    %214 = vector.extract_strided_slice %212 {offsets = [0, 0], sizes = [16, 16], strides = [1, 1]} : vector<16x18xf32> to vector<16x16xf32>
    %215 = vector.broadcast %213 : f32 to vector<16x16xf32>
    %216 = arith.mulf %215, %214 : vector<16x16xf32>
    %217 = arith.addf %210, %216 : vector<16x16xf32>
    %c37 = arith.constant 37 : index
    %218 = memref.load %arg2[%c37] : memref<144xf32, #tpu.memory_space<smem>>
    %219 = vector.extract_strided_slice %212 {offsets = [0, 1], sizes = [16, 16], strides = [1, 1]} : vector<16x18xf32> to vector<16x16xf32>
    %220 = vector.broadcast %218 : f32 to vector<16x16xf32>
    %221 = arith.mulf %220, %219 : vector<16x16xf32>
    %222 = arith.addf %217, %221 : vector<16x16xf32>
    %c38 = arith.constant 38 : index
    %223 = memref.load %arg2[%c38] : memref<144xf32, #tpu.memory_space<smem>>
    %224 = vector.extract_strided_slice %212 {offsets = [0, 2], sizes = [16, 16], strides = [1, 1]} : vector<16x18xf32> to vector<16x16xf32>
    %225 = vector.broadcast %223 : f32 to vector<16x16xf32>
    %226 = arith.mulf %225, %224 : vector<16x16xf32>
    %227 = arith.addf %222, %226 : vector<16x16xf32>
    %c0_71 = arith.constant 0 : index
    %c0_72 = arith.constant 0 : index
    %c0_73 = arith.constant 0 : index
    %c1_74 = arith.constant 1 : index
    %c0_75 = arith.constant 0 : index
    %228 = vector.load %arg4[%c0_71, %c0_72, %c0_73, %c1_74, %c0_75] : memref<1x1x4x18x18xf32, #tpu.memory_space<vmem>>, vector<1x1x1x16x18xf32>
    %229 = vector.shape_cast %228 : vector<1x1x1x16x18xf32> to vector<16x18xf32>
    %c39 = arith.constant 39 : index
    %230 = memref.load %arg2[%c39] : memref<144xf32, #tpu.memory_space<smem>>
    %231 = vector.extract_strided_slice %229 {offsets = [0, 0], sizes = [16, 16], strides = [1, 1]} : vector<16x18xf32> to vector<16x16xf32>
    %232 = vector.broadcast %230 : f32 to vector<16x16xf32>
    %233 = arith.mulf %232, %231 : vector<16x16xf32>
    %234 = arith.addf %227, %233 : vector<16x16xf32>
    %c40 = arith.constant 40 : index
    %235 = memref.load %arg2[%c40] : memref<144xf32, #tpu.memory_space<smem>>
    %236 = vector.extract_strided_slice %229 {offsets = [0, 1], sizes = [16, 16], strides = [1, 1]} : vector<16x18xf32> to vector<16x16xf32>
    %237 = vector.broadcast %235 : f32 to vector<16x16xf32>
    %238 = arith.mulf %237, %236 : vector<16x16xf32>
    %239 = arith.addf %234, %238 : vector<16x16xf32>
    %c41 = arith.constant 41 : index
    %240 = memref.load %arg2[%c41] : memref<144xf32, #tpu.memory_space<smem>>
    %241 = vector.extract_strided_slice %229 {offsets = [0, 2], sizes = [16, 16], strides = [1, 1]} : vector<16x18xf32> to vector<16x16xf32>
    %242 = vector.broadcast %240 : f32 to vector<16x16xf32>
    %243 = arith.mulf %242, %241 : vector<16x16xf32>
    %244 = arith.addf %239, %243 : vector<16x16xf32>
    %c0_76 = arith.constant 0 : index
    %c0_77 = arith.constant 0 : index
    %c0_78 = arith.constant 0 : index
    %c2_79 = arith.constant 2 : index
    %c0_80 = arith.constant 0 : index
    %245 = vector.load %arg4[%c0_76, %c0_77, %c0_78, %c2_79, %c0_80] : memref<1x1x4x18x18xf32, #tpu.memory_space<vmem>>, vector<1x1x1x16x18xf32>
    %246 = vector.shape_cast %245 : vector<1x1x1x16x18xf32> to vector<16x18xf32>
    %c42 = arith.constant 42 : index
    %247 = memref.load %arg2[%c42] : memref<144xf32, #tpu.memory_space<smem>>
    %248 = vector.extract_strided_slice %246 {offsets = [0, 0], sizes = [16, 16], strides = [1, 1]} : vector<16x18xf32> to vector<16x16xf32>
    %249 = vector.broadcast %247 : f32 to vector<16x16xf32>
    %250 = arith.mulf %249, %248 : vector<16x16xf32>
    %251 = arith.addf %244, %250 : vector<16x16xf32>
    %c43 = arith.constant 43 : index
    %252 = memref.load %arg2[%c43] : memref<144xf32, #tpu.memory_space<smem>>
    %253 = vector.extract_strided_slice %246 {offsets = [0, 1], sizes = [16, 16], strides = [1, 1]} : vector<16x18xf32> to vector<16x16xf32>
    %254 = vector.broadcast %252 : f32 to vector<16x16xf32>
    %255 = arith.mulf %254, %253 : vector<16x16xf32>
    %256 = arith.addf %251, %255 : vector<16x16xf32>
    %c44 = arith.constant 44 : index
    %257 = memref.load %arg2[%c44] : memref<144xf32, #tpu.memory_space<smem>>
    %258 = vector.extract_strided_slice %246 {offsets = [0, 2], sizes = [16, 16], strides = [1, 1]} : vector<16x18xf32> to vector<16x16xf32>
    %259 = vector.broadcast %257 : f32 to vector<16x16xf32>
    %260 = arith.mulf %259, %258 : vector<16x16xf32>
    %261 = arith.addf %256, %260 : vector<16x16xf32>
    %c0_81 = arith.constant 0 : index
    %c0_82 = arith.constant 0 : index
    %c1_83 = arith.constant 1 : index
    %c0_84 = arith.constant 0 : index
    %c0_85 = arith.constant 0 : index
    %262 = vector.load %arg4[%c0_81, %c0_82, %c1_83, %c0_84, %c0_85] : memref<1x1x4x18x18xf32, #tpu.memory_space<vmem>>, vector<1x1x1x16x18xf32>
    %263 = vector.shape_cast %262 : vector<1x1x1x16x18xf32> to vector<16x18xf32>
    %c45 = arith.constant 45 : index
    %264 = memref.load %arg2[%c45] : memref<144xf32, #tpu.memory_space<smem>>
    %265 = vector.extract_strided_slice %263 {offsets = [0, 0], sizes = [16, 16], strides = [1, 1]} : vector<16x18xf32> to vector<16x16xf32>
    %266 = vector.broadcast %264 : f32 to vector<16x16xf32>
    %267 = arith.mulf %266, %265 : vector<16x16xf32>
    %268 = arith.addf %261, %267 : vector<16x16xf32>
    %c46 = arith.constant 46 : index
    %269 = memref.load %arg2[%c46] : memref<144xf32, #tpu.memory_space<smem>>
    %270 = vector.extract_strided_slice %263 {offsets = [0, 1], sizes = [16, 16], strides = [1, 1]} : vector<16x18xf32> to vector<16x16xf32>
    %271 = vector.broadcast %269 : f32 to vector<16x16xf32>
    %272 = arith.mulf %271, %270 : vector<16x16xf32>
    %273 = arith.addf %268, %272 : vector<16x16xf32>
    %c47 = arith.constant 47 : index
    %274 = memref.load %arg2[%c47] : memref<144xf32, #tpu.memory_space<smem>>
    %275 = vector.extract_strided_slice %263 {offsets = [0, 2], sizes = [16, 16], strides = [1, 1]} : vector<16x18xf32> to vector<16x16xf32>
    %276 = vector.broadcast %274 : f32 to vector<16x16xf32>
    %277 = arith.mulf %276, %275 : vector<16x16xf32>
    %278 = arith.addf %273, %277 : vector<16x16xf32>
    %c0_86 = arith.constant 0 : index
    %c0_87 = arith.constant 0 : index
    %c1_88 = arith.constant 1 : index
    %c1_89 = arith.constant 1 : index
    %c0_90 = arith.constant 0 : index
    %279 = vector.load %arg4[%c0_86, %c0_87, %c1_88, %c1_89, %c0_90] : memref<1x1x4x18x18xf32, #tpu.memory_space<vmem>>, vector<1x1x1x16x18xf32>
    %280 = vector.shape_cast %279 : vector<1x1x1x16x18xf32> to vector<16x18xf32>
    %c48 = arith.constant 48 : index
    %281 = memref.load %arg2[%c48] : memref<144xf32, #tpu.memory_space<smem>>
    %282 = vector.extract_strided_slice %280 {offsets = [0, 0], sizes = [16, 16], strides = [1, 1]} : vector<16x18xf32> to vector<16x16xf32>
    %283 = vector.broadcast %281 : f32 to vector<16x16xf32>
    %284 = arith.mulf %283, %282 : vector<16x16xf32>
    %285 = arith.addf %278, %284 : vector<16x16xf32>
    %c49 = arith.constant 49 : index
    %286 = memref.load %arg2[%c49] : memref<144xf32, #tpu.memory_space<smem>>
    %287 = vector.extract_strided_slice %280 {offsets = [0, 1], sizes = [16, 16], strides = [1, 1]} : vector<16x18xf32> to vector<16x16xf32>
    %288 = vector.broadcast %286 : f32 to vector<16x16xf32>
    %289 = arith.mulf %288, %287 : vector<16x16xf32>
    %290 = arith.addf %285, %289 : vector<16x16xf32>
    %c50 = arith.constant 50 : index
    %291 = memref.load %arg2[%c50] : memref<144xf32, #tpu.memory_space<smem>>
    %292 = vector.extract_strided_slice %280 {offsets = [0, 2], sizes = [16, 16], strides = [1, 1]} : vector<16x18xf32> to vector<16x16xf32>
    %293 = vector.broadcast %291 : f32 to vector<16x16xf32>
    %294 = arith.mulf %293, %292 : vector<16x16xf32>
    %295 = arith.addf %290, %294 : vector<16x16xf32>
    %c0_91 = arith.constant 0 : index
    %c0_92 = arith.constant 0 : index
    %c1_93 = arith.constant 1 : index
    %c2_94 = arith.constant 2 : index
    %c0_95 = arith.constant 0 : index
    %296 = vector.load %arg4[%c0_91, %c0_92, %c1_93, %c2_94, %c0_95] : memref<1x1x4x18x18xf32, #tpu.memory_space<vmem>>, vector<1x1x1x16x18xf32>
    %297 = vector.shape_cast %296 : vector<1x1x1x16x18xf32> to vector<16x18xf32>
    %c51 = arith.constant 51 : index
    %298 = memref.load %arg2[%c51] : memref<144xf32, #tpu.memory_space<smem>>
    %299 = vector.extract_strided_slice %297 {offsets = [0, 0], sizes = [16, 16], strides = [1, 1]} : vector<16x18xf32> to vector<16x16xf32>
    %300 = vector.broadcast %298 : f32 to vector<16x16xf32>
    %301 = arith.mulf %300, %299 : vector<16x16xf32>
    %302 = arith.addf %295, %301 : vector<16x16xf32>
    %c52 = arith.constant 52 : index
    %303 = memref.load %arg2[%c52] : memref<144xf32, #tpu.memory_space<smem>>
    %304 = vector.extract_strided_slice %297 {offsets = [0, 1], sizes = [16, 16], strides = [1, 1]} : vector<16x18xf32> to vector<16x16xf32>
    %305 = vector.broadcast %303 : f32 to vector<16x16xf32>
    %306 = arith.mulf %305, %304 : vector<16x16xf32>
    %307 = arith.addf %302, %306 : vector<16x16xf32>
    %c53 = arith.constant 53 : index
    %308 = memref.load %arg2[%c53] : memref<144xf32, #tpu.memory_space<smem>>
    %309 = vector.extract_strided_slice %297 {offsets = [0, 2], sizes = [16, 16], strides = [1, 1]} : vector<16x18xf32> to vector<16x16xf32>
    %310 = vector.broadcast %308 : f32 to vector<16x16xf32>
    %311 = arith.mulf %310, %309 : vector<16x16xf32>
    %312 = arith.addf %307, %311 : vector<16x16xf32>
    %c0_96 = arith.constant 0 : index
    %c0_97 = arith.constant 0 : index
    %c2_98 = arith.constant 2 : index
    %c0_99 = arith.constant 0 : index
    %c0_100 = arith.constant 0 : index
    %313 = vector.load %arg4[%c0_96, %c0_97, %c2_98, %c0_99, %c0_100] : memref<1x1x4x18x18xf32, #tpu.memory_space<vmem>>, vector<1x1x1x16x18xf32>
    %314 = vector.shape_cast %313 : vector<1x1x1x16x18xf32> to vector<16x18xf32>
    %c54 = arith.constant 54 : index
    %315 = memref.load %arg2[%c54] : memref<144xf32, #tpu.memory_space<smem>>
    %316 = vector.extract_strided_slice %314 {offsets = [0, 0], sizes = [16, 16], strides = [1, 1]} : vector<16x18xf32> to vector<16x16xf32>
    %317 = vector.broadcast %315 : f32 to vector<16x16xf32>
    %318 = arith.mulf %317, %316 : vector<16x16xf32>
    %319 = arith.addf %312, %318 : vector<16x16xf32>
    %c55 = arith.constant 55 : index
    %320 = memref.load %arg2[%c55] : memref<144xf32, #tpu.memory_space<smem>>
    %321 = vector.extract_strided_slice %314 {offsets = [0, 1], sizes = [16, 16], strides = [1, 1]} : vector<16x18xf32> to vector<16x16xf32>
    %322 = vector.broadcast %320 : f32 to vector<16x16xf32>
    %323 = arith.mulf %322, %321 : vector<16x16xf32>
    %324 = arith.addf %319, %323 : vector<16x16xf32>
    %c56 = arith.constant 56 : index
    %325 = memref.load %arg2[%c56] : memref<144xf32, #tpu.memory_space<smem>>
    %326 = vector.extract_strided_slice %314 {offsets = [0, 2], sizes = [16, 16], strides = [1, 1]} : vector<16x18xf32> to vector<16x16xf32>
    %327 = vector.broadcast %325 : f32 to vector<16x16xf32>
    %328 = arith.mulf %327, %326 : vector<16x16xf32>
    %329 = arith.addf %324, %328 : vector<16x16xf32>
    %c0_101 = arith.constant 0 : index
    %c0_102 = arith.constant 0 : index
    %c2_103 = arith.constant 2 : index
    %c1_104 = arith.constant 1 : index
    %c0_105 = arith.constant 0 : index
    %330 = vector.load %arg4[%c0_101, %c0_102, %c2_103, %c1_104, %c0_105] : memref<1x1x4x18x18xf32, #tpu.memory_space<vmem>>, vector<1x1x1x16x18xf32>
    %331 = vector.shape_cast %330 : vector<1x1x1x16x18xf32> to vector<16x18xf32>
    %c57 = arith.constant 57 : index
    %332 = memref.load %arg2[%c57] : memref<144xf32, #tpu.memory_space<smem>>
    %333 = vector.extract_strided_slice %331 {offsets = [0, 0], sizes = [16, 16], strides = [1, 1]} : vector<16x18xf32> to vector<16x16xf32>
    %334 = vector.broadcast %332 : f32 to vector<16x16xf32>
    %335 = arith.mulf %334, %333 : vector<16x16xf32>
    %336 = arith.addf %329, %335 : vector<16x16xf32>
    %c58 = arith.constant 58 : index
    %337 = memref.load %arg2[%c58] : memref<144xf32, #tpu.memory_space<smem>>
    %338 = vector.extract_strided_slice %331 {offsets = [0, 1], sizes = [16, 16], strides = [1, 1]} : vector<16x18xf32> to vector<16x16xf32>
    %339 = vector.broadcast %337 : f32 to vector<16x16xf32>
    %340 = arith.mulf %339, %338 : vector<16x16xf32>
    %341 = arith.addf %336, %340 : vector<16x16xf32>
    %c59 = arith.constant 59 : index
    %342 = memref.load %arg2[%c59] : memref<144xf32, #tpu.memory_space<smem>>
    %343 = vector.extract_strided_slice %331 {offsets = [0, 2], sizes = [16, 16], strides = [1, 1]} : vector<16x18xf32> to vector<16x16xf32>
    %344 = vector.broadcast %342 : f32 to vector<16x16xf32>
    %345 = arith.mulf %344, %343 : vector<16x16xf32>
    %346 = arith.addf %341, %345 : vector<16x16xf32>
    %c0_106 = arith.constant 0 : index
    %c0_107 = arith.constant 0 : index
    %c2_108 = arith.constant 2 : index
    %c2_109 = arith.constant 2 : index
    %c0_110 = arith.constant 0 : index
    %347 = vector.load %arg4[%c0_106, %c0_107, %c2_108, %c2_109, %c0_110] : memref<1x1x4x18x18xf32, #tpu.memory_space<vmem>>, vector<1x1x1x16x18xf32>
    %348 = vector.shape_cast %347 : vector<1x1x1x16x18xf32> to vector<16x18xf32>
    %c60 = arith.constant 60 : index
    %349 = memref.load %arg2[%c60] : memref<144xf32, #tpu.memory_space<smem>>
    %350 = vector.extract_strided_slice %348 {offsets = [0, 0], sizes = [16, 16], strides = [1, 1]} : vector<16x18xf32> to vector<16x16xf32>
    %351 = vector.broadcast %349 : f32 to vector<16x16xf32>
    %352 = arith.mulf %351, %350 : vector<16x16xf32>
    %353 = arith.addf %346, %352 : vector<16x16xf32>
    %c61 = arith.constant 61 : index
    %354 = memref.load %arg2[%c61] : memref<144xf32, #tpu.memory_space<smem>>
    %355 = vector.extract_strided_slice %348 {offsets = [0, 1], sizes = [16, 16], strides = [1, 1]} : vector<16x18xf32> to vector<16x16xf32>
    %356 = vector.broadcast %354 : f32 to vector<16x16xf32>
    %357 = arith.mulf %356, %355 : vector<16x16xf32>
    %358 = arith.addf %353, %357 : vector<16x16xf32>
    %c62 = arith.constant 62 : index
    %359 = memref.load %arg2[%c62] : memref<144xf32, #tpu.memory_space<smem>>
    %360 = vector.extract_strided_slice %348 {offsets = [0, 2], sizes = [16, 16], strides = [1, 1]} : vector<16x18xf32> to vector<16x16xf32>
    %361 = vector.broadcast %359 : f32 to vector<16x16xf32>
    %362 = arith.mulf %361, %360 : vector<16x16xf32>
    %363 = arith.addf %358, %362 : vector<16x16xf32>
    %c0_111 = arith.constant 0 : index
    %c0_112 = arith.constant 0 : index
    %c3_113 = arith.constant 3 : index
    %c0_114 = arith.constant 0 : index
    %c0_115 = arith.constant 0 : index
    %364 = vector.load %arg4[%c0_111, %c0_112, %c3_113, %c0_114, %c0_115] : memref<1x1x4x18x18xf32, #tpu.memory_space<vmem>>, vector<1x1x1x16x18xf32>
    %365 = vector.shape_cast %364 : vector<1x1x1x16x18xf32> to vector<16x18xf32>
    %c63 = arith.constant 63 : index
    %366 = memref.load %arg2[%c63] : memref<144xf32, #tpu.memory_space<smem>>
    %367 = vector.extract_strided_slice %365 {offsets = [0, 0], sizes = [16, 16], strides = [1, 1]} : vector<16x18xf32> to vector<16x16xf32>
    %368 = vector.broadcast %366 : f32 to vector<16x16xf32>
    %369 = arith.mulf %368, %367 : vector<16x16xf32>
    %370 = arith.addf %363, %369 : vector<16x16xf32>
    %c64 = arith.constant 64 : index
    %371 = memref.load %arg2[%c64] : memref<144xf32, #tpu.memory_space<smem>>
    %372 = vector.extract_strided_slice %365 {offsets = [0, 1], sizes = [16, 16], strides = [1, 1]} : vector<16x18xf32> to vector<16x16xf32>
    %373 = vector.broadcast %371 : f32 to vector<16x16xf32>
    %374 = arith.mulf %373, %372 : vector<16x16xf32>
    %375 = arith.addf %370, %374 : vector<16x16xf32>
    %c65 = arith.constant 65 : index
    %376 = memref.load %arg2[%c65] : memref<144xf32, #tpu.memory_space<smem>>
    %377 = vector.extract_strided_slice %365 {offsets = [0, 2], sizes = [16, 16], strides = [1, 1]} : vector<16x18xf32> to vector<16x16xf32>
    %378 = vector.broadcast %376 : f32 to vector<16x16xf32>
    %379 = arith.mulf %378, %377 : vector<16x16xf32>
    %380 = arith.addf %375, %379 : vector<16x16xf32>
    %c0_116 = arith.constant 0 : index
    %c0_117 = arith.constant 0 : index
    %c3_118 = arith.constant 3 : index
    %c1_119 = arith.constant 1 : index
    %c0_120 = arith.constant 0 : index
    %381 = vector.load %arg4[%c0_116, %c0_117, %c3_118, %c1_119, %c0_120] : memref<1x1x4x18x18xf32, #tpu.memory_space<vmem>>, vector<1x1x1x16x18xf32>
    %382 = vector.shape_cast %381 : vector<1x1x1x16x18xf32> to vector<16x18xf32>
    %c66 = arith.constant 66 : index
    %383 = memref.load %arg2[%c66] : memref<144xf32, #tpu.memory_space<smem>>
    %384 = vector.extract_strided_slice %382 {offsets = [0, 0], sizes = [16, 16], strides = [1, 1]} : vector<16x18xf32> to vector<16x16xf32>
    %385 = vector.broadcast %383 : f32 to vector<16x16xf32>
    %386 = arith.mulf %385, %384 : vector<16x16xf32>
    %387 = arith.addf %380, %386 : vector<16x16xf32>
    %c67 = arith.constant 67 : index
    %388 = memref.load %arg2[%c67] : memref<144xf32, #tpu.memory_space<smem>>
    %389 = vector.extract_strided_slice %382 {offsets = [0, 1], sizes = [16, 16], strides = [1, 1]} : vector<16x18xf32> to vector<16x16xf32>
    %390 = vector.broadcast %388 : f32 to vector<16x16xf32>
    %391 = arith.mulf %390, %389 : vector<16x16xf32>
    %392 = arith.addf %387, %391 : vector<16x16xf32>
    %c68 = arith.constant 68 : index
    %393 = memref.load %arg2[%c68] : memref<144xf32, #tpu.memory_space<smem>>
    %394 = vector.extract_strided_slice %382 {offsets = [0, 2], sizes = [16, 16], strides = [1, 1]} : vector<16x18xf32> to vector<16x16xf32>
    %395 = vector.broadcast %393 : f32 to vector<16x16xf32>
    %396 = arith.mulf %395, %394 : vector<16x16xf32>
    %397 = arith.addf %392, %396 : vector<16x16xf32>
    %c0_121 = arith.constant 0 : index
    %c0_122 = arith.constant 0 : index
    %c3_123 = arith.constant 3 : index
    %c2_124 = arith.constant 2 : index
    %c0_125 = arith.constant 0 : index
    %398 = vector.load %arg4[%c0_121, %c0_122, %c3_123, %c2_124, %c0_125] : memref<1x1x4x18x18xf32, #tpu.memory_space<vmem>>, vector<1x1x1x16x18xf32>
    %399 = vector.shape_cast %398 : vector<1x1x1x16x18xf32> to vector<16x18xf32>
    %c69 = arith.constant 69 : index
    %400 = memref.load %arg2[%c69] : memref<144xf32, #tpu.memory_space<smem>>
    %401 = vector.extract_strided_slice %399 {offsets = [0, 0], sizes = [16, 16], strides = [1, 1]} : vector<16x18xf32> to vector<16x16xf32>
    %402 = vector.broadcast %400 : f32 to vector<16x16xf32>
    %403 = arith.mulf %402, %401 : vector<16x16xf32>
    %404 = arith.addf %397, %403 : vector<16x16xf32>
    %c70 = arith.constant 70 : index
    %405 = memref.load %arg2[%c70] : memref<144xf32, #tpu.memory_space<smem>>
    %406 = vector.extract_strided_slice %399 {offsets = [0, 1], sizes = [16, 16], strides = [1, 1]} : vector<16x18xf32> to vector<16x16xf32>
    %407 = vector.broadcast %405 : f32 to vector<16x16xf32>
    %408 = arith.mulf %407, %406 : vector<16x16xf32>
    %409 = arith.addf %404, %408 : vector<16x16xf32>
    %c71 = arith.constant 71 : index
    %410 = memref.load %arg2[%c71] : memref<144xf32, #tpu.memory_space<smem>>
    %411 = vector.extract_strided_slice %399 {offsets = [0, 2], sizes = [16, 16], strides = [1, 1]} : vector<16x18xf32> to vector<16x16xf32>
    %412 = vector.broadcast %410 : f32 to vector<16x16xf32>
    %413 = arith.mulf %412, %411 : vector<16x16xf32>
    %414 = arith.addf %409, %413 : vector<16x16xf32>
    %c0_126 = arith.constant 0 : index
    %c1_127 = arith.constant 1 : index
    %c0_128 = arith.constant 0 : index
    %c0_129 = arith.constant 0 : index
    %415 = vector.load %arg5[%c0_126, %c1_127, %c0_128, %c0_129] : memref<1x4x16x16xf32, #tpu.memory_space<vmem>>, vector<1x1x16x16xf32>
    %416 = vector.shape_cast %415 : vector<1x1x16x16xf32> to vector<16x16xf32>
    %417 = vector.shape_cast %414 : vector<16x16xf32> to vector<1x1x16x16xf32>
    tpu.vector_store %arg5[%c0_126, %c1_127, %c0_128, %c0_129], %417 {strides = array<i32>} : memref<1x4x16x16xf32, #tpu.memory_space<vmem>>, vector<1x1x16x16xf32>,
    %c2_130 = arith.constant 2 : index
    %418 = memref.load %arg3[%c2_130] : memref<4xf32, #tpu.memory_space<smem>>
    %419 = vector.broadcast %418 : f32 to vector<16x16xf32>
    %c0_131 = arith.constant 0 : index
    %c0_132 = arith.constant 0 : index
    %c0_133 = arith.constant 0 : index
    %c0_134 = arith.constant 0 : index
    %c0_135 = arith.constant 0 : index
    %420 = vector.load %arg4[%c0_131, %c0_132, %c0_133, %c0_134, %c0_135] : memref<1x1x4x18x18xf32, #tpu.memory_space<vmem>>, vector<1x1x1x16x18xf32>
    %421 = vector.shape_cast %420 : vector<1x1x1x16x18xf32> to vector<16x18xf32>
    %c72 = arith.constant 72 : index
    %422 = memref.load %arg2[%c72] : memref<144xf32, #tpu.memory_space<smem>>
    %423 = vector.extract_strided_slice %421 {offsets = [0, 0], sizes = [16, 16], strides = [1, 1]} : vector<16x18xf32> to vector<16x16xf32>
    %424 = vector.broadcast %422 : f32 to vector<16x16xf32>
    %425 = arith.mulf %424, %423 : vector<16x16xf32>
    %426 = arith.addf %419, %425 : vector<16x16xf32>
    %c73 = arith.constant 73 : index
    %427 = memref.load %arg2[%c73] : memref<144xf32, #tpu.memory_space<smem>>
    %428 = vector.extract_strided_slice %421 {offsets = [0, 1], sizes = [16, 16], strides = [1, 1]} : vector<16x18xf32> to vector<16x16xf32>
    %429 = vector.broadcast %427 : f32 to vector<16x16xf32>
    %430 = arith.mulf %429, %428 : vector<16x16xf32>
    %431 = arith.addf %426, %430 : vector<16x16xf32>
    %c74 = arith.constant 74 : index
    %432 = memref.load %arg2[%c74] : memref<144xf32, #tpu.memory_space<smem>>
    %433 = vector.extract_strided_slice %421 {offsets = [0, 2], sizes = [16, 16], strides = [1, 1]} : vector<16x18xf32> to vector<16x16xf32>
    %434 = vector.broadcast %432 : f32 to vector<16x16xf32>
    %435 = arith.mulf %434, %433 : vector<16x16xf32>
    %436 = arith.addf %431, %435 : vector<16x16xf32>
    %c0_136 = arith.constant 0 : index
    %c0_137 = arith.constant 0 : index
    %c0_138 = arith.constant 0 : index
    %c1_139 = arith.constant 1 : index
    %c0_140 = arith.constant 0 : index
    %437 = vector.load %arg4[%c0_136, %c0_137, %c0_138, %c1_139, %c0_140] : memref<1x1x4x18x18xf32, #tpu.memory_space<vmem>>, vector<1x1x1x16x18xf32>
    %438 = vector.shape_cast %437 : vector<1x1x1x16x18xf32> to vector<16x18xf32>
    %c75 = arith.constant 75 : index
    %439 = memref.load %arg2[%c75] : memref<144xf32, #tpu.memory_space<smem>>
    %440 = vector.extract_strided_slice %438 {offsets = [0, 0], sizes = [16, 16], strides = [1, 1]} : vector<16x18xf32> to vector<16x16xf32>
    %441 = vector.broadcast %439 : f32 to vector<16x16xf32>
    %442 = arith.mulf %441, %440 : vector<16x16xf32>
    %443 = arith.addf %436, %442 : vector<16x16xf32>
    %c76 = arith.constant 76 : index
    %444 = memref.load %arg2[%c76] : memref<144xf32, #tpu.memory_space<smem>>
    %445 = vector.extract_strided_slice %438 {offsets = [0, 1], sizes = [16, 16], strides = [1, 1]} : vector<16x18xf32> to vector<16x16xf32>
    %446 = vector.broadcast %444 : f32 to vector<16x16xf32>
    %447 = arith.mulf %446, %445 : vector<16x16xf32>
    %448 = arith.addf %443, %447 : vector<16x16xf32>
    %c77 = arith.constant 77 : index
    %449 = memref.load %arg2[%c77] : memref<144xf32, #tpu.memory_space<smem>>
    %450 = vector.extract_strided_slice %438 {offsets = [0, 2], sizes = [16, 16], strides = [1, 1]} : vector<16x18xf32> to vector<16x16xf32>
    %451 = vector.broadcast %449 : f32 to vector<16x16xf32>
    %452 = arith.mulf %451, %450 : vector<16x16xf32>
    %453 = arith.addf %448, %452 : vector<16x16xf32>
    %c0_141 = arith.constant 0 : index
    %c0_142 = arith.constant 0 : index
    %c0_143 = arith.constant 0 : index
    %c2_144 = arith.constant 2 : index
    %c0_145 = arith.constant 0 : index
    %454 = vector.load %arg4[%c0_141, %c0_142, %c0_143, %c2_144, %c0_145] : memref<1x1x4x18x18xf32, #tpu.memory_space<vmem>>, vector<1x1x1x16x18xf32>
    %455 = vector.shape_cast %454 : vector<1x1x1x16x18xf32> to vector<16x18xf32>
    %c78 = arith.constant 78 : index
    %456 = memref.load %arg2[%c78] : memref<144xf32, #tpu.memory_space<smem>>
    %457 = vector.extract_strided_slice %455 {offsets = [0, 0], sizes = [16, 16], strides = [1, 1]} : vector<16x18xf32> to vector<16x16xf32>
    %458 = vector.broadcast %456 : f32 to vector<16x16xf32>
    %459 = arith.mulf %458, %457 : vector<16x16xf32>
    %460 = arith.addf %453, %459 : vector<16x16xf32>
    %c79 = arith.constant 79 : index
    %461 = memref.load %arg2[%c79] : memref<144xf32, #tpu.memory_space<smem>>
    %462 = vector.extract_strided_slice %455 {offsets = [0, 1], sizes = [16, 16], strides = [1, 1]} : vector<16x18xf32> to vector<16x16xf32>
    %463 = vector.broadcast %461 : f32 to vector<16x16xf32>
    %464 = arith.mulf %463, %462 : vector<16x16xf32>
    %465 = arith.addf %460, %464 : vector<16x16xf32>
    %c80 = arith.constant 80 : index
    %466 = memref.load %arg2[%c80] : memref<144xf32, #tpu.memory_space<smem>>
    %467 = vector.extract_strided_slice %455 {offsets = [0, 2], sizes = [16, 16], strides = [1, 1]} : vector<16x18xf32> to vector<16x16xf32>
    %468 = vector.broadcast %466 : f32 to vector<16x16xf32>
    %469 = arith.mulf %468, %467 : vector<16x16xf32>
    %470 = arith.addf %465, %469 : vector<16x16xf32>
    %c0_146 = arith.constant 0 : index
    %c0_147 = arith.constant 0 : index
    %c1_148 = arith.constant 1 : index
    %c0_149 = arith.constant 0 : index
    %c0_150 = arith.constant 0 : index
    %471 = vector.load %arg4[%c0_146, %c0_147, %c1_148, %c0_149, %c0_150] : memref<1x1x4x18x18xf32, #tpu.memory_space<vmem>>, vector<1x1x1x16x18xf32>
    %472 = vector.shape_cast %471 : vector<1x1x1x16x18xf32> to vector<16x18xf32>
    %c81 = arith.constant 81 : index
    %473 = memref.load %arg2[%c81] : memref<144xf32, #tpu.memory_space<smem>>
    %474 = vector.extract_strided_slice %472 {offsets = [0, 0], sizes = [16, 16], strides = [1, 1]} : vector<16x18xf32> to vector<16x16xf32>
    %475 = vector.broadcast %473 : f32 to vector<16x16xf32>
    %476 = arith.mulf %475, %474 : vector<16x16xf32>
    %477 = arith.addf %470, %476 : vector<16x16xf32>
    %c82 = arith.constant 82 : index
    %478 = memref.load %arg2[%c82] : memref<144xf32, #tpu.memory_space<smem>>
    %479 = vector.extract_strided_slice %472 {offsets = [0, 1], sizes = [16, 16], strides = [1, 1]} : vector<16x18xf32> to vector<16x16xf32>
    %480 = vector.broadcast %478 : f32 to vector<16x16xf32>
    %481 = arith.mulf %480, %479 : vector<16x16xf32>
    %482 = arith.addf %477, %481 : vector<16x16xf32>
    %c83 = arith.constant 83 : index
    %483 = memref.load %arg2[%c83] : memref<144xf32, #tpu.memory_space<smem>>
    %484 = vector.extract_strided_slice %472 {offsets = [0, 2], sizes = [16, 16], strides = [1, 1]} : vector<16x18xf32> to vector<16x16xf32>
    %485 = vector.broadcast %483 : f32 to vector<16x16xf32>
    %486 = arith.mulf %485, %484 : vector<16x16xf32>
    %487 = arith.addf %482, %486 : vector<16x16xf32>
    %c0_151 = arith.constant 0 : index
    %c0_152 = arith.constant 0 : index
    %c1_153 = arith.constant 1 : index
    %c1_154 = arith.constant 1 : index
    %c0_155 = arith.constant 0 : index
    %488 = vector.load %arg4[%c0_151, %c0_152, %c1_153, %c1_154, %c0_155] : memref<1x1x4x18x18xf32, #tpu.memory_space<vmem>>, vector<1x1x1x16x18xf32>
    %489 = vector.shape_cast %488 : vector<1x1x1x16x18xf32> to vector<16x18xf32>
    %c84 = arith.constant 84 : index
    %490 = memref.load %arg2[%c84] : memref<144xf32, #tpu.memory_space<smem>>
    %491 = vector.extract_strided_slice %489 {offsets = [0, 0], sizes = [16, 16], strides = [1, 1]} : vector<16x18xf32> to vector<16x16xf32>
    %492 = vector.broadcast %490 : f32 to vector<16x16xf32>
    %493 = arith.mulf %492, %491 : vector<16x16xf32>
    %494 = arith.addf %487, %493 : vector<16x16xf32>
    %c85 = arith.constant 85 : index
    %495 = memref.load %arg2[%c85] : memref<144xf32, #tpu.memory_space<smem>>
    %496 = vector.extract_strided_slice %489 {offsets = [0, 1], sizes = [16, 16], strides = [1, 1]} : vector<16x18xf32> to vector<16x16xf32>
    %497 = vector.broadcast %495 : f32 to vector<16x16xf32>
    %498 = arith.mulf %497, %496 : vector<16x16xf32>
    %499 = arith.addf %494, %498 : vector<16x16xf32>
    %c86 = arith.constant 86 : index
    %500 = memref.load %arg2[%c86] : memref<144xf32, #tpu.memory_space<smem>>
    %501 = vector.extract_strided_slice %489 {offsets = [0, 2], sizes = [16, 16], strides = [1, 1]} : vector<16x18xf32> to vector<16x16xf32>
    %502 = vector.broadcast %500 : f32 to vector<16x16xf32>
    %503 = arith.mulf %502, %501 : vector<16x16xf32>
    %504 = arith.addf %499, %503 : vector<16x16xf32>
    %c0_156 = arith.constant 0 : index
    %c0_157 = arith.constant 0 : index
    %c1_158 = arith.constant 1 : index
    %c2_159 = arith.constant 2 : index
    %c0_160 = arith.constant 0 : index
    %505 = vector.load %arg4[%c0_156, %c0_157, %c1_158, %c2_159, %c0_160] : memref<1x1x4x18x18xf32, #tpu.memory_space<vmem>>, vector<1x1x1x16x18xf32>
    %506 = vector.shape_cast %505 : vector<1x1x1x16x18xf32> to vector<16x18xf32>
    %c87 = arith.constant 87 : index
    %507 = memref.load %arg2[%c87] : memref<144xf32, #tpu.memory_space<smem>>
    %508 = vector.extract_strided_slice %506 {offsets = [0, 0], sizes = [16, 16], strides = [1, 1]} : vector<16x18xf32> to vector<16x16xf32>
    %509 = vector.broadcast %507 : f32 to vector<16x16xf32>
    %510 = arith.mulf %509, %508 : vector<16x16xf32>
    %511 = arith.addf %504, %510 : vector<16x16xf32>
    %c88 = arith.constant 88 : index
    %512 = memref.load %arg2[%c88] : memref<144xf32, #tpu.memory_space<smem>>
    %513 = vector.extract_strided_slice %506 {offsets = [0, 1], sizes = [16, 16], strides = [1, 1]} : vector<16x18xf32> to vector<16x16xf32>
    %514 = vector.broadcast %512 : f32 to vector<16x16xf32>
    %515 = arith.mulf %514, %513 : vector<16x16xf32>
    %516 = arith.addf %511, %515 : vector<16x16xf32>
    %c89 = arith.constant 89 : index
    %517 = memref.load %arg2[%c89] : memref<144xf32, #tpu.memory_space<smem>>
    %518 = vector.extract_strided_slice %506 {offsets = [0, 2], sizes = [16, 16], strides = [1, 1]} : vector<16x18xf32> to vector<16x16xf32>
    %519 = vector.broadcast %517 : f32 to vector<16x16xf32>
    %520 = arith.mulf %519, %518 : vector<16x16xf32>
    %521 = arith.addf %516, %520 : vector<16x16xf32>
    %c0_161 = arith.constant 0 : index
    %c0_162 = arith.constant 0 : index
    %c2_163 = arith.constant 2 : index
    %c0_164 = arith.constant 0 : index
    %c0_165 = arith.constant 0 : index
    %522 = vector.load %arg4[%c0_161, %c0_162, %c2_163, %c0_164, %c0_165] : memref<1x1x4x18x18xf32, #tpu.memory_space<vmem>>, vector<1x1x1x16x18xf32>
    %523 = vector.shape_cast %522 : vector<1x1x1x16x18xf32> to vector<16x18xf32>
    %c90 = arith.constant 90 : index
    %524 = memref.load %arg2[%c90] : memref<144xf32, #tpu.memory_space<smem>>
    %525 = vector.extract_strided_slice %523 {offsets = [0, 0], sizes = [16, 16], strides = [1, 1]} : vector<16x18xf32> to vector<16x16xf32>
    %526 = vector.broadcast %524 : f32 to vector<16x16xf32>
    %527 = arith.mulf %526, %525 : vector<16x16xf32>
    %528 = arith.addf %521, %527 : vector<16x16xf32>
    %c91 = arith.constant 91 : index
    %529 = memref.load %arg2[%c91] : memref<144xf32, #tpu.memory_space<smem>>
    %530 = vector.extract_strided_slice %523 {offsets = [0, 1], sizes = [16, 16], strides = [1, 1]} : vector<16x18xf32> to vector<16x16xf32>
    %531 = vector.broadcast %529 : f32 to vector<16x16xf32>
    %532 = arith.mulf %531, %530 : vector<16x16xf32>
    %533 = arith.addf %528, %532 : vector<16x16xf32>
    %c92 = arith.constant 92 : index
    %534 = memref.load %arg2[%c92] : memref<144xf32, #tpu.memory_space<smem>>
    %535 = vector.extract_strided_slice %523 {offsets = [0, 2], sizes = [16, 16], strides = [1, 1]} : vector<16x18xf32> to vector<16x16xf32>
    %536 = vector.broadcast %534 : f32 to vector<16x16xf32>
    %537 = arith.mulf %536, %535 : vector<16x16xf32>
    %538 = arith.addf %533, %537 : vector<16x16xf32>
    %c0_166 = arith.constant 0 : index
    %c0_167 = arith.constant 0 : index
    %c2_168 = arith.constant 2 : index
    %c1_169 = arith.constant 1 : index
    %c0_170 = arith.constant 0 : index
    %539 = vector.load %arg4[%c0_166, %c0_167, %c2_168, %c1_169, %c0_170] : memref<1x1x4x18x18xf32, #tpu.memory_space<vmem>>, vector<1x1x1x16x18xf32>
    %540 = vector.shape_cast %539 : vector<1x1x1x16x18xf32> to vector<16x18xf32>
    %c93 = arith.constant 93 : index
    %541 = memref.load %arg2[%c93] : memref<144xf32, #tpu.memory_space<smem>>
    %542 = vector.extract_strided_slice %540 {offsets = [0, 0], sizes = [16, 16], strides = [1, 1]} : vector<16x18xf32> to vector<16x16xf32>
    %543 = vector.broadcast %541 : f32 to vector<16x16xf32>
    %544 = arith.mulf %543, %542 : vector<16x16xf32>
    %545 = arith.addf %538, %544 : vector<16x16xf32>
    %c94 = arith.constant 94 : index
    %546 = memref.load %arg2[%c94] : memref<144xf32, #tpu.memory_space<smem>>
    %547 = vector.extract_strided_slice %540 {offsets = [0, 1], sizes = [16, 16], strides = [1, 1]} : vector<16x18xf32> to vector<16x16xf32>
    %548 = vector.broadcast %546 : f32 to vector<16x16xf32>
    %549 = arith.mulf %548, %547 : vector<16x16xf32>
    %550 = arith.addf %545, %549 : vector<16x16xf32>
    %c95 = arith.constant 95 : index
    %551 = memref.load %arg2[%c95] : memref<144xf32, #tpu.memory_space<smem>>
    %552 = vector.extract_strided_slice %540 {offsets = [0, 2], sizes = [16, 16], strides = [1, 1]} : vector<16x18xf32> to vector<16x16xf32>
    %553 = vector.broadcast %551 : f32 to vector<16x16xf32>
    %554 = arith.mulf %553, %552 : vector<16x16xf32>
    %555 = arith.addf %550, %554 : vector<16x16xf32>
    %c0_171 = arith.constant 0 : index
    %c0_172 = arith.constant 0 : index
    %c2_173 = arith.constant 2 : index
    %c2_174 = arith.constant 2 : index
    %c0_175 = arith.constant 0 : index
    %556 = vector.load %arg4[%c0_171, %c0_172, %c2_173, %c2_174, %c0_175] : memref<1x1x4x18x18xf32, #tpu.memory_space<vmem>>, vector<1x1x1x16x18xf32>
    %557 = vector.shape_cast %556 : vector<1x1x1x16x18xf32> to vector<16x18xf32>
    %c96 = arith.constant 96 : index
    %558 = memref.load %arg2[%c96] : memref<144xf32, #tpu.memory_space<smem>>
    %559 = vector.extract_strided_slice %557 {offsets = [0, 0], sizes = [16, 16], strides = [1, 1]} : vector<16x18xf32> to vector<16x16xf32>
    %560 = vector.broadcast %558 : f32 to vector<16x16xf32>
    %561 = arith.mulf %560, %559 : vector<16x16xf32>
    %562 = arith.addf %555, %561 : vector<16x16xf32>
    %c97 = arith.constant 97 : index
    %563 = memref.load %arg2[%c97] : memref<144xf32, #tpu.memory_space<smem>>
    %564 = vector.extract_strided_slice %557 {offsets = [0, 1], sizes = [16, 16], strides = [1, 1]} : vector<16x18xf32> to vector<16x16xf32>
    %565 = vector.broadcast %563 : f32 to vector<16x16xf32>
    %566 = arith.mulf %565, %564 : vector<16x16xf32>
    %567 = arith.addf %562, %566 : vector<16x16xf32>
    %c98 = arith.constant 98 : index
    %568 = memref.load %arg2[%c98] : memref<144xf32, #tpu.memory_space<smem>>
    %569 = vector.extract_strided_slice %557 {offsets = [0, 2], sizes = [16, 16], strides = [1, 1]} : vector<16x18xf32> to vector<16x16xf32>
    %570 = vector.broadcast %568 : f32 to vector<16x16xf32>
    %571 = arith.mulf %570, %569 : vector<16x16xf32>
    %572 = arith.addf %567, %571 : vector<16x16xf32>
    %c0_176 = arith.constant 0 : index
    %c0_177 = arith.constant 0 : index
    %c3_178 = arith.constant 3 : index
    %c0_179 = arith.constant 0 : index
    %c0_180 = arith.constant 0 : index
    %573 = vector.load %arg4[%c0_176, %c0_177, %c3_178, %c0_179, %c0_180] : memref<1x1x4x18x18xf32, #tpu.memory_space<vmem>>, vector<1x1x1x16x18xf32>
    %574 = vector.shape_cast %573 : vector<1x1x1x16x18xf32> to vector<16x18xf32>
    %c99 = arith.constant 99 : index
    %575 = memref.load %arg2[%c99] : memref<144xf32, #tpu.memory_space<smem>>
    %576 = vector.extract_strided_slice %574 {offsets = [0, 0], sizes = [16, 16], strides = [1, 1]} : vector<16x18xf32> to vector<16x16xf32>
    %577 = vector.broadcast %575 : f32 to vector<16x16xf32>
    %578 = arith.mulf %577, %576 : vector<16x16xf32>
    %579 = arith.addf %572, %578 : vector<16x16xf32>
    %c100 = arith.constant 100 : index
    %580 = memref.load %arg2[%c100] : memref<144xf32, #tpu.memory_space<smem>>
    %581 = vector.extract_strided_slice %574 {offsets = [0, 1], sizes = [16, 16], strides = [1, 1]} : vector<16x18xf32> to vector<16x16xf32>
    %582 = vector.broadcast %580 : f32 to vector<16x16xf32>
    %583 = arith.mulf %582, %581 : vector<16x16xf32>
    %584 = arith.addf %579, %583 : vector<16x16xf32>
    %c101 = arith.constant 101 : index
    %585 = memref.load %arg2[%c101] : memref<144xf32, #tpu.memory_space<smem>>
    %586 = vector.extract_strided_slice %574 {offsets = [0, 2], sizes = [16, 16], strides = [1, 1]} : vector<16x18xf32> to vector<16x16xf32>
    %587 = vector.broadcast %585 : f32 to vector<16x16xf32>
    %588 = arith.mulf %587, %586 : vector<16x16xf32>
    %589 = arith.addf %584, %588 : vector<16x16xf32>
    %c0_181 = arith.constant 0 : index
    %c0_182 = arith.constant 0 : index
    %c3_183 = arith.constant 3 : index
    %c1_184 = arith.constant 1 : index
    %c0_185 = arith.constant 0 : index
    %590 = vector.load %arg4[%c0_181, %c0_182, %c3_183, %c1_184, %c0_185] : memref<1x1x4x18x18xf32, #tpu.memory_space<vmem>>, vector<1x1x1x16x18xf32>
    %591 = vector.shape_cast %590 : vector<1x1x1x16x18xf32> to vector<16x18xf32>
    %c102 = arith.constant 102 : index
    %592 = memref.load %arg2[%c102] : memref<144xf32, #tpu.memory_space<smem>>
    %593 = vector.extract_strided_slice %591 {offsets = [0, 0], sizes = [16, 16], strides = [1, 1]} : vector<16x18xf32> to vector<16x16xf32>
    %594 = vector.broadcast %592 : f32 to vector<16x16xf32>
    %595 = arith.mulf %594, %593 : vector<16x16xf32>
    %596 = arith.addf %589, %595 : vector<16x16xf32>
    %c103 = arith.constant 103 : index
    %597 = memref.load %arg2[%c103] : memref<144xf32, #tpu.memory_space<smem>>
    %598 = vector.extract_strided_slice %591 {offsets = [0, 1], sizes = [16, 16], strides = [1, 1]} : vector<16x18xf32> to vector<16x16xf32>
    %599 = vector.broadcast %597 : f32 to vector<16x16xf32>
    %600 = arith.mulf %599, %598 : vector<16x16xf32>
    %601 = arith.addf %596, %600 : vector<16x16xf32>
    %c104 = arith.constant 104 : index
    %602 = memref.load %arg2[%c104] : memref<144xf32, #tpu.memory_space<smem>>
    %603 = vector.extract_strided_slice %591 {offsets = [0, 2], sizes = [16, 16], strides = [1, 1]} : vector<16x18xf32> to vector<16x16xf32>
    %604 = vector.broadcast %602 : f32 to vector<16x16xf32>
    %605 = arith.mulf %604, %603 : vector<16x16xf32>
    %606 = arith.addf %601, %605 : vector<16x16xf32>
    %c0_186 = arith.constant 0 : index
    %c0_187 = arith.constant 0 : index
    %c3_188 = arith.constant 3 : index
    %c2_189 = arith.constant 2 : index
    %c0_190 = arith.constant 0 : index
    %607 = vector.load %arg4[%c0_186, %c0_187, %c3_188, %c2_189, %c0_190] : memref<1x1x4x18x18xf32, #tpu.memory_space<vmem>>, vector<1x1x1x16x18xf32>
    %608 = vector.shape_cast %607 : vector<1x1x1x16x18xf32> to vector<16x18xf32>
    %c105 = arith.constant 105 : index
    %609 = memref.load %arg2[%c105] : memref<144xf32, #tpu.memory_space<smem>>
    %610 = vector.extract_strided_slice %608 {offsets = [0, 0], sizes = [16, 16], strides = [1, 1]} : vector<16x18xf32> to vector<16x16xf32>
    %611 = vector.broadcast %609 : f32 to vector<16x16xf32>
    %612 = arith.mulf %611, %610 : vector<16x16xf32>
    %613 = arith.addf %606, %612 : vector<16x16xf32>
    %c106 = arith.constant 106 : index
    %614 = memref.load %arg2[%c106] : memref<144xf32, #tpu.memory_space<smem>>
    %615 = vector.extract_strided_slice %608 {offsets = [0, 1], sizes = [16, 16], strides = [1, 1]} : vector<16x18xf32> to vector<16x16xf32>
    %616 = vector.broadcast %614 : f32 to vector<16x16xf32>
    %617 = arith.mulf %616, %615 : vector<16x16xf32>
    %618 = arith.addf %613, %617 : vector<16x16xf32>
    %c107 = arith.constant 107 : index
    %619 = memref.load %arg2[%c107] : memref<144xf32, #tpu.memory_space<smem>>
    %620 = vector.extract_strided_slice %608 {offsets = [0, 2], sizes = [16, 16], strides = [1, 1]} : vector<16x18xf32> to vector<16x16xf32>
    %621 = vector.broadcast %619 : f32 to vector<16x16xf32>
    %622 = arith.mulf %621, %620 : vector<16x16xf32>
    %623 = arith.addf %618, %622 : vector<16x16xf32>
    %c0_191 = arith.constant 0 : index
    %c2_192 = arith.constant 2 : index
    %c0_193 = arith.constant 0 : index
    %c0_194 = arith.constant 0 : index
    %624 = vector.load %arg5[%c0_191, %c2_192, %c0_193, %c0_194] : memref<1x4x16x16xf32, #tpu.memory_space<vmem>>, vector<1x1x16x16xf32>
    %625 = vector.shape_cast %624 : vector<1x1x16x16xf32> to vector<16x16xf32>
    %626 = vector.shape_cast %623 : vector<16x16xf32> to vector<1x1x16x16xf32>
    tpu.vector_store %arg5[%c0_191, %c2_192, %c0_193, %c0_194], %626 {strides = array<i32>} : memref<1x4x16x16xf32, #tpu.memory_space<vmem>>, vector<1x1x16x16xf32>,
    %c3_195 = arith.constant 3 : index
    %627 = memref.load %arg3[%c3_195] : memref<4xf32, #tpu.memory_space<smem>>
    %628 = vector.broadcast %627 : f32 to vector<16x16xf32>
    %c0_196 = arith.constant 0 : index
    %c0_197 = arith.constant 0 : index
    %c0_198 = arith.constant 0 : index
    %c0_199 = arith.constant 0 : index
    %c0_200 = arith.constant 0 : index
    %629 = vector.load %arg4[%c0_196, %c0_197, %c0_198, %c0_199, %c0_200] : memref<1x1x4x18x18xf32, #tpu.memory_space<vmem>>, vector<1x1x1x16x18xf32>
    %630 = vector.shape_cast %629 : vector<1x1x1x16x18xf32> to vector<16x18xf32>
    %c108 = arith.constant 108 : index
    %631 = memref.load %arg2[%c108] : memref<144xf32, #tpu.memory_space<smem>>
    %632 = vector.extract_strided_slice %630 {offsets = [0, 0], sizes = [16, 16], strides = [1, 1]} : vector<16x18xf32> to vector<16x16xf32>
    %633 = vector.broadcast %631 : f32 to vector<16x16xf32>
    %634 = arith.mulf %633, %632 : vector<16x16xf32>
    %635 = arith.addf %628, %634 : vector<16x16xf32>
    %c109 = arith.constant 109 : index
    %636 = memref.load %arg2[%c109] : memref<144xf32, #tpu.memory_space<smem>>
    %637 = vector.extract_strided_slice %630 {offsets = [0, 1], sizes = [16, 16], strides = [1, 1]} : vector<16x18xf32> to vector<16x16xf32>
    %638 = vector.broadcast %636 : f32 to vector<16x16xf32>
    %639 = arith.mulf %638, %637 : vector<16x16xf32>
    %640 = arith.addf %635, %639 : vector<16x16xf32>
    %c110 = arith.constant 110 : index
    %641 = memref.load %arg2[%c110] : memref<144xf32, #tpu.memory_space<smem>>
    %642 = vector.extract_strided_slice %630 {offsets = [0, 2], sizes = [16, 16], strides = [1, 1]} : vector<16x18xf32> to vector<16x16xf32>
    %643 = vector.broadcast %641 : f32 to vector<16x16xf32>
    %644 = arith.mulf %643, %642 : vector<16x16xf32>
    %645 = arith.addf %640, %644 : vector<16x16xf32>
    %c0_201 = arith.constant 0 : index
    %c0_202 = arith.constant 0 : index
    %c0_203 = arith.constant 0 : index
    %c1_204 = arith.constant 1 : index
    %c0_205 = arith.constant 0 : index
    %646 = vector.load %arg4[%c0_201, %c0_202, %c0_203, %c1_204, %c0_205] : memref<1x1x4x18x18xf32, #tpu.memory_space<vmem>>, vector<1x1x1x16x18xf32>
    %647 = vector.shape_cast %646 : vector<1x1x1x16x18xf32> to vector<16x18xf32>
    %c111 = arith.constant 111 : index
    %648 = memref.load %arg2[%c111] : memref<144xf32, #tpu.memory_space<smem>>
    %649 = vector.extract_strided_slice %647 {offsets = [0, 0], sizes = [16, 16], strides = [1, 1]} : vector<16x18xf32> to vector<16x16xf32>
    %650 = vector.broadcast %648 : f32 to vector<16x16xf32>
    %651 = arith.mulf %650, %649 : vector<16x16xf32>
    %652 = arith.addf %645, %651 : vector<16x16xf32>
    %c112 = arith.constant 112 : index
    %653 = memref.load %arg2[%c112] : memref<144xf32, #tpu.memory_space<smem>>
    %654 = vector.extract_strided_slice %647 {offsets = [0, 1], sizes = [16, 16], strides = [1, 1]} : vector<16x18xf32> to vector<16x16xf32>
    %655 = vector.broadcast %653 : f32 to vector<16x16xf32>
    %656 = arith.mulf %655, %654 : vector<16x16xf32>
    %657 = arith.addf %652, %656 : vector<16x16xf32>
    %c113 = arith.constant 113 : index
    %658 = memref.load %arg2[%c113] : memref<144xf32, #tpu.memory_space<smem>>
    %659 = vector.extract_strided_slice %647 {offsets = [0, 2], sizes = [16, 16], strides = [1, 1]} : vector<16x18xf32> to vector<16x16xf32>
    %660 = vector.broadcast %658 : f32 to vector<16x16xf32>
    %661 = arith.mulf %660, %659 : vector<16x16xf32>
    %662 = arith.addf %657, %661 : vector<16x16xf32>
    %c0_206 = arith.constant 0 : index
    %c0_207 = arith.constant 0 : index
    %c0_208 = arith.constant 0 : index
    %c2_209 = arith.constant 2 : index
    %c0_210 = arith.constant 0 : index
    %663 = vector.load %arg4[%c0_206, %c0_207, %c0_208, %c2_209, %c0_210] : memref<1x1x4x18x18xf32, #tpu.memory_space<vmem>>, vector<1x1x1x16x18xf32>
    %664 = vector.shape_cast %663 : vector<1x1x1x16x18xf32> to vector<16x18xf32>
    %c114 = arith.constant 114 : index
    %665 = memref.load %arg2[%c114] : memref<144xf32, #tpu.memory_space<smem>>
    %666 = vector.extract_strided_slice %664 {offsets = [0, 0], sizes = [16, 16], strides = [1, 1]} : vector<16x18xf32> to vector<16x16xf32>
    %667 = vector.broadcast %665 : f32 to vector<16x16xf32>
    %668 = arith.mulf %667, %666 : vector<16x16xf32>
    %669 = arith.addf %662, %668 : vector<16x16xf32>
    %c115 = arith.constant 115 : index
    %670 = memref.load %arg2[%c115] : memref<144xf32, #tpu.memory_space<smem>>
    %671 = vector.extract_strided_slice %664 {offsets = [0, 1], sizes = [16, 16], strides = [1, 1]} : vector<16x18xf32> to vector<16x16xf32>
    %672 = vector.broadcast %670 : f32 to vector<16x16xf32>
    %673 = arith.mulf %672, %671 : vector<16x16xf32>
    %674 = arith.addf %669, %673 : vector<16x16xf32>
    %c116 = arith.constant 116 : index
    %675 = memref.load %arg2[%c116] : memref<144xf32, #tpu.memory_space<smem>>
    %676 = vector.extract_strided_slice %664 {offsets = [0, 2], sizes = [16, 16], strides = [1, 1]} : vector<16x18xf32> to vector<16x16xf32>
    %677 = vector.broadcast %675 : f32 to vector<16x16xf32>
    %678 = arith.mulf %677, %676 : vector<16x16xf32>
    %679 = arith.addf %674, %678 : vector<16x16xf32>
    %c0_211 = arith.constant 0 : index
    %c0_212 = arith.constant 0 : index
    %c1_213 = arith.constant 1 : index
    %c0_214 = arith.constant 0 : index
    %c0_215 = arith.constant 0 : index
    %680 = vector.load %arg4[%c0_211, %c0_212, %c1_213, %c0_214, %c0_215] : memref<1x1x4x18x18xf32, #tpu.memory_space<vmem>>, vector<1x1x1x16x18xf32>
    %681 = vector.shape_cast %680 : vector<1x1x1x16x18xf32> to vector<16x18xf32>
    %c117 = arith.constant 117 : index
    %682 = memref.load %arg2[%c117] : memref<144xf32, #tpu.memory_space<smem>>
    %683 = vector.extract_strided_slice %681 {offsets = [0, 0], sizes = [16, 16], strides = [1, 1]} : vector<16x18xf32> to vector<16x16xf32>
    %684 = vector.broadcast %682 : f32 to vector<16x16xf32>
    %685 = arith.mulf %684, %683 : vector<16x16xf32>
    %686 = arith.addf %679, %685 : vector<16x16xf32>
    %c118 = arith.constant 118 : index
    %687 = memref.load %arg2[%c118] : memref<144xf32, #tpu.memory_space<smem>>
    %688 = vector.extract_strided_slice %681 {offsets = [0, 1], sizes = [16, 16], strides = [1, 1]} : vector<16x18xf32> to vector<16x16xf32>
    %689 = vector.broadcast %687 : f32 to vector<16x16xf32>
    %690 = arith.mulf %689, %688 : vector<16x16xf32>
    %691 = arith.addf %686, %690 : vector<16x16xf32>
    %c119 = arith.constant 119 : index
    %692 = memref.load %arg2[%c119] : memref<144xf32, #tpu.memory_space<smem>>
    %693 = vector.extract_strided_slice %681 {offsets = [0, 2], sizes = [16, 16], strides = [1, 1]} : vector<16x18xf32> to vector<16x16xf32>
    %694 = vector.broadcast %692 : f32 to vector<16x16xf32>
    %695 = arith.mulf %694, %693 : vector<16x16xf32>
    %696 = arith.addf %691, %695 : vector<16x16xf32>
    %c0_216 = arith.constant 0 : index
    %c0_217 = arith.constant 0 : index
    %c1_218 = arith.constant 1 : index
    %c1_219 = arith.constant 1 : index
    %c0_220 = arith.constant 0 : index
    %697 = vector.load %arg4[%c0_216, %c0_217, %c1_218, %c1_219, %c0_220] : memref<1x1x4x18x18xf32, #tpu.memory_space<vmem>>, vector<1x1x1x16x18xf32>
    %698 = vector.shape_cast %697 : vector<1x1x1x16x18xf32> to vector<16x18xf32>
    %c120 = arith.constant 120 : index
    %699 = memref.load %arg2[%c120] : memref<144xf32, #tpu.memory_space<smem>>
    %700 = vector.extract_strided_slice %698 {offsets = [0, 0], sizes = [16, 16], strides = [1, 1]} : vector<16x18xf32> to vector<16x16xf32>
    %701 = vector.broadcast %699 : f32 to vector<16x16xf32>
    %702 = arith.mulf %701, %700 : vector<16x16xf32>
    %703 = arith.addf %696, %702 : vector<16x16xf32>
    %c121 = arith.constant 121 : index
    %704 = memref.load %arg2[%c121] : memref<144xf32, #tpu.memory_space<smem>>
    %705 = vector.extract_strided_slice %698 {offsets = [0, 1], sizes = [16, 16], strides = [1, 1]} : vector<16x18xf32> to vector<16x16xf32>
    %706 = vector.broadcast %704 : f32 to vector<16x16xf32>
    %707 = arith.mulf %706, %705 : vector<16x16xf32>
    %708 = arith.addf %703, %707 : vector<16x16xf32>
    %c122 = arith.constant 122 : index
    %709 = memref.load %arg2[%c122] : memref<144xf32, #tpu.memory_space<smem>>
    %710 = vector.extract_strided_slice %698 {offsets = [0, 2], sizes = [16, 16], strides = [1, 1]} : vector<16x18xf32> to vector<16x16xf32>
    %711 = vector.broadcast %709 : f32 to vector<16x16xf32>
    %712 = arith.mulf %711, %710 : vector<16x16xf32>
    %713 = arith.addf %708, %712 : vector<16x16xf32>
    %c0_221 = arith.constant 0 : index
    %c0_222 = arith.constant 0 : index
    %c1_223 = arith.constant 1 : index
    %c2_224 = arith.constant 2 : index
    %c0_225 = arith.constant 0 : index
    %714 = vector.load %arg4[%c0_221, %c0_222, %c1_223, %c2_224, %c0_225] : memref<1x1x4x18x18xf32, #tpu.memory_space<vmem>>, vector<1x1x1x16x18xf32>
    %715 = vector.shape_cast %714 : vector<1x1x1x16x18xf32> to vector<16x18xf32>
    %c123 = arith.constant 123 : index
    %716 = memref.load %arg2[%c123] : memref<144xf32, #tpu.memory_space<smem>>
    %717 = vector.extract_strided_slice %715 {offsets = [0, 0], sizes = [16, 16], strides = [1, 1]} : vector<16x18xf32> to vector<16x16xf32>
    %718 = vector.broadcast %716 : f32 to vector<16x16xf32>
    %719 = arith.mulf %718, %717 : vector<16x16xf32>
    %720 = arith.addf %713, %719 : vector<16x16xf32>
    %c124 = arith.constant 124 : index
    %721 = memref.load %arg2[%c124] : memref<144xf32, #tpu.memory_space<smem>>
    %722 = vector.extract_strided_slice %715 {offsets = [0, 1], sizes = [16, 16], strides = [1, 1]} : vector<16x18xf32> to vector<16x16xf32>
    %723 = vector.broadcast %721 : f32 to vector<16x16xf32>
    %724 = arith.mulf %723, %722 : vector<16x16xf32>
    %725 = arith.addf %720, %724 : vector<16x16xf32>
    %c125 = arith.constant 125 : index
    %726 = memref.load %arg2[%c125] : memref<144xf32, #tpu.memory_space<smem>>
    %727 = vector.extract_strided_slice %715 {offsets = [0, 2], sizes = [16, 16], strides = [1, 1]} : vector<16x18xf32> to vector<16x16xf32>
    %728 = vector.broadcast %726 : f32 to vector<16x16xf32>
    %729 = arith.mulf %728, %727 : vector<16x16xf32>
    %730 = arith.addf %725, %729 : vector<16x16xf32>
    %c0_226 = arith.constant 0 : index
    %c0_227 = arith.constant 0 : index
    %c2_228 = arith.constant 2 : index
    %c0_229 = arith.constant 0 : index
    %c0_230 = arith.constant 0 : index
    %731 = vector.load %arg4[%c0_226, %c0_227, %c2_228, %c0_229, %c0_230] : memref<1x1x4x18x18xf32, #tpu.memory_space<vmem>>, vector<1x1x1x16x18xf32>
    %732 = vector.shape_cast %731 : vector<1x1x1x16x18xf32> to vector<16x18xf32>
    %c126 = arith.constant 126 : index
    %733 = memref.load %arg2[%c126] : memref<144xf32, #tpu.memory_space<smem>>
    %734 = vector.extract_strided_slice %732 {offsets = [0, 0], sizes = [16, 16], strides = [1, 1]} : vector<16x18xf32> to vector<16x16xf32>
    %735 = vector.broadcast %733 : f32 to vector<16x16xf32>
    %736 = arith.mulf %735, %734 : vector<16x16xf32>
    %737 = arith.addf %730, %736 : vector<16x16xf32>
    %c127 = arith.constant 127 : index
    %738 = memref.load %arg2[%c127] : memref<144xf32, #tpu.memory_space<smem>>
    %739 = vector.extract_strided_slice %732 {offsets = [0, 1], sizes = [16, 16], strides = [1, 1]} : vector<16x18xf32> to vector<16x16xf32>
    %740 = vector.broadcast %738 : f32 to vector<16x16xf32>
    %741 = arith.mulf %740, %739 : vector<16x16xf32>
    %742 = arith.addf %737, %741 : vector<16x16xf32>
    %c128 = arith.constant 128 : index
    %743 = memref.load %arg2[%c128] : memref<144xf32, #tpu.memory_space<smem>>
    %744 = vector.extract_strided_slice %732 {offsets = [0, 2], sizes = [16, 16], strides = [1, 1]} : vector<16x18xf32> to vector<16x16xf32>
    %745 = vector.broadcast %743 : f32 to vector<16x16xf32>
    %746 = arith.mulf %745, %744 : vector<16x16xf32>
    %747 = arith.addf %742, %746 : vector<16x16xf32>
    %c0_231 = arith.constant 0 : index
    %c0_232 = arith.constant 0 : index
    %c2_233 = arith.constant 2 : index
    %c1_234 = arith.constant 1 : index
    %c0_235 = arith.constant 0 : index
    %748 = vector.load %arg4[%c0_231, %c0_232, %c2_233, %c1_234, %c0_235] : memref<1x1x4x18x18xf32, #tpu.memory_space<vmem>>, vector<1x1x1x16x18xf32>
    %749 = vector.shape_cast %748 : vector<1x1x1x16x18xf32> to vector<16x18xf32>
    %c129 = arith.constant 129 : index
    %750 = memref.load %arg2[%c129] : memref<144xf32, #tpu.memory_space<smem>>
    %751 = vector.extract_strided_slice %749 {offsets = [0, 0], sizes = [16, 16], strides = [1, 1]} : vector<16x18xf32> to vector<16x16xf32>
    %752 = vector.broadcast %750 : f32 to vector<16x16xf32>
    %753 = arith.mulf %752, %751 : vector<16x16xf32>
    %754 = arith.addf %747, %753 : vector<16x16xf32>
    %c130 = arith.constant 130 : index
    %755 = memref.load %arg2[%c130] : memref<144xf32, #tpu.memory_space<smem>>
    %756 = vector.extract_strided_slice %749 {offsets = [0, 1], sizes = [16, 16], strides = [1, 1]} : vector<16x18xf32> to vector<16x16xf32>
    %757 = vector.broadcast %755 : f32 to vector<16x16xf32>
    %758 = arith.mulf %757, %756 : vector<16x16xf32>
    %759 = arith.addf %754, %758 : vector<16x16xf32>
    %c131 = arith.constant 131 : index
    %760 = memref.load %arg2[%c131] : memref<144xf32, #tpu.memory_space<smem>>
    %761 = vector.extract_strided_slice %749 {offsets = [0, 2], sizes = [16, 16], strides = [1, 1]} : vector<16x18xf32> to vector<16x16xf32>
    %762 = vector.broadcast %760 : f32 to vector<16x16xf32>
    %763 = arith.mulf %762, %761 : vector<16x16xf32>
    %764 = arith.addf %759, %763 : vector<16x16xf32>
    %c0_236 = arith.constant 0 : index
    %c0_237 = arith.constant 0 : index
    %c2_238 = arith.constant 2 : index
    %c2_239 = arith.constant 2 : index
    %c0_240 = arith.constant 0 : index
    %765 = vector.load %arg4[%c0_236, %c0_237, %c2_238, %c2_239, %c0_240] : memref<1x1x4x18x18xf32, #tpu.memory_space<vmem>>, vector<1x1x1x16x18xf32>
    %766 = vector.shape_cast %765 : vector<1x1x1x16x18xf32> to vector<16x18xf32>
    %c132 = arith.constant 132 : index
    %767 = memref.load %arg2[%c132] : memref<144xf32, #tpu.memory_space<smem>>
    %768 = vector.extract_strided_slice %766 {offsets = [0, 0], sizes = [16, 16], strides = [1, 1]} : vector<16x18xf32> to vector<16x16xf32>
    %769 = vector.broadcast %767 : f32 to vector<16x16xf32>
    %770 = arith.mulf %769, %768 : vector<16x16xf32>
    %771 = arith.addf %764, %770 : vector<16x16xf32>
    %c133 = arith.constant 133 : index
    %772 = memref.load %arg2[%c133] : memref<144xf32, #tpu.memory_space<smem>>
    %773 = vector.extract_strided_slice %766 {offsets = [0, 1], sizes = [16, 16], strides = [1, 1]} : vector<16x18xf32> to vector<16x16xf32>
    %774 = vector.broadcast %772 : f32 to vector<16x16xf32>
    %775 = arith.mulf %774, %773 : vector<16x16xf32>
    %776 = arith.addf %771, %775 : vector<16x16xf32>
    %c134 = arith.constant 134 : index
    %777 = memref.load %arg2[%c134] : memref<144xf32, #tpu.memory_space<smem>>
    %778 = vector.extract_strided_slice %766 {offsets = [0, 2], sizes = [16, 16], strides = [1, 1]} : vector<16x18xf32> to vector<16x16xf32>
    %779 = vector.broadcast %777 : f32 to vector<16x16xf32>
    %780 = arith.mulf %779, %778 : vector<16x16xf32>
    %781 = arith.addf %776, %780 : vector<16x16xf32>
    %c0_241 = arith.constant 0 : index
    %c0_242 = arith.constant 0 : index
    %c3_243 = arith.constant 3 : index
    %c0_244 = arith.constant 0 : index
    %c0_245 = arith.constant 0 : index
    %782 = vector.load %arg4[%c0_241, %c0_242, %c3_243, %c0_244, %c0_245] : memref<1x1x4x18x18xf32, #tpu.memory_space<vmem>>, vector<1x1x1x16x18xf32>
    %783 = vector.shape_cast %782 : vector<1x1x1x16x18xf32> to vector<16x18xf32>
    %c135 = arith.constant 135 : index
    %784 = memref.load %arg2[%c135] : memref<144xf32, #tpu.memory_space<smem>>
    %785 = vector.extract_strided_slice %783 {offsets = [0, 0], sizes = [16, 16], strides = [1, 1]} : vector<16x18xf32> to vector<16x16xf32>
    %786 = vector.broadcast %784 : f32 to vector<16x16xf32>
    %787 = arith.mulf %786, %785 : vector<16x16xf32>
    %788 = arith.addf %781, %787 : vector<16x16xf32>
    %c136 = arith.constant 136 : index
    %789 = memref.load %arg2[%c136] : memref<144xf32, #tpu.memory_space<smem>>
    %790 = vector.extract_strided_slice %783 {offsets = [0, 1], sizes = [16, 16], strides = [1, 1]} : vector<16x18xf32> to vector<16x16xf32>
    %791 = vector.broadcast %789 : f32 to vector<16x16xf32>
    %792 = arith.mulf %791, %790 : vector<16x16xf32>
    %793 = arith.addf %788, %792 : vector<16x16xf32>
    %c137 = arith.constant 137 : index
    %794 = memref.load %arg2[%c137] : memref<144xf32, #tpu.memory_space<smem>>
    %795 = vector.extract_strided_slice %783 {offsets = [0, 2], sizes = [16, 16], strides = [1, 1]} : vector<16x18xf32> to vector<16x16xf32>
    %796 = vector.broadcast %794 : f32 to vector<16x16xf32>
    %797 = arith.mulf %796, %795 : vector<16x16xf32>
    %798 = arith.addf %793, %797 : vector<16x16xf32>
    %c0_246 = arith.constant 0 : index
    %c0_247 = arith.constant 0 : index
    %c3_248 = arith.constant 3 : index
    %c1_249 = arith.constant 1 : index
    %c0_250 = arith.constant 0 : index
    %799 = vector.load %arg4[%c0_246, %c0_247, %c3_248, %c1_249, %c0_250] : memref<1x1x4x18x18xf32, #tpu.memory_space<vmem>>, vector<1x1x1x16x18xf32>
    %800 = vector.shape_cast %799 : vector<1x1x1x16x18xf32> to vector<16x18xf32>
    %c138 = arith.constant 138 : index
    %801 = memref.load %arg2[%c138] : memref<144xf32, #tpu.memory_space<smem>>
    %802 = vector.extract_strided_slice %800 {offsets = [0, 0], sizes = [16, 16], strides = [1, 1]} : vector<16x18xf32> to vector<16x16xf32>
    %803 = vector.broadcast %801 : f32 to vector<16x16xf32>
    %804 = arith.mulf %803, %802 : vector<16x16xf32>
    %805 = arith.addf %798, %804 : vector<16x16xf32>
    %c139 = arith.constant 139 : index
    %806 = memref.load %arg2[%c139] : memref<144xf32, #tpu.memory_space<smem>>
    %807 = vector.extract_strided_slice %800 {offsets = [0, 1], sizes = [16, 16], strides = [1, 1]} : vector<16x18xf32> to vector<16x16xf32>
    %808 = vector.broadcast %806 : f32 to vector<16x16xf32>
    %809 = arith.mulf %808, %807 : vector<16x16xf32>
    %810 = arith.addf %805, %809 : vector<16x16xf32>
    %c140 = arith.constant 140 : index
    %811 = memref.load %arg2[%c140] : memref<144xf32, #tpu.memory_space<smem>>
    %812 = vector.extract_strided_slice %800 {offsets = [0, 2], sizes = [16, 16], strides = [1, 1]} : vector<16x18xf32> to vector<16x16xf32>
    %813 = vector.broadcast %811 : f32 to vector<16x16xf32>
    %814 = arith.mulf %813, %812 : vector<16x16xf32>
    %815 = arith.addf %810, %814 : vector<16x16xf32>
    %c0_251 = arith.constant 0 : index
    %c0_252 = arith.constant 0 : index
    %c3_253 = arith.constant 3 : index
    %c2_254 = arith.constant 2 : index
    %c0_255 = arith.constant 0 : index
    %816 = vector.load %arg4[%c0_251, %c0_252, %c3_253, %c2_254, %c0_255] : memref<1x1x4x18x18xf32, #tpu.memory_space<vmem>>, vector<1x1x1x16x18xf32>
    %817 = vector.shape_cast %816 : vector<1x1x1x16x18xf32> to vector<16x18xf32>
    %c141 = arith.constant 141 : index
    %818 = memref.load %arg2[%c141] : memref<144xf32, #tpu.memory_space<smem>>
    %819 = vector.extract_strided_slice %817 {offsets = [0, 0], sizes = [16, 16], strides = [1, 1]} : vector<16x18xf32> to vector<16x16xf32>
    %820 = vector.broadcast %818 : f32 to vector<16x16xf32>
    %821 = arith.mulf %820, %819 : vector<16x16xf32>
    %822 = arith.addf %815, %821 : vector<16x16xf32>
    %c142 = arith.constant 142 : index
    %823 = memref.load %arg2[%c142] : memref<144xf32, #tpu.memory_space<smem>>
    %824 = vector.extract_strided_slice %817 {offsets = [0, 1], sizes = [16, 16], strides = [1, 1]} : vector<16x18xf32> to vector<16x16xf32>
    %825 = vector.broadcast %823 : f32 to vector<16x16xf32>
    %826 = arith.mulf %825, %824 : vector<16x16xf32>
    %827 = arith.addf %822, %826 : vector<16x16xf32>
    %c143 = arith.constant 143 : index
    %828 = memref.load %arg2[%c143] : memref<144xf32, #tpu.memory_space<smem>>
    %829 = vector.extract_strided_slice %817 {offsets = [0, 2], sizes = [16, 16], strides = [1, 1]} : vector<16x18xf32> to vector<16x16xf32>
    %830 = vector.broadcast %828 : f32 to vector<16x16xf32>
    %831 = arith.mulf %830, %829 : vector<16x16xf32>
    %832 = arith.addf %827, %831 : vector<16x16xf32>
    %c0_256 = arith.constant 0 : index
    %c3_257 = arith.constant 3 : index
    %c0_258 = arith.constant 0 : index
    %c0_259 = arith.constant 0 : index
    %833 = vector.load %arg5[%c0_256, %c3_257, %c0_258, %c0_259] : memref<1x4x16x16xf32, #tpu.memory_space<vmem>>, vector<1x1x16x16xf32>
    %834 = vector.shape_cast %833 : vector<1x1x16x16xf32> to vector<16x16xf32>
    %835 = vector.shape_cast %832 : vector<16x16xf32> to vector<1x1x16x16xf32>
    tpu.vector_store %arg5[%c0_256, %c3_257, %c0_258, %c0_259], %835 {strides = array<i32>} : memref<1x4x16x16xf32, #tpu.memory_space<vmem>>, vector<1x1x16x16xf32>,
    return
  }
  func.func @transform_0(%arg0: i32, %arg1: i32) -> i32 {
    %c0_i32 = arith.constant 0 : i32
    %c0_i32_0 = arith.constant 0 : i32
    return %c0_i32 : i32
  }
  func.func @transform_1(%arg0: i32, %arg1: i32) -> i32 {
    %c0_i32 = arith.constant 0 : i32
    %c0_i32_0 = arith.constant 0 : i32
    return %c0_i32 : i32
  }
  func.func @transform_2(%arg0: i32, %arg1: i32) -> (i32, i32, i32, i32, i32) {
    %c0_i32 = arith.constant 0 : i32
    %c0_i32_0 = arith.constant 0 : i32
    %c0_i32_1 = arith.constant 0 : i32
    %c0_i32_2 = arith.constant 0 : i32
    return %arg0, %arg1, %c0_i32, %c0_i32_0, %c0_i32_1 : i32, i32, i32, i32, i32
  }
  func.func @transform_3(%arg0: i32, %arg1: i32) -> (i32, i32, i32, i32) {
    %c0_i32 = arith.constant 0 : i32
    %c0_i32_0 = arith.constant 0 : i32
    %c0_i32_1 = arith.constant 0 : i32
    return %arg0, %c0_i32, %arg1, %c0_i32_0 : i32, i32, i32, i32
  }
}

</mosaic_0001>

<bundles_post_ra>
// kernel: synthesis_residual_layer.1
= control target key start
LH: loop header
LB: loop body
LE: loop exit
PB: predicated region body
PF: predicated region fallthrough
CT: control target
= control target key end

     0   :  { %8 = vsyncpa [#allocation4], 0  ;;  %s3731_s0 = inlined_call_operand.vmem [shape: f32[144], index: 0, kind: input, shape index: {}]   ;;  %s3732_s1 = inlined_call_operand.vmem [shape: f32[4], index: 1, kind: input, shape index: {}]   ;;  %s3733_s2 = inlined_call_operand.vmem [shape: f32[2,1,4,18,18], index: 2, kind: input, shape index: {}]   ;;  %s3734_s3 = inlined_call_operand.hbm [shape: f32[2,4,16,16], index: 3, kind: output, shape index: {}]  }
   0x1   :  { %9 = vsyncpa [#allocation6], 0 }
   0x2   :  { %10 = vsyncpa [#allocation3], 0 }
   0x3   :  { %12 = vsyncpa [#allocation3 + $0x1], 0  ;;  %s2597_s12 = smov 0   ;;  %s2599_s13 = smov 0  }
   0x4   :  { %s2601_s14 = smov 0   ;;  %s2603_s15 = smov 0  }
   0x5   :  { %s2605_s16 = smov 0   ;;  %s2607_s17 = smov 0  }
   0x6 LB: > { %s2096_s18 = sadd.s32 4294967295, %s2568_s17   ;;  %s2097_s19 = sadd.s32 4294967294, %s2568_s17   ;;  %s2568_s17 = sphi %s2607_s17, %s18_s17   ;;  %s2564_s16 = sphi %s2605_s16, %s3752_s16   ;;  %s2560_s15 = sphi %s2603_s15, %s3751_s15   ;;  %s2556_s14 = sphi %s2601_s14, %s3750_s14   ;;  %s2552_s13 = sphi %s2599_s13, %s3749_s13   ;;  %s2548_s12 = sphi %s2597_s12, %s3748_s12  }
   0x7   : > { %s30_s20 = sadd.s32 1, %s2564_s16  ;;  %s109_s21 = sadd.s32 1, %s2556_s14 }
   0x8   : > { %p32_p0 = scmp.ge.s32.totalorder %s30_s20, 2  ;;  %p119_p1 = scmp.ne.s32.totalorder %s2556_s14, %s2552_s13 }
   0x9   : > { %p120_p2 = scmp.eq.s32.totalorder %s2096_s18, 1  ;;  %p125_p3 = scmp.ne.s32.totalorder %s2552_s13, %s2548_s12 }
   0xa   : > { %s3754_s20 = smov (%p32_p0, %s30_s20), 0  ;;  %p126_p5 = scmp.eq.s32.totalorder %s2097_s19, 1 }
   0xb   : > { %p2637_p4 = por %p120_p2, %p119_p1  ;;  %s104_s23 = ssub.s32 %s2564_s16, %s3754_s20 }
   0xc   : > { %p2098_p6 = scmp.ge.s32.totalorder %s2568_s17, 1  ;;  %p107_p7 = scmp.eq.s32.totalorder %s104_s23, 0 }
   0xd   : > { %s3739_s22 = scalar_select %p2637_p4, 1, 0 }
   0xe   : > { %p2644_p8 = por %p126_p5, %p125_p3  ;;  %p133_p9 = scmp.lt.s32.totalorder %s2568_s17, 3 }
   0xf   : > { %s2650_s25 = scalar_select %p107_p7, %s2556_s14, %s109_s21  }
  0x10   : > { %s3740_s24 = scalar_select %p2644_p8, 1, 0 }
  0x11   : > { %p2652_p10 = pnand %p2098_p6, %p133_p9  ;;  %p2656_p11 = scmp.eq.s32.totalorder %s2096_s18, 0 }
  0x12   : > { %s146_s30 = sshll.u32 %s3731_s0, 4  ;;  %s157_s6 = sshll.u32 %s3732_s1, 4  ;;  %s147_s30 = int_to_ptr.vmem [resolvable:$true] %s146_s30  ;;  %s158_s6 = int_to_ptr.vmem [resolvable:$true] %s157_s6 }
  0x13   : > { %s3741_s26 = scalar_select %p2652_p10, 1, 0 }
  0x14   : > { %s3742_s27 = scalar_select %p2656_p11, 1, 0 }
  0x15   : > { %p2348_p12 = pneg %p2652_p10  ;;  %s2454_s8 = scalar_lea.vmem %s147_s30, 32 }
  0x16   : > { %p2455_p0 = scmp.ne.s32.totalorder %s147_s30, %s2454_s8  ;;  %p2462_p5 = scmp.lt.s32.totalorder %s147_s30, %s147_s30 }
  0x17   : > { %p2670_p13 = pnand %p2656_p11, %p2348_p12  ;;  %p2463_p6 = scmp.lt.s32.totalorder %s2454_s8, %s2454_s8 }
  0x19   : > { %p2456_p1 = pneg %p2670_p13  ;;  %p2464_p7 = por %p2463_p6, %p2462_p5 }
  0x1b   : > { %p2457_p2 = pnand %p2456_p1, %p2455_p0 }
  0x1d   : > { %p2458_p3 = pneg %p2457_p2 }
  0x1f   : > { %p2465_p9 = pnand %p2464_p7, %p2458_p3 }
  0x21   : > { %2468 = shalt.err (!%p2465_p9)
}
  0x22   : > { %s2570_s9 = smov [#allocation2]   ;;  %s2469_s10 = scalar_lea.vmem %s158_s6, 16 }
  0x23   : > { %2351 = dma.vmem_to_smem (!%p2670_p13), %s147_s30, 32, %s2570_s9, [#allocation4]  }
  0x24   : > { %p2470_p12 = scmp.ne.s32.totalorder %s158_s6, %s2469_s10  ;;  %p2477_p11 = scmp.lt.s32.totalorder %s158_s6, %s158_s6 }
  0x25   : > { %p2478_p10 = scmp.lt.s32.totalorder %s2469_s10, %s2469_s10 }
  0x26   : > { %p2472_p8 = pnand %p2470_p12, %p2456_p1 }
  0x27   : > { %p2479_p0 = por %p2478_p10, %p2477_p11 }
  0x28   : > { %p2473_p4 = pneg %p2472_p8 }
  0x2a   : > { %p2480_p2 = pnand %p2479_p0, %p2473_p4 }
  0x2c   : > { %2483 = shalt.err (!%p2480_p2)
}
  0x2d   : > { %s2571_s11 = smov [#allocation5]   ;;  %p3744_p3 = scmp.ne.s32.totalorder %s3741_s26, 0 }
  0x2e   : > { %2354 = dma.vmem_to_smem (!%p2670_p13), %s158_s6, 16, %s2571_s11, [#allocation6]  }
  0x2f   : > { %182 = sbr.rel (%p3744_p3) target bundleno = 578 (0x242), region = 32  ;;  %p3745_p5 = scmp.ne.s32.totalorder (!%p3744_p3), %s3742_s27, 0 }
  0x34   : > { %2535 = dma.done.wait (%p3745_p5), [#allocation4], 32  }
  0x35   : > { %2537 = vsyncadd (%p3745_p5), [#allocation4], 4294967264 }
  0x36   : > { %2539 = dma.done.wait (%p3745_p5), [#allocation6], 16  }
  0x37   : > { %2541 = vsyncadd (%p3745_p5), [#allocation6], 4294967280 }
  0x38   : > { %192 = sfence }
  0x39   : > { %p215_p4 = scmp.lt.s32.totalorder %s2560_s15, 1  ;;  %s2108_s18 = sld [smem:[#allocation2 + $0x2]]  ;;  %vm662_vm0 = vcmask 130048  }
  0x3a   : > { %s2107_s19 = sld [smem:[#allocation2 + $0x1]]  ;;  %s2572_s4 = smov 126  }
  0x3b   : > { %s216_s21 = scalar_select %p215_p4, %s2560_s15, 1 }
  0x3c   : > { %s2110_s23 = sld [smem:[#allocation2 + $0x4]]  ;;  %s2573_s5 = smov 127  }
  0x3d   : > { %s2337_s26 = smul.u32 96, %s216_s21  ;;  %s2111_s27 = sld [smem:[#allocation2 + $0x5]] }
  0x3e   : > { %s2113_s6 = sld [smem:[#allocation2 + $0x7]]  ;;  %p3746_p10 = scmp.ne.s32.totalorder %s3739_s22, 0 }
  0x3f   : > { %s2695_s30 = scalar_lea.vmem %s3733_s2, %s2337_s26  ;;  %v250_v0 = vstv %s2108_s18  ;;  %s2114_s7 = sld [smem:[#allocation2 + $0x8]] }
  0x40   : > { %v2698_v1 = vld [vmem:[%s2695_s30] sm:$0xff]  ;;  %v2701_v2 = vld [vmem:[%s2695_s30 + $0x8] sm:$0xff]  ;;  %v236_v3 = vstv %s2107_s19  ;;  %s2118_s8 = sld [smem:[#allocation2 + $0xa]]  ;;  %v2741_v26 = vld [vmem:[%s2695_s30 + $0x18] sm:$0xff] }
  0x41   : > { %v251_v4 = vmul.f32 %v250_v0, %v2698_v1  ;;  %v237_v5 = vmul.f32 %v236_v3, %v2698_v1  ;;  %v252_v6 = vmul.f32 %v250_v0, %v2701_v2  ;;  %v238_v7 = vmul.f32 %v236_v3, %v2701_v2  ;;  %v2710_v8 = vld [vmem:[%s2695_s30 + $0x9] sm:$0xff]  ;;  %v2713_v10 = vld [vmem:[%s2695_s30 + $0x1] sm:$0xff]  ;;  %s2119_s9 = sld [smem:[#allocation2 + $0xb]]  ;;  %v2755_v34 = vld [vmem:[%s2695_s30 + $0x19] sm:$0xff] }
  0x42   : > { %v272_v9 = vstv %s2110_s23  ;;  %v2724_v16 = vld [vmem:[%s2695_s30 + $0xa] sm:$0xff]  ;;  %v2727_v18 = vld [vmem:[%s2695_s30 + $0x2] sm:$0xff]  ;;  %s2123_s10 = sld [smem:[#allocation2 + $0xd]]  ;;  %v2769_v42 = vld [vmem:[%s2695_s30 + $0x1a] sm:$0xff] }
  0x43   : > { %255 = vrot.lane.b32.xlu1 %v251_v4, %s2572_s4  ;;  %241 = vrot.lane.b32.xlu0 %v237_v5, %s2573_s5  ;;  %v274_v11 = vmul.f32 %v272_v9, %v2710_v8  ;;  %v273_v12 = vmul.f32 %v272_v9, %v2713_v10  ;;  %v286_v13 = vstv %s2111_s27  ;;  %v2738_v24 = vld [vmem:[%s2695_s30 + $0x20] sm:$0xff]  ;;  %s2124_s11 = sld [smem:[#allocation2 + $0xe]] }
  0x44   : > { %v288_v14 = vmul.f32 %v286_v13, %v2710_v8  ;;  %v287_v15 = vmul.f32 %v286_v13, %v2713_v10  ;;  %v308_v17 = vstv %s2113_s6  ;;  %v2752_v32 = vld [vmem:[%s2695_s30 + $0x21] sm:$0xff]  ;;  %s2128_s18 = sld [smem:[#allocation2 + $0x10]]  ;;  %v2780_v48 = vld [vmem:[%s2695_s30 + $0x38] sm:$0xff]  ;;  %v2783_v50 = vld [vmem:[%s2695_s30 + $0x30] sm:$0xff] }
  0x45   : > { %v310_v19 = vmul.f32 %v308_v17, %v2724_v16  ;;  %v309_v20 = vmul.f32 %v308_v17, %v2727_v18  ;;  %v322_v21 = vstv %s2114_s7  ;;  %s2129_s19 = sld [smem:[#allocation2 + $0x11]]  ;;  %v2766_v40 = vld [vmem:[%s2695_s30 + $0x22] sm:$0xff]  ;;  %v2794_v56 = vld [vmem:[%s2695_s30 + $0x39] sm:$0xff]  ;;  %v2797_v58 = vld [vmem:[%s2695_s30 + $0x31] sm:$0xff] }
  0x46   : > { %v324_v22 = vmul.f32 %v322_v21, %v2724_v16  ;;  %v323_v23 = vmul.f32 %v322_v21, %v2727_v18  ;;  %v345_v25 = vstv %s2118_s8  ;;  %s2133_s21 = sld [smem:[#allocation2 + $0x13]]  ;;  %v2808_v0 = vld [vmem:[%s2695_s30 + $0x3a] sm:$0xff]  ;;  %v2811_v4 = vld [vmem:[%s2695_s30 + $0x32] sm:$0xff] }
  0x47   : > { %257 = vrot.lane.b32.xlu1 %v252_v6, %s2572_s4  ;;  %243 = vrot.lane.b32.xlu0 %v238_v7, %s2573_s5  ;;  %v347_v27 = vmul.f32 %v2738_v24, %v345_v25  ;;  %v346_v28 = vmul.f32 %v2741_v26, %v345_v25  ;;  %v359_v29 = vstv %s2119_s9  ;;  %s2134_s23 = sld [smem:[#allocation2 + $0x14]]  ;;  %v2839_v25 = vld [vmem:[%s2695_s30 + $0x49] sm:$0xff] }
  0x48   : > { %v361_v30 = vmul.f32 %v2738_v24, %v359_v29  ;;  %v360_v31 = vmul.f32 %v2741_v26, %v359_v29  ;;  %v381_v33 = vstv %s2123_s10  ;;  %s2138_s26 = sld [smem:[#allocation2 + $0x16]] }
  0x49   : > { %v383_v35 = vmul.f32 %v2752_v32, %v381_v33  ;;  %v382_v36 = vmul.f32 %v2755_v34, %v381_v33  ;;  %v395_v37 = vstv %s2124_s11  ;;  %s2139_s28 = sld [smem:[#allocation2 + $0x17]]  ;;  %v2850_v33 = vld [vmem:[%s2695_s30 + $0x52] sm:$0xff] }
  0x4a   : > { %v397_v38 = vmul.f32 %v2752_v32, %v395_v37  ;;  %v396_v39 = vmul.f32 %v2755_v34, %v395_v37  ;;  %v417_v41 = vstv %s2128_s18  ;;  %s2143_s29 = sld [smem:[#allocation2 + $0x19]] }
  0x4b   : > { %279 = vrot.lane.b32.xlu1 %v274_v11, %s2573_s5  ;;  %277 = vrot.lane.b32.xlu0 %v273_v12, %s2573_s5  ;;  %v419_v43 = vmul.f32 %v2766_v40, %v417_v41  ;;  %v418_v44 = vmul.f32 %v2769_v42, %v417_v41  ;;  %v431_v45 = vstv %s2129_s19  ;;  %s2144_s27 = sld [smem:[#allocation2 + $0x1a]]  ;;  %v2822_v12 = vld [vmem:[%s2695_s30 + $0x50] sm:$0xff] }
  0x4c   : > { %v433_v46 = vmul.f32 %v2766_v40, %v431_v45  ;;  %v432_v47 = vmul.f32 %v2769_v42, %v431_v45  ;;  %v454_v49 = vstv %s2133_s21  ;;  %s2148_s6 = sld [smem:[#allocation2 + $0x1c]] }
  0x4d   : > { %v456_v51 = vmul.f32 %v2780_v48, %v454_v49  ;;  %v455_v52 = vmul.f32 %v2783_v50, %v454_v49  ;;  %v468_v53 = vstv %s2134_s23  ;;  %s2149_s7 = sld [smem:[#allocation2 + $0x1d]] }
  0x4e   : > { %v470_v54 = vmul.f32 %v2780_v48, %v468_v53  ;;  %v469_v55 = vmul.f32 %v2783_v50, %v468_v53  ;;  %v490_v57 = vstv %s2138_s26  ;;  %s2153_s8 = sld [smem:[#allocation2 + $0x1f]] }
  0x4f   : > { %293 = vrot.lane.b32.xlu1 %v288_v14, %s2572_s4  ;;  %291 = vrot.lane.b32.xlu0 %v287_v15, %s2572_s4  ;;  %v492_v59 = vmul.f32 %v2794_v56, %v490_v57  ;;  %v491_v60 = vmul.f32 %v2797_v58, %v490_v57  ;;  %v504_v61 = vstv %s2139_s28  ;;  %v2825_v14 = vld [vmem:[%s2695_s30 + $0x48] sm:$0xff]  ;;  %s2154_s9 = sld [smem:[#allocation2 + $0x20]] }
  0x50   : > { %v506_v62 = vmul.f32 %v2794_v56, %v504_v61  ;;  %v505_v63 = vmul.f32 %v2797_v58, %v504_v61  ;;  %v526_v3 = vstv %s2143_s29  ;;  %s2158_s10 = sld [smem:[#allocation2 + $0x22]] }
  0x51   : > { %v528_v5 = vmul.f32 %v2808_v0, %v526_v3  ;;  %v527_v6 = vmul.f32 %v2811_v4, %v526_v3  ;;  %v540_v7 = vstv %s2144_s27  ;;  %s2159_s11 = sld [smem:[#allocation2 + $0x23]] }
  0x52   : > { %v542_v9 = vmul.f32 %v2808_v0, %v540_v7  ;;  %v541_v11 = vmul.f32 %v2811_v4, %v540_v7  ;;  %v563_v13 = vstv %s2148_s6  ;;  %s2162_s18 = sld [smem:[#allocation2 + $0x25]] }
  0x53   : > { %315 = vrot.lane.b32.xlu1 %v310_v19, %s2573_s5  ;;  %313 = vrot.lane.b32.xlu0 %v309_v20, %s2573_s5  ;;  %v565_v15 = vmul.f32 %v2822_v12, %v563_v13  ;;  %v564_v17 = vmul.f32 %v2825_v14, %v563_v13  ;;  %v577_v19 = vstv %s2149_s7  ;;  %s2163_s19 = sld [smem:[#allocation2 + $0x26]] }
  0x54   : > { %v579_v20 = vmul.f32 %v2822_v12, %v577_v19  ;;  %v578_v21 = vmul.f32 %v2825_v14, %v577_v19  ;;  %s2165_s21 = sld [smem:[#allocation2 + $0x28]] }
  0x55   : > { %v613_v29 = vstv %s2154_s9  ;;  %s2166_s23 = sld [smem:[#allocation2 + $0x29]] }
  0x56   : > { %s229_s26 = sld [smem:[#allocation2]] }
  0x57   : > { %329 = vrot.lane.b32.xlu1 %v324_v22, %s2572_s4  ;;  %327 = vrot.lane.b32.xlu0 %v323_v23, %s2572_s4  ;;  %v2836_v22 = vld [vmem:[%s2695_s30 + $0x51] sm:$0xff]  ;;  %v599_v23 = vstv %s2153_s8  ;;  %s2168_s28 = sld [smem:[#allocation2 + $0x2b]] }
  0x58   : > { %s2875_s29 = sld [smem:[#allocation5]] }
  0x59   : > { %s2169_s27 = sld [smem:[#allocation2 + $0x2c]] }
  0x5a   : > { %s2173_s6 = sld [smem:[#allocation2 + $0x2e]] }
  0x5b   : > { %352 = vrot.lane.b32.xlu1 %v347_v27, %s2573_s5  ;;  %350 = vrot.lane.b32.xlu0 %v346_v28, %s2573_s5  ;;  %v601_v27 = vmul.f32 %v2836_v22, %v599_v23  ;;  %v600_v28 = vmul.f32 %v2839_v25, %v599_v23  ;;  %s2109_s7 = sld [smem:[#allocation2 + $0x3]] }
  0x5c   : > { %s2174_s8 = sld [smem:[#allocation2 + $0x2f]] }
  0x5d   : > { %v748_v61 = vstv %s2168_s28  ;;  %s2892_s9 = sld [smem:[#allocation2 + $0x31]] }
  0x5e   : > { %v749_v3 = vmul.f32 %v748_v61, %v2727_v18  ;;  %s2940_s28 = sld [smem:[#allocation2 + $0x38]] }
  0x5f   : > { %366 = vrot.lane.b32.xlu1 %v361_v30, %s2572_s4  ;;  %364 = vrot.lane.b32.xlu0 %v360_v31, %s2572_s4  ;;  %v615_v30 = vmul.f32 %v2836_v22, %v613_v29  ;;  %v614_v31 = vmul.f32 %v2839_v25, %v613_v29 }
  0x62   : > { %v798_v29 = vstv %s2174_s8  ;;  %s2969_s8 = sld [smem:[#allocation2 + $0x12]] }
  0x63   : > { %388 = vrot.lane.b32.xlu1 %v383_v35, %s2573_s5  ;;  %386 = vrot.lane.b32.xlu0 %v382_v36, %s2573_s5  ;;  %v635_v35 = vstv %s2158_s10  ;;  %v2853_v36 = vld [vmem:[%s2695_s30 + $0x4a] sm:$0xff]  ;;  %s2894_s10 = sld [smem:[#allocation2 + $0x6]] }
  0x64   : > { %v637_v37 = vmul.f32 %v2850_v33, %v635_v35 }
  0x67   : > { %402 = vrot.lane.b32.xlu1 %v397_v38, %s2572_s4  ;;  %400 = vrot.lane.b32.xlu0 %v396_v39, %s2572_s4  ;;  %v636_v38 = vmul.f32 %v2853_v36, %v635_v35  ;;  %v649_v39 = vstv %s2159_s11  ;;  %s2900_s11 = sld [smem:[#allocation2 + $0x32]] }
  0x68   : > { %v651_v41 = vmul.f32 %v2850_v33, %v649_v39 }
  0x6b   : > { %424 = vrot.lane.b32.xlu1 %v419_v43, %s2573_s5  ;;  %422 = vrot.lane.b32.xlu0 %v418_v44, %s2573_s5  ;;  %v650_v43 = vmul.f32 %v2853_v36, %v649_v39  ;;  %v676_v44 = vstv %s2162_s18  ;;  %s2908_s18 = sld [smem:[#allocation2 + $0x34]] }
  0x6c   : > { %v678_v45 = vmul.f32 %v676_v44, %v2701_v2 }
  0x6f   : > { %438 = vrot.lane.b32.xlu1 %v433_v46, %s2572_s4  ;;  %436 = vrot.lane.b32.xlu0 %v432_v47, %s2572_s4  ;;  %v677_v46 = vmul.f32 %v676_v44, %v2698_v1  ;;  %v690_v47 = vstv %s2163_s19  ;;  %s2912_s19 = sld [smem:[#allocation2 + $0x9]] }
  0x70   : > { %v692_v49 = vmul.f32 %v690_v47, %v2701_v2 }
  0x73   : > { %461 = vrot.lane.b32.xlu1 %v456_v51, %s2573_s5  ;;  %459 = vrot.lane.b32.xlu0 %v455_v52, %s2573_s5  ;;  %v691_v51 = vmul.f32 %v690_v47, %v2698_v1  ;;  %v712_v52 = vstv %s2165_s21  ;;  %s2921_s21 = sld [smem:[#allocation2 + $0x35]] }
  0x74   : > { %v714_v53 = vmul.f32 %v712_v52, %v2710_v8 }
  0x77   : > { %475 = vrot.lane.b32.xlu1 %v470_v54, %s2572_s4  ;;  %473 = vrot.lane.b32.xlu0 %v469_v55, %s2572_s4  ;;  %v713_v54 = vmul.f32 %v712_v52, %v2713_v10  ;;  %v726_v55 = vstv %s2166_s23  ;;  %s2927_s23 = sld [smem:[#allocation2 + $0x37]] }
  0x78   : > { %v728_v57 = vmul.f32 %v726_v55, %v2710_v8 }
  0x7b   : > { %497 = vrot.lane.b32.xlu1 %v492_v59, %s2573_s5  ;;  %495 = vrot.lane.b32.xlu0 %v491_v60, %s2573_s5  ;;  %v727_v59 = vmul.f32 %v726_v55, %v2713_v10  ;;  %v230_v60 = vstv %s229_s26  ;;  %s2931_s26 = sld [smem:[#allocation2 + $0xc]] }
  0x7f   : > { %511 = vrot.lane.b32.xlu1 %v506_v62, %s2572_s4  ;;  %509 = vrot.lane.b32.xlu0 %v505_v63, %s2572_s4  ;;  %v231_v62 = vmul.f32 %v230_v60, %v2698_v1  ;;  %v750_v63 = vmul.f32 %v748_v61, %v2724_v16  ;;  %v834_v61 = vstv %s2900_s11  ;;  %s2988_s11 = sld [smem:[#allocation2 + $0x15]] }
  0x83   : > { %533 = vrot.lane.b32.xlu1 %v528_v5, %s2573_s5  ;;  %531 = vrot.lane.b32.xlu0 %v527_v6, %s2573_s5  ;;  %v226_v5 = vstv %s2875_s29  ;;  %v762_v6 = vstv %s2169_s27  ;;  %s2946_s29 = sld [smem:[#allocation2 + $0x3a]] }
  0x84   : > { %v233_v7 = vadd.f32 %v231_v62, %v226_v5  ;;  %v763_v13 = vmul.f32 %v762_v6, %v2727_v18  ;;  %s2950_s27 = sld [smem:[#allocation2 + $0xf]] }
  0x87   : > { %547 = vrot.lane.b32.xlu1 %v542_v9, %s2572_s4  ;;  %545 = vrot.lane.b32.xlu0 %v541_v11, %s2572_s4  ;;  %v232_v9 = vmul.f32 %v230_v60, %v2701_v2  ;;  %v764_v11 = vmul.f32 %v762_v6, %v2724_v16  ;;  %v836_v6 = vmul.f32 %v2752_v32, %v834_v61 }
  0x8b   : > { %570 = vrot.lane.b32.xlu1 %v565_v15, %s2573_s5  ;;  %568 = vrot.lane.b32.xlu0 %v564_v17, %s2573_s5  ;;  %v784_v15 = vstv %s2173_s6  ;;  %s2959_s6 = sld [smem:[#allocation2 + $0x3b]] }
  0x8c   : > { %v786_v23 = vmul.f32 %v2738_v24, %v784_v15 }
  0x8f   : > { %584 = vrot.lane.b32.xlu1 %v579_v20, %s2572_s4  ;;  %582 = vrot.lane.b32.xlu0 %v578_v21, %s2572_s4  ;;  %v234_v21 = vadd.f32 %v232_v9, %v226_v5  ;;  %v856_v9 = vstv %s2908_s18  ;;  %s2997_s18 = sld [smem:[#allocation2 + $0x41]] }
  0x93   : > { %606 = vrot.lane.b32.xlu1 %v601_v27, %s2573_s5  ;;  %604 = vrot.lane.b32.xlu0 %v600_v28, %s2573_s5  ;;  %v785_v27 = vmul.f32 %v2741_v26, %v784_v15  ;;  %v266_v28 = vstv %s2109_s7  ;;  %s2965_s7 = sld [smem:[#allocation2 + $0x3d]] }
  0x94   : > { %v267_v39 = vmul.f32 %v266_v28, %v2713_v10 }
  0x97   : > { %620 = vrot.lane.b32.xlu1 %v615_v30, %s2572_s4  ;;  %618 = vrot.lane.b32.xlu0 %v614_v31, %s2572_s4 }
  0x9b   : > { %642 = vrot.lane.b32.xlu1 %v637_v37, %s2573_s5  ;;  %640 = vrot.lane.b32.xlu0 %v636_v38, %s2573_s5  ;;  %v268_v38 = vmul.f32 %v266_v28, %v2710_v8  ;;  %v870_v28 = vstv %s2921_s21  ;;  %s3007_s21 = sld [smem:[#allocation2 + $0x18]] }
  0x9f   : > { %656 = vrot.lane.b32.xlu1 %v651_v41, %s2572_s4  ;;  %654 = vrot.lane.b32.xlu0 %v650_v43, %s2572_s4  ;;  %v800_v41 = vmul.f32 %v2738_v24, %v798_v29  ;;  %v799_v43 = vmul.f32 %v2741_v26, %v798_v29 }
  0xa3   : > { %683 = vrot.lane.b32.xlu1 %v678_v45, %s2573_s5  ;;  %681 = vrot.lane.b32.xlu0 %v677_v46, %s2573_s5  ;;  %v820_v45 = vstv %s2892_s9  ;;  %v302_v46 = vstv %s2894_s10  ;;  %s2978_s9 = sld [smem:[#allocation2 + $0x3e]] }
  0xa4   : > { %v304_v55 = vmul.f32 %v302_v46, %v2724_v16  ;;  %v303_v60 = vmul.f32 %v302_v46, %v2727_v18  ;;  %v835_v16 = vmul.f32 %v2755_v34, %v834_v61  ;;  %s2984_s10 = sld [smem:[#allocation2 + $0x40]] }
  0xa7   : > { %697 = vrot.lane.b32.xlu1 %v692_v49, %s2572_s4  ;;  %695 = vrot.lane.b32.xlu0 %v691_v51, %s2572_s4 }
  0xab   : > { %719 = vrot.lane.b32.xlu1 %v714_v53, %s2573_s5  ;;  %717 = vrot.lane.b32.xlu0 %v713_v54, %s2573_s5  ;;  %v822_v53 = vmul.f32 %v2752_v32, %v820_v45  ;;  %v821_v54 = vmul.f32 %v2755_v34, %v820_v45 }
  0xaf   : > { %733 = vrot.lane.b32.xlu1 %v728_v57, %s2572_s4  ;;  %731 = vrot.lane.b32.xlu0 %v727_v59, %s2572_s4 }
  0xb3   : > { %755 = vrot.lane.b32.xlu1 %v750_v63, %s2573_s5  ;;  %753 = vrot.lane.b32.xlu0 %v749_v3, %s2573_s5 }
  0xb5   : > { %v256_v17 = vpop.permute.xlu1 %255  ;;  %v242_v19 = vpop.permute.xlu0 %241 }
  0xb6   : > { %v247_v20 = vadd.f32 %v242_v19, %v233_v7  ;;  %v857_v19 = vmul.f32 %v2769_v42, %v856_v9 }
  0xb7   : > { %769 = vrot.lane.b32.xlu1 %v764_v11, %s2572_s4  ;;  %767 = vrot.lane.b32.xlu0 %v763_v13, %s2572_s4  ;;  %v339_v11 = vstv %s2912_s19  ;;  %s3003_s19 = sld [smem:[#allocation2 + $0x43]] }
  0xb8   : > { %v261_v35 = vadd.f32 %v256_v17, %v247_v20  ;;  %v858_v17 = vmul.f32 %v2766_v40, %v856_v9  ;;  %v341_v20 = vmul.f32 %v2738_v24, %v339_v11  ;;  %v871_v24 = vmul.f32 %v2769_v42, %v870_v28 }
  0xb9   : > { %v258_v30 = vpop.permute.xlu1 %257  ;;  %v244_v31 = vpop.permute.xlu0 %243 }
  0xba   : > { %v248_v37 = vadd.f32 %v244_v31, %v234_v21  ;;  %v269_v52 = vadd.f32 %v267_v39, %v261_v35  ;;  %v892_v39 = vstv %s2927_s23  ;;  %s3016_s23 = sld [smem:[#allocation2 + $0x44]] }
  0xbb   : > { %791 = vrot.lane.b32.xlu1 %v786_v23, %s2573_s5  ;;  %789 = vrot.lane.b32.xlu0 %v785_v27, %s2573_s5  ;;  %v340_v27 = vmul.f32 %v2741_v26, %v339_v11  ;;  %v894_v45 = vmul.f32 %v2780_v48, %v892_v39  ;;  %v893_v46 = vmul.f32 %v2783_v50, %v892_v39  ;;  %v978_v39 = vstv %s2978_s9  ;;  %s3064_s9 = sld [smem:[#allocation2 + $0x21]] }
  0xbc   : > { %v262_v44 = vadd.f32 %v258_v30, %v248_v37  ;;  %v872_v37 = vmul.f32 %v2766_v40, %v870_v28  ;;  %v448_v28 = vstv %s2969_s8  ;;  %s3060_s8 = sld [smem:[#allocation2 + $0x4c]] }
  0xbd   : > { %v280_v47 = vpop.permute.xlu1 %279  ;;  %v278_v49 = vpop.permute.xlu0 %277 }
  0xbe   : > { %v270_v51 = vadd.f32 %v268_v38, %v262_v44  ;;  %v283_v59 = vadd.f32 %v278_v49, %v269_v52 }
  0xbf   : > { %805 = vrot.lane.b32.xlu1 %v800_v41, %s2572_s4  ;;  %803 = vrot.lane.b32.xlu0 %v799_v43, %s2572_s4  ;;  %v375_v41 = vstv %s2931_s26  ;;  %s3022_s26 = sld [smem:[#allocation2 + $0x46]] }
  0xc0   : > { %v284_v57 = vadd.f32 %v280_v47, %v270_v51  ;;  %v377_v47 = vmul.f32 %v2752_v32, %v375_v41  ;;  %v376_v52 = vmul.f32 %v2755_v34, %v375_v41 }
  0xc1   : > { %v294_v62 = vpop.permute.xlu1 %293  ;;  %v292_v63 = vpop.permute.xlu0 %291 }
  0xc2   : > { %v298_v3 = vadd.f32 %v294_v62, %v284_v57  ;;  %v297_v5 = vadd.f32 %v292_v63, %v283_v59  ;;  %v928_v62 = vstv %s2946_s29  ;;  %v411_v63 = vstv %s2950_s27  ;;  %s3035_s29 = sld [smem:[#allocation2 + $0x47]] }
  0xc3   : > { %827 = vrot.lane.b32.xlu1 %v822_v53, %s2573_s5  ;;  %825 = vrot.lane.b32.xlu0 %v821_v54, %s2573_s5  ;;  %v906_v53 = vstv %s2940_s28  ;;  %v412_v11 = vmul.f32 %v2769_v42, %v411_v63  ;;  %s3026_s28 = sld [smem:[#allocation2 + $0x1b]] }
  0xc4   : > { %v306_v7 = vadd.f32 %v304_v55, %v298_v3  ;;  %v305_v18 = vadd.f32 %v303_v60, %v297_v5  ;;  %v908_v60 = vmul.f32 %v2780_v48, %v906_v53  ;;  %v907_v32 = vmul.f32 %v2783_v50, %v906_v53  ;;  %s3041_s27 = sld [smem:[#allocation2 + $0x49]] }
  0xc5   : > { %v316_v13 = vpop.permute.xlu1 %315  ;;  %v314_v15 = vpop.permute.xlu0 %313 }
  0xc6   : > { %v320_v21 = vadd.f32 %v316_v13, %v306_v7  ;;  %v319_v23 = vadd.f32 %v314_v15, %v305_v18  ;;  %v413_v7 = vmul.f32 %v2766_v40, %v411_v63  ;;  %v942_v13 = vstv %s2959_s6  ;;  %s3045_s6 = sld [smem:[#allocation2 + $0x1e]] }
  0xc7   : > { %841 = vrot.lane.b32.xlu1 %v836_v6, %s2572_s4  ;;  %839 = vrot.lane.b32.xlu0 %v835_v16, %s2572_s4  ;;  %v930_v6 = vmul.f32 %v2794_v56, %v928_v62  ;;  %v929_v16 = vmul.f32 %v2797_v58, %v928_v62  ;;  %v943_v40 = vmul.f32 %v2797_v58, %v942_v13 }
  0xc9   : > { %v330_v29 = vpop.permute.xlu1 %329  ;;  %v328_v30 = vpop.permute.xlu0 %327 }
  0xca   : > { %v334_v31 = vadd.f32 %v330_v29, %v320_v21  ;;  %v333_v35 = vadd.f32 %v328_v30, %v319_v23  ;;  %v944_v21 = vmul.f32 %v2794_v56, %v942_v13 }
  0xcb   : > { %863 = vrot.lane.b32.xlu1 %v858_v17, %s2573_s5  ;;  %861 = vrot.lane.b32.xlu0 %v857_v19, %s2573_s5 }
  0xcc   : > { %v343_v38 = vadd.f32 %v341_v20, %v334_v31  ;;  %v342_v26 = vadd.f32 %v340_v27, %v333_v35  ;;  %v964_v27 = vstv %s2965_s7  ;;  %s3054_s7 = sld [smem:[#allocation2 + $0x4a]] }
  0xcd   : > { %v353_v43 = vpop.permute.xlu1 %352  ;;  %v351_v44 = vpop.permute.xlu0 %350  ;;  %v966_v31 = vmul.f32 %v2808_v0, %v964_v27  ;;  %v965_v35 = vmul.f32 %v2811_v4, %v964_v27 }
  0xce   : > { %v357_v49 = vadd.f32 %v353_v43, %v343_v38  ;;  %v356_v51 = vadd.f32 %v351_v44, %v342_v26  ;;  %v449_v26 = vmul.f32 %v2783_v50, %v448_v28 }
  0xcf   : > { %877 = vrot.lane.b32.xlu1 %v872_v37, %s2572_s4  ;;  %875 = vrot.lane.b32.xlu0 %v871_v24, %s2572_s4  ;;  %v450_v37 = vmul.f32 %v2780_v48, %v448_v28  ;;  %v979_v48 = vmul.f32 %v2811_v4, %v978_v39 }
  0xd1   : > { %v367_v54 = vpop.permute.xlu1 %366  ;;  %v365_v55 = vpop.permute.xlu0 %364 }
  0xd2   : > { %v371_v57 = vadd.f32 %v367_v54, %v357_v49  ;;  %v370_v59 = vadd.f32 %v365_v55, %v356_v51  ;;  %v1000_v49 = vstv %s2984_s10  ;;  %v484_v51 = vstv %s2988_s11  ;;  %s3073_s10 = sld [smem:[#allocation2 + $0x4d]] }
  0xd3   : > { %899 = vrot.lane.b32.xlu1 %v894_v45, %s2573_s5  ;;  %897 = vrot.lane.b32.xlu0 %v893_v46, %s2573_s5  ;;  %v980_v46 = vmul.f32 %v2808_v0, %v978_v39  ;;  %v1002_v54 = vmul.f32 %v2822_v12, %v1000_v49  ;;  %v1001_v55 = vmul.f32 %v2825_v14, %v1000_v49  ;;  %s3079_s11 = sld [smem:[#allocation2 + $0x4f]] }
  0xd4   : > { %v379_v61 = vadd.f32 %v377_v47, %v371_v57  ;;  %v378_v34 = vadd.f32 %v376_v52, %v370_v59  ;;  %v486_v57 = vmul.f32 %v2794_v56, %v484_v51 }
  0xd5   : > { %v389_v3 = vpop.permute.xlu1 %388  ;;  %v387_v5 = vpop.permute.xlu0 %386 }
  0xd6   : > { %v393_v18 = vadd.f32 %v389_v3, %v379_v61  ;;  %v392_v9 = vadd.f32 %v387_v5, %v378_v34  ;;  %v1014_v61 = vstv %s2997_s18  ;;  %s3083_s18 = sld [smem:[#allocation2 + $0x24]] }
  0xd7   : > { %913 = vrot.lane.b32.xlu1 %v908_v60, %s2572_s4  ;;  %911 = vrot.lane.b32.xlu0 %v907_v32, %s2572_s4  ;;  %v485_v32 = vmul.f32 %v2797_v58, %v484_v51  ;;  %v1016_v5 = vmul.f32 %v2822_v12, %v1014_v61  ;;  %v1015_v56 = vmul.f32 %v2825_v14, %v1014_v61  ;;  %v1113_v51 = vstv %s3041_s27  ;;  %s3125_s27 = sld [smem:[#allocation2 + $0x53]] }
  0xd9   : > { %v403_v15 = vpop.permute.xlu1 %402  ;;  %v401_v17 = vpop.permute.xlu0 %400 }
  0xda   : > { %v407_v19 = vadd.f32 %v403_v15, %v393_v18  ;;  %v406_v20 = vadd.f32 %v401_v17, %v392_v9 }
  0xdb   : > { %935 = vrot.lane.b32.xlu1 %v930_v6, %s2573_s5  ;;  %933 = vrot.lane.b32.xlu0 %v929_v16, %s2573_s5  ;;  %v1036_v16 = vstv %s3003_s19  ;;  %s3092_s19 = sld [smem:[#allocation2 + $0x50]] }
  0xdc   : > { %v415_v23 = vadd.f32 %v413_v7, %v407_v19  ;;  %v414_v42 = vadd.f32 %v412_v11, %v406_v20  ;;  %v520_v7 = vstv %s3007_s21  ;;  %v1038_v11 = vmul.f32 %v2836_v22, %v1036_v16  ;;  %s3094_s21 = sld [smem:[#allocation5 + $0x1]] }
  0xdd   : > { %v425_v29 = vpop.permute.xlu1 %424  ;;  %v423_v30 = vpop.permute.xlu0 %422  ;;  %v1037_v13 = vmul.f32 %v2839_v25, %v1036_v16  ;;  %v522_v15 = vmul.f32 %v2808_v0, %v520_v7  ;;  %v521_v20 = vmul.f32 %v2811_v4, %v520_v7  ;;  %v629_v16 = vstv %s3064_s9  ;;  %s3163_s9 = sld [smem:[#allocation2 + $0x56]] }
  0xde   : > { %v429_v24 = vadd.f32 %v425_v29, %v415_v23  ;;  %v428_v38 = vadd.f32 %v423_v30, %v414_v42  ;;  %v1072_v30 = vstv %s3022_s26  ;;  %s3101_s26 = sld [smem:[#allocation2 + $0x52]] }
  0xdf   : > { %949 = vrot.lane.b32.xlu1 %v944_v21, %s2572_s4  ;;  %947 = vrot.lane.b32.xlu0 %v943_v40, %s2572_s4  ;;  %v1050_v21 = vstv %s3016_s23  ;;  %s212_s23 = sand.u32 1, %s2552_s13  }
  0xe0   : > { %v1052_v28 = vmul.f32 %v2836_v22, %v1050_v21  ;;  %v1051_v0 = vmul.f32 %v2839_v25, %v1050_v21 }
  0xe1   : > { %v439_v41 = vpop.permute.xlu1 %438  ;;  %v437_v43 = vpop.permute.xlu0 %436 }
  0xe2   : > { %v443_v44 = vadd.f32 %v439_v41, %v429_v24  ;;  %v442_v45 = vadd.f32 %v437_v43, %v428_v38  ;;  %v1074_v24 = vmul.f32 %v2850_v33, %v1072_v30  ;;  %v1073_v38 = vmul.f32 %v2853_v36, %v1072_v30 }
  0xe3   : > { %971 = vrot.lane.b32.xlu1 %v966_v31, %s2573_s5  ;;  %969 = vrot.lane.b32.xlu0 %v965_v35, %s2573_s5  ;;  %v557_v31 = vstv %s3026_s28  ;;  %s3111_s28 = sld [smem:[#allocation2 + $0x27]] }
  0xe4   : > { %v452_v47 = vadd.f32 %v450_v37, %v443_v44  ;;  %v451_v50 = vadd.f32 %v449_v26, %v442_v45  ;;  %v559_v26 = vmul.f32 %v2822_v12, %v557_v31  ;;  %v558_v43 = vmul.f32 %v2825_v14, %v557_v31 }
  0xe5   : > { %v462_v52 = vpop.permute.xlu1 %461  ;;  %v460_v53 = vpop.permute.xlu0 %459  ;;  %v1086_v44 = vstv %s3035_s29  ;;  %s2105_s29 = sshll.u32 %s212_s23, 6 }
  0xe6   : > { %v466_v59 = vadd.f32 %v462_v52, %v452_v47  ;;  %v465_v60 = vadd.f32 %v460_v53, %v451_v50  ;;  %v1088_v50 = vmul.f32 %v2850_v33, %v1086_v44  ;;  %v1087_v12 = vmul.f32 %v2853_v36, %v1086_v44 }
  0xe7   : > { %985 = vrot.lane.b32.xlu1 %v980_v46, %s2572_s4  ;;  %983 = vrot.lane.b32.xlu0 %v979_v48, %s2572_s4  ;;  %v593_v52 = vstv %s3045_s6  ;;  %v666_v44 = vstv %s3094_s21  ;;  %s3132_s6 = sld [smem:[#allocation2 + $0x55]] }
  0xe8   : > { %v594_v61 = vmul.f32 %v2839_v25, %v593_v52  ;;  %s3204_s21 = sld [smem:[#allocation2 + $0x30]] }
  0xe9   : > { %v476_v34 = vpop.permute.xlu1 %475  ;;  %v474_v62 = vpop.permute.xlu0 %473 }
  0xea   : > { %v480_v63 = vadd.f32 %v476_v34, %v466_v59  ;;  %v479_v3 = vadd.f32 %v474_v62, %v465_v60  ;;  %v595_v59 = vmul.f32 %v2836_v22, %v593_v52  ;;  %v1127_v34 = vstv %s3054_s7  ;;  %s3134_s7 = scalar_lea.vmem [#allocation7], %s2105_s29  ;;  %s3229_s29 = sld [smem:[#allocation2 + $0x33]] }
  0xeb   : > { %1007 = vrot.lane.b32.xlu1 %v1002_v54, %s2573_s5  ;;  %1005 = vrot.lane.b32.xlu0 %v1001_v55, %s2573_s5  ;;  %v1115_v55 = vmul.f32 %v1113_v51, %v2701_v2  ;;  %v1128_v22 = vmul.f32 %v1127_v34, %v2698_v1 }
  0xec   : > { %v488_v6 = vadd.f32 %v486_v57, %v480_v63  ;;  %v487_v58 = vadd.f32 %v485_v32, %v479_v3  ;;  %v1114_v57 = vmul.f32 %v1113_v51, %v2698_v1  ;;  %v631_v1 = vmul.f32 %v2850_v33, %v629_v16 }
  0xed   : > { %v498_v18 = vpop.permute.xlu1 %497  ;;  %v496_v9 = vpop.permute.xlu0 %495  ;;  %v706_v51 = vstv %s3111_s28  ;;  %s3219_s28 = sld [smem:[#allocation2 + $0x5e]] }
  0xee   : > { %v502_v17 = vadd.f32 %v498_v18, %v488_v6  ;;  %v501_v19 = vadd.f32 %v496_v9, %v487_v58  ;;  %v1149_v58 = vstv %s3060_s8  ;;  %s3148_s8 = sld [smem:[#allocation2 + $0x2a]] }
  0xef   : > { %1021 = vrot.lane.b32.xlu1 %v1016_v5, %s2572_s4  ;;  %1019 = vrot.lane.b32.xlu0 %v1015_v56, %s2572_s4  ;;  %v1129_v56 = vmul.f32 %v1127_v34, %v2701_v2  ;;  %v1151_v9 = vmul.f32 %v1149_v58, %v2710_v8 }
  0xf1   : > { %v512_v40 = vpop.permute.xlu1 %511  ;;  %v510_v23 = vpop.permute.xlu0 %509 }
  0xf2   : > { %v516_v42 = vadd.f32 %v512_v40, %v502_v17  ;;  %v515_v27 = vadd.f32 %v510_v23, %v501_v19  ;;  %v630_v17 = vmul.f32 %v2853_v36, %v629_v16  ;;  %v1163_v19 = vstv %s3073_s10  ;;  %s3169_s10 = sld [smem:[#allocation2 + $0x58]]  ;;  %v3172_v16 = vld [vmem:[%s2695_s30 + $0x21] sm:$0xff] }
  0xf3   : > { %1043 = vrot.lane.b32.xlu1 %v1038_v11, %s2573_s5  ;;  %1041 = vrot.lane.b32.xlu0 %v1037_v13, %s2573_s5  ;;  %v1150_v11 = vmul.f32 %v1149_v58, %v2713_v10  ;;  %v1165_v33 = vmul.f32 %v1163_v19, %v2710_v8  ;;  %v1164_v36 = vmul.f32 %v1163_v19, %v2713_v10 }
  0xf4   : > { %v524_v29 = vadd.f32 %v522_v15, %v516_v42  ;;  %v523_v4 = vadd.f32 %v521_v20, %v515_v27 }
  0xf5   : > { %v534_v35 = vpop.permute.xlu1 %533  ;;  %v532_v37 = vpop.permute.xlu0 %531 }
  0xf6   : > { %v538_v39 = vadd.f32 %v534_v35, %v524_v29  ;;  %v537_v41 = vadd.f32 %v532_v37, %v523_v4  ;;  %v3108_v29 = vld [vmem:[%s2695_s30 + $0x2] sm:$0xff]  ;;  %v670_v4 = vstv %s3083_s18  ;;  %s3188_s18 = sld [smem:[#allocation2 + $0x59]] }
  0xf7   : > { %1057 = vrot.lane.b32.xlu1 %v1052_v28, %s2572_s4  ;;  %1055 = vrot.lane.b32.xlu0 %v1051_v0, %s2572_s4  ;;  %v3104_v28 = vld [vmem:[%s2695_s30 + $0xa] sm:$0xff]  ;;  %v1185_v0 = vstv %s3079_s11  ;;  %v672_v35 = vmul.f32 %v670_v4, %v2701_v2  ;;  %s3179_s11 = sld [smem:[#allocation2 + $0x2d]] }
  0xf8   : > { %v1187_v8 = vmul.f32 %v1185_v0, %v3104_v28  ;;  %v1186_v10 = vmul.f32 %v1185_v0, %v3108_v29 }
  0xf9   : > { %v548_v45 = vpop.permute.xlu1 %547  ;;  %v546_v46 = vpop.permute.xlu0 %545 }
  0xfa   : > { %v552_v48 = vadd.f32 %v548_v45, %v538_v39  ;;  %v551_v47 = vadd.f32 %v546_v46, %v537_v41  ;;  %v1199_v39 = vstv %s3092_s19  ;;  %s3194_s19 = sld [smem:[#allocation2 + $0x5b]] }
  0xfb   : > { %1079 = vrot.lane.b32.xlu1 %v1074_v24, %s2573_s5  ;;  %1077 = vrot.lane.b32.xlu0 %v1073_v38, %s2573_s5  ;;  %v3121_v38 = vld [vmem:[%s2695_s30] sm:$0xff]  ;;  %v1201_v2 = vmul.f32 %v1199_v39, %v3104_v28 }
  0xfc   : > { %v561_v49 = vadd.f32 %v559_v26, %v552_v48  ;;  %v560_v14 = vadd.f32 %v558_v43, %v551_v47  ;;  %v671_v26 = vmul.f32 %v3121_v38, %v670_v4  ;;  %v1200_v48 = vmul.f32 %v1199_v39, %v3108_v29 }
  0xfd   : > { %v571_v53 = vpop.permute.xlu1 %570  ;;  %v569_v54 = vpop.permute.xlu0 %568  ;;  %v674_v47 = vadd.f32 %v672_v35, %v666_v44  ;;  %v1293_v35 = vstv %s3169_s10  ;;  %s3269_s10 = sld [smem:[#allocation2 + $0x70]] }
  0xfe   : > { %v575_v60 = vadd.f32 %v571_v53, %v561_v49  ;;  %v574_v32 = vadd.f32 %v569_v54, %v560_v14  ;;  %v1221_v49 = vstv %s3101_s26  ;;  %v3145_v14 = vld [vmem:[%s2695_s30 + $0x18] sm:$0xff]  ;;  %s3213_s26 = sld [smem:[#allocation2 + $0x5c]] }
  0xff   : > { %1093 = vrot.lane.b32.xlu1 %v1088_v50, %s2572_s4  ;;  %1091 = vrot.lane.b32.xlu0 %v1087_v12, %s2572_s4  ;;  %v673_v50 = vadd.f32 %v671_v26, %v666_v44  ;;  %v3141_v12 = vld [vmem:[%s2695_s30 + $0x20] sm:$0xff] }
 0x100   : > { %v1223_v54 = vmul.f32 %v3141_v12, %v1221_v49  ;;  %v2423_v44 = vld [vmem:[%s2695_s30 + $0x20] sm:$0xff] }
 0x101   : > { %v585_v62 = vpop.permute.xlu1 %584  ;;  %v583_v63 = vpop.permute.xlu0 %582 }
 0x102   : > { %v589_v3 = vadd.f32 %v585_v62, %v575_v60  ;;  %v588_v5 = vadd.f32 %v583_v63, %v574_v32  ;;  %v1235_v62 = vstv %s3125_s27  ;;  %s3238_s27 = sld [smem:[#allocation2 + $0x5f]] }
 0x103   : > { %1120 = vrot.lane.b32.xlu1 %v1115_v55, %s2573_s5  ;;  %1118 = vrot.lane.b32.xlu0 %v1114_v57, %s2573_s5  ;;  %v1222_v55 = vmul.f32 %v3145_v14, %v1221_v49  ;;  %v3155_v57 = vld [vmem:[%s2695_s30 + $0x9] sm:$0xff] }
 0x104   : > { %v597_v6 = vadd.f32 %v595_v59, %v589_v3  ;;  %v596_v25 = vadd.f32 %v594_v61, %v588_v5  ;;  %v708_v59 = vmul.f32 %v3155_v57, %v706_v51  ;;  %v3159_v61 = vld [vmem:[%s2695_s30 + $0x1] sm:$0xff] }
 0x105   : > { %v607_v7 = vpop.permute.xlu1 %606  ;;  %v605_v18 = vpop.permute.xlu0 %604  ;;  %v707_v34 = vmul.f32 %v3159_v61, %v706_v51 }
 0x106   : > { %v611_v13 = vadd.f32 %v607_v7, %v597_v6  ;;  %v610_v15 = vadd.f32 %v605_v18, %v596_v25  ;;  %v1236_v6 = vmul.f32 %v3145_v14, %v1235_v62  ;;  %v1257_v7 = vstv %s3132_s6  ;;  %v3176_v18 = vld [vmem:[%s2695_s30 + $0x19] sm:$0xff]  ;;  %s3244_s6 = sld [smem:[#allocation2 + $0x6d]] }
 0x107   : > { %1134 = vrot.lane.b32.xlu1 %v1129_v56, %s2572_s4  ;;  %1132 = vrot.lane.b32.xlu0 %v1128_v22, %s2572_s4  ;;  %v1237_v22 = vmul.f32 %v3141_v12, %v1235_v62  ;;  %v3226_v62 = vld [vmem:[%s2695_s30 + $0x30] sm:$0xff] }
 0x109   : > { %v621_v20 = vpop.permute.xlu1 %620  ;;  %v619_v21 = vpop.permute.xlu0 %618 }
 0x10a   : > { %v625_v40 = vadd.f32 %v621_v20, %v611_v13  ;;  %v624_v23 = vadd.f32 %v619_v21, %v610_v15  ;;  %v1259_v13 = vmul.f32 %v3172_v16, %v1257_v7  ;;  %v1258_v15 = vmul.f32 %v3176_v18, %v1257_v7 }
 0x10b   : > { %1156 = vrot.lane.b32.xlu1 %v1151_v9, %s2573_s5  ;;  %1154 = vrot.lane.b32.xlu0 %v1150_v11, %s2573_s5  ;;  %v742_v9 = vstv %s3148_s8  ;;  %s3254_s8 = sld [smem:[#allocation2 + $0x36]] }
 0x10c   : > { %v633_v42 = vadd.f32 %v631_v1, %v625_v40  ;;  %v632_v27 = vadd.f32 %v630_v17, %v624_v23  ;;  %v2421_v17 = vld [vmem:[%s2695_s30 + $0xa] sm:$0xff]  ;;  %v2422_v40 = vld [vmem:[%s2695_s30 + $0x2] sm:$0xff] }
 0x10d   : > { %v643_v30 = vpop.permute.xlu1 %642  ;;  %v641_v31 = vpop.permute.xlu0 %640  ;;  %v744_v19 = vmul.f32 %v2421_v17, %v742_v9  ;;  %v743_v23 = vmul.f32 %v2422_v40, %v742_v9  ;;  %v2426_v9 = vld [vmem:[%s2695_s30 + $0x19] sm:$0xff] }
 0x10e   : > { %v647_v37 = vadd.f32 %v643_v30, %v633_v42  ;;  %v646_v24 = vadd.f32 %v641_v31, %v632_v27 }
 0x10f   : > { %1170 = vrot.lane.b32.xlu1 %v1165_v33, %s2572_s4  ;;  %1168 = vrot.lane.b32.xlu0 %v1164_v36, %s2572_s4  ;;  %v1271_v33 = vstv %s3163_s9  ;;  %s3263_s9 = sld [smem:[#allocation2 + $0x6e]] }
 0x110   : > { %v1273_v4 = vmul.f32 %v3172_v16, %v1271_v33  ;;  %v1272_v30 = vmul.f32 %v3176_v18, %v1271_v33  ;;  %v3247_v33 = vld [vmem:[%s2695_s30 + $0x39] sm:$0xff] }
 0x111   : > { %v657_v41 = vpop.permute.xlu1 %656  ;;  %v655_v43 = vpop.permute.xlu0 %654 }
 0x112   : > { %v661_v45 = vadd.f32 %v657_v41, %v647_v37  ;;  %v660_v46 = vadd.f32 %v655_v43, %v646_v24  ;;  %v3201_v37 = vld [vmem:[%s2695_s30 + $0x1a] sm:$0xff]  ;;  %v778_v24 = vstv %s3179_s11  ;;  %s3279_s11 = sld [smem:[#allocation2 + $0x39]] }
 0x113   : > { %1192 = vrot.lane.b32.xlu1 %v1187_v8, %s2573_s5  ;;  %1190 = vrot.lane.b32.xlu0 %v1186_v10, %s2573_s5  ;;  %v3197_v10 = vld [vmem:[%s2695_s30 + $0x22] sm:$0xff]  ;;  %v1294_v43 = vmul.f32 %v3201_v37, %v1293_v35 }
 0x114   : > { %664 = vst.msk [vmem:[%s3134_s7 + $0x8] sm:$0xff] %vm662_vm0, %v661_v45  ;;  %663 = vst.msk [vmem:[%s3134_s7] sm:$0xff] %vm662_vm0, %v660_v46  ;;  %v1295_v41 = vmul.f32 %v3197_v10, %v1293_v35  ;;  %v780_v45 = vmul.f32 %v2423_v44, %v778_v24 }
 0x115   : > { %v684_v52 = vpop.permute.xlu1 %683  ;;  %v682_v53 = vpop.permute.xlu0 %681 }
 0x116   : > { %v688_v60 = vadd.f32 %v684_v52, %v674_v47  ;;  %v687_v32 = vadd.f32 %v682_v53, %v673_v50  ;;  %v1307_v50 = vstv %s3188_s18  ;;  %s3288_s18 = sld [smem:[#allocation2 + $0x71]] }
 0x117   : > { %1206 = vrot.lane.b32.xlu1 %v1201_v2, %s2572_s4  ;;  %1204 = vrot.lane.b32.xlu0 %v1200_v48, %s2572_s4  ;;  %v2424_v48 = vld [vmem:[%s2695_s30 + $0x18] sm:$0xff] }
 0x118   : > { %v779_v47 = vmul.f32 %v2424_v48, %v778_v24 }
 0x119   : > { %v698_v63 = vpop.permute.xlu1 %697  ;;  %v696_v3 = vpop.permute.xlu0 %695 }
 0x11a   : > { %v702_v5 = vadd.f32 %v698_v63, %v688_v60  ;;  %v701_v56 = vadd.f32 %v696_v3, %v687_v32  ;;  %v3222_v32 = vld [vmem:[%s2695_s30 + $0x38] sm:$0xff]  ;;  %v814_v63 = vstv %s3204_s21  ;;  %s3304_s21 = sld [smem:[#allocation2 + $0x3c]] }
 0x11b   : > { %1228 = vrot.lane.b32.xlu1 %v1223_v54, %s2573_s5  ;;  %1226 = vrot.lane.b32.xlu0 %v1222_v55, %s2573_s5  ;;  %v1309_v54 = vmul.f32 %v3197_v10, %v1307_v50  ;;  %v1308_v55 = vmul.f32 %v3201_v37, %v1307_v50 }
 0x11c   : > { %v710_v25 = vadd.f32 %v708_v59, %v702_v5  ;;  %v709_v58 = vadd.f32 %v707_v34, %v701_v56  ;;  %v1329_v34 = vstv %s3194_s19  ;;  %s3294_s19 = sld [smem:[#allocation2 + $0x73]] }
 0x11d   : > { %v720_v11 = vpop.permute.xlu1 %719  ;;  %v718_v1 = vpop.permute.xlu0 %717  ;;  %v1331_v56 = vmul.f32 %v3222_v32, %v1329_v34 }
 0x11e   : > { %v724_v20 = vadd.f32 %v720_v11, %v710_v25  ;;  %v723_v21 = vadd.f32 %v718_v1, %v709_v58  ;;  %v815_v11 = vmul.f32 %v2426_v9, %v814_v63  ;;  %v1343_v1 = vstv %s3213_s26  ;;  %s3313_s26 = sld [smem:[#allocation2 + $0x74]] }
 0x11f   : > { %1242 = vrot.lane.b32.xlu1 %v1237_v22, %s2572_s4  ;;  %1240 = vrot.lane.b32.xlu0 %v1236_v6, %s2572_s4  ;;  %v1330_v22 = vmul.f32 %v3226_v62, %v1329_v34  ;;  %v2425_v6 = vld [vmem:[%s2695_s30 + $0x21] sm:$0xff] }
 0x120   : > { %v816_v25 = vmul.f32 %v2425_v6, %v814_v63  ;;  %v2429_v63 = vld [vmem:[%s2695_s30 + $0x38] sm:$0xff] }
 0x121   : > { %v734_v36 = vpop.permute.xlu1 %733  ;;  %v732_v42 = vpop.permute.xlu0 %731 }
 0x122   : > { %v738_v27 = vadd.f32 %v734_v36, %v724_v20  ;;  %v737_v0 = vadd.f32 %v732_v42, %v723_v21  ;;  %v1345_v20 = vmul.f32 %v3222_v32, %v1343_v1  ;;  %v1344_v21 = vmul.f32 %v3226_v62, %v1343_v1  ;;  %v3251_v42 = vld [vmem:[%s2695_s30 + $0x31] sm:$0xff] }
 0x123   : > { %1264 = vrot.lane.b32.xlu1 %v1259_v13, %s2573_s5  ;;  %1262 = vrot.lane.b32.xlu0 %v1258_v15, %s2573_s5  ;;  %v1365_v36 = vstv %s3219_s28  ;;  %s3319_s28 = sld [smem:[#allocation2 + $0x76]] }
 0x124   : > { %v746_v31 = vadd.f32 %v744_v19, %v738_v27  ;;  %v745_v8 = vadd.f32 %v743_v23, %v737_v0  ;;  %v850_v27 = vstv %s3229_s29  ;;  %s3323_s29 = sld [smem:[#allocation2 + $0x3f]] }
 0x125   : > { %v756_v26 = vpop.permute.xlu1 %755  ;;  %v754_v39 = vpop.permute.xlu0 %753 }
 0x126   : > { %v760_v46 = vadd.f32 %v756_v26, %v746_v31  ;;  %v759_v2 = vadd.f32 %v754_v39, %v745_v8  ;;  %v1366_v31 = vmul.f32 %v3251_v42, %v1365_v36  ;;  %v2427_v8 = vld [vmem:[%s2695_s30 + $0x22] sm:$0xff]  ;;  %v2428_v39 = vld [vmem:[%s2695_s30 + $0x1a] sm:$0xff] }
 0x127   : > { %1278 = vrot.lane.b32.xlu1 %v1273_v4, %s2572_s4  ;;  %1276 = vrot.lane.b32.xlu0 %v1272_v30, %s2572_s4  ;;  %v1367_v30 = vmul.f32 %v3247_v33, %v1365_v36  ;;  %v852_v35 = vmul.f32 %v2427_v8, %v850_v27 }
 0x129   : > { %v770_v49 = vpop.permute.xlu1 %769  ;;  %v768_v51 = vpop.permute.xlu0 %767 }
 0x12a   : > { %v774_v52 = vadd.f32 %v770_v49, %v760_v46  ;;  %v773_v53 = vadd.f32 %v768_v51, %v759_v2  ;;  %v3272_v51 = vld [vmem:[%s2695_s30 + $0x8] sm:$0xff] }
 0x12b   : > { %1300 = vrot.lane.b32.xlu1 %v1295_v41, %s2573_s5  ;;  %1298 = vrot.lane.b32.xlu0 %v1294_v43, %s2573_s5  ;;  %v851_v41 = vmul.f32 %v2428_v39, %v850_v27  ;;  %v1379_v43 = vstv %s3238_s27  ;;  %s3332_s27 = sld [smem:[#allocation2 + $0x77]] }
 0x12c   : > { %v782_v59 = vadd.f32 %v780_v45, %v774_v52  ;;  %v781_v60 = vadd.f32 %v779_v47, %v773_v53  ;;  %v1381_v48 = vmul.f32 %v3247_v33, %v1379_v43  ;;  %v1380_v47 = vmul.f32 %v3251_v42, %v1379_v43  ;;  %v3276_v53 = vld [vmem:[%s2695_s30] sm:$0xff] }
 0x12d   : > { %v792_v3 = vpop.permute.xlu1 %791  ;;  %v790_v5 = vpop.permute.xlu0 %789  ;;  %v1550_v52 = vstv %s3244_s6  ;;  %s3338_s6 = sld [smem:[#allocation2 + $0x79]] }
 0x12e   : > { %v796_v58 = vadd.f32 %v792_v3, %v782_v59  ;;  %v795_v7 = vadd.f32 %v790_v5, %v781_v60  ;;  %v1552_v60 = vmul.f32 %v1550_v52, %v3272_v51  ;;  %v1551_v34 = vmul.f32 %v1550_v52, %v3276_v53 }
 0x12f   : > { %1314 = vrot.lane.b32.xlu1 %v1309_v54, %s2572_s4  ;;  %1312 = vrot.lane.b32.xlu0 %v1308_v55, %s2572_s4  ;;  %v886_v54 = vstv %s3254_s8  ;;  %s3342_s8 = sld [smem:[#allocation2 + $0x42]] }
 0x130   : > { %v888_v3 = vmul.f32 %v2429_v63, %v886_v54 }
 0x131   : > { %v806_v13 = vpop.permute.xlu1 %805  ;;  %v804_v15 = vpop.permute.xlu0 %803 }
 0x132   : > { %v810_v17 = vadd.f32 %v806_v13, %v796_v58  ;;  %v809_v19 = vadd.f32 %v804_v15, %v795_v7 }
 0x133   : > { %1336 = vrot.lane.b32.xlu1 %v1331_v56, %s2573_s5  ;;  %1334 = vrot.lane.b32.xlu0 %v1330_v22, %s2573_s5  ;;  %v2430_v22 = vld [vmem:[%s2695_s30 + $0x30] sm:$0xff] }
 0x134   : > { %v818_v40 = vadd.f32 %v816_v25, %v810_v17  ;;  %v817_v23 = vadd.f32 %v815_v11, %v809_v19  ;;  %v887_v6 = vmul.f32 %v2430_v22, %v886_v54  ;;  %v1564_v25 = vstv %s3263_s9  ;;  %v3297_v19 = vld [vmem:[%s2695_s30 + $0x9] sm:$0xff]  ;;  %s3351_s9 = sld [smem:[#allocation2 + $0x7a]] }
 0x135   : > { %v828_v0 = vpop.permute.xlu1 %827  ;;  %v826_v4 = vpop.permute.xlu0 %825  ;;  %v1566_v1 = vmul.f32 %v1564_v25, %v3272_v51  ;;  %v1565_v13 = vmul.f32 %v1564_v25, %v3276_v53 }
 0x136   : > { %v832_v24 = vadd.f32 %v828_v0, %v818_v40  ;;  %v831_v26 = vadd.f32 %v826_v4, %v817_v23  ;;  %v922_v40 = vstv %s3279_s11  ;;  %v2431_v4 = vld [vmem:[%s2695_s30 + $0x39] sm:$0xff]  ;;  %s3361_s11 = sld [smem:[#allocation2 + $0x45]] }
 0x137   : > { %1350 = vrot.lane.b32.xlu1 %v1345_v20, %s2572_s4  ;;  %1348 = vrot.lane.b32.xlu0 %v1344_v21, %s2572_s4  ;;  %v1586_v20 = vstv %s3269_s10  ;;  %v3301_v21 = vld [vmem:[%s2695_s30 + $0x1] sm:$0xff]  ;;  %s3357_s10 = sld [smem:[#allocation2 + $0x7c]] }
 0x138   : > { %v1588_v27 = vmul.f32 %v1586_v20, %v3297_v19  ;;  %v1587_v0 = vmul.f32 %v1586_v20, %v3301_v21 }
 0x139   : > { %v842_v44 = vpop.permute.xlu1 %841  ;;  %v840_v45 = vpop.permute.xlu0 %839 }
 0x13a   : > { %v846_v46 = vadd.f32 %v842_v44, %v832_v24  ;;  %v845_v2 = vadd.f32 %v840_v45, %v831_v26  ;;  %v1600_v26 = vstv %s3288_s18  ;;  %s3370_s18 = sld [smem:[#allocation2 + $0x7d]] }
 0x13b   : > { %1372 = vrot.lane.b32.xlu1 %v1367_v30, %s2573_s5  ;;  %1370 = vrot.lane.b32.xlu0 %v1366_v31, %s2573_s5  ;;  %v924_v30 = vmul.f32 %v2431_v4, %v922_v40  ;;  %v1602_v45 = vmul.f32 %v1600_v26, %v3297_v19 }
 0x13c   : > { %v854_v50 = vadd.f32 %v852_v35, %v846_v46  ;;  %v853_v49 = vadd.f32 %v851_v41, %v845_v2  ;;  %v2432_v35 = vld [vmem:[%s2695_s30 + $0x31] sm:$0xff]  ;;  %v1601_v46 = vmul.f32 %v1600_v26, %v3301_v21 }
 0x13d   : > { %v864_v55 = vpop.permute.xlu1 %863  ;;  %v862_v59 = vpop.permute.xlu0 %861  ;;  %v923_v24 = vmul.f32 %v2432_v35, %v922_v40 }
 0x13e   : > { %v868_v5 = vadd.f32 %v864_v55, %v854_v50  ;;  %v867_v56 = vadd.f32 %v862_v59, %v853_v49  ;;  %v958_v50 = vstv %s3304_s21  ;;  %v2433_v59 = vld [vmem:[%s2695_s30 + $0x3a] sm:$0xff]  ;;  %s3380_s21 = sld [smem:[#allocation2 + $0x48]] }
 0x13f   : > { %1386 = vrot.lane.b32.xlu1 %v1381_v48, %s2572_s4  ;;  %1384 = vrot.lane.b32.xlu0 %v1380_v47, %s2572_s4  ;;  %v1622_v47 = vstv %s3294_s19  ;;  %s3376_s19 = sld [smem:[#allocation2 + $0x7f]] }
 0x140   : > { %v1624_v54 = vmul.f32 %v1622_v47, %v3104_v28  ;;  %v1623_v55 = vmul.f32 %v1622_v47, %v3108_v29 }
 0x141   : > { %v878_v58 = vpop.permute.xlu1 %877  ;;  %v876_v7 = vpop.permute.xlu0 %875 }
 0x142   : > { %v882_v9 = vadd.f32 %v878_v58, %v868_v5  ;;  %v881_v11 = vadd.f32 %v876_v7, %v867_v56  ;;  %v1636_v56 = vstv %s3313_s26  ;;  %s3389_s26 = sld [smem:[#allocation2 + $0x80]] }
 0x143   : > { %1557 = vrot.lane.b32.xlu1 %v1552_v60, %s2573_s5  ;;  %1555 = vrot.lane.b32.xlu0 %v1551_v34, %s2573_s5  ;;  %v960_v60 = vmul.f32 %v2433_v59, %v958_v50  ;;  %v1638_v7 = vmul.f32 %v1636_v56, %v3104_v28 }
 0x144   : > { %v890_v15 = vadd.f32 %v888_v3, %v882_v9  ;;  %v889_v17 = vadd.f32 %v887_v6, %v881_v11  ;;  %v2434_v3 = vld [vmem:[%s2695_s30 + $0x32] sm:$0xff]  ;;  %v1637_v9 = vmul.f32 %v1636_v56, %v3108_v29 }
 0x145   : > { %v900_v23 = vpop.permute.xlu1 %899  ;;  %v898_v36 = vpop.permute.xlu0 %897  ;;  %v959_v5 = vmul.f32 %v2434_v3, %v958_v50 }
 0x146   : > { %v904_v31 = vadd.f32 %v900_v23, %v890_v15  ;;  %v903_v8 = vadd.f32 %v898_v36, %v889_v17  ;;  %v994_v15 = vstv %s3323_s29  ;;  %v2435_v36 = vld [vmem:[%s2695_s30 + $0x50] sm:$0xff]  ;;  %s3397_s29 = sld [smem:[#allocation2 + $0x82]] }
 0x147   : > { %1571 = vrot.lane.b32.xlu1 %v1566_v1, %s2572_s4  ;;  %1569 = vrot.lane.b32.xlu0 %v1565_v13, %s2572_s4  ;;  %v1658_v13 = vstv %s3319_s28  ;;  %s3391_s28 = sld [smem:[#allocation5 + $0x2]] }
 0x148   : > { %v1660_v40 = vmul.f32 %v3141_v12, %v1658_v13  ;;  %v1659_v23 = vmul.f32 %v3145_v14, %v1658_v13 }
 0x149   : > { %v914_v39 = vpop.permute.xlu1 %913  ;;  %v912_v41 = vpop.permute.xlu0 %911 }
 0x14a   : > { %v918_v43 = vadd.f32 %v914_v39, %v904_v31  ;;  %v917_v44 = vadd.f32 %v912_v41, %v903_v8  ;;  %v1672_v8 = vstv %s3332_s27  ;;  %s3401_s27 = sld [smem:[#allocation2 + $0x4b]] }
 0x14b   : > { %1593 = vrot.lane.b32.xlu1 %v1588_v27, %s2573_s5  ;;  %1591 = vrot.lane.b32.xlu0 %v1587_v0, %s2573_s5  ;;  %v996_v27 = vmul.f32 %v2435_v36, %v994_v15  ;;  %v1674_v41 = vmul.f32 %v3141_v12, %v1672_v8 }
 0x14c   : > { %v926_v2 = vadd.f32 %v924_v30, %v918_v43  ;;  %v925_v48 = vadd.f32 %v923_v24, %v917_v44  ;;  %v2436_v30 = vld [vmem:[%s2695_s30 + $0x48] sm:$0xff]  ;;  %v1673_v43 = vmul.f32 %v3145_v14, %v1672_v8 }
 0x14d   : > { %v936_v49 = vpop.permute.xlu1 %935  ;;  %v934_v52 = vpop.permute.xlu0 %933  ;;  %v995_v31 = vmul.f32 %v2436_v30, %v994_v15 }
 0x14e   : > { %v940_v34 = vadd.f32 %v936_v49, %v926_v2  ;;  %v939_v63 = vadd.f32 %v934_v52, %v925_v48  ;;  %v1030_v2 = vstv %s3342_s8  ;;  %v2437_v52 = vld [vmem:[%s2695_s30 + $0x51] sm:$0xff]  ;;  %s3423_s8 = sld [smem:[#allocation2 + $0x61]] }
 0x14f   : > { %1607 = vrot.lane.b32.xlu1 %v1602_v45, %s2572_s4  ;;  %1605 = vrot.lane.b32.xlu0 %v1601_v46, %s2572_s4  ;;  %v1694_v46 = vstv %s3338_s6  ;;  %s3410_s6 = sld [smem:[#allocation2 + $0x83]] }
 0x150   : > { %v1696_v50 = vmul.f32 %v3172_v16, %v1694_v46  ;;  %v1695_v49 = vmul.f32 %v3176_v18, %v1694_v46 }
 0x151   : > { %v950_v22 = vpop.permute.xlu1 %949  ;;  %v948_v6 = vpop.permute.xlu0 %947 }
 0x152   : > { %v954_v25 = vadd.f32 %v950_v22, %v940_v34  ;;  %v953_v58 = vadd.f32 %v948_v6, %v939_v63  ;;  %v1708_v63 = vstv %s3351_s9  ;;  %s3425_s9 = sld [smem:[#allocation2 + $0x4e]] }
 0x153   : > { %1629 = vrot.lane.b32.xlu1 %v1624_v54, %s2573_s5  ;;  %1627 = vrot.lane.b32.xlu0 %v1623_v55, %s2573_s5  ;;  %v1032_v54 = vmul.f32 %v2437_v52, %v1030_v2  ;;  %v1710_v6 = vmul.f32 %v3172_v16, %v1708_v63 }
 0x154   : > { %v962_v11 = vadd.f32 %v960_v60, %v954_v25  ;;  %v961_v1 = vadd.f32 %v959_v5, %v953_v58  ;;  %v2438_v60 = vld [vmem:[%s2695_s30 + $0x49] sm:$0xff]  ;;  %v1709_v25 = vmul.f32 %v3176_v18, %v1708_v63 }
 0x155   : > { %v972_v17 = vpop.permute.xlu1 %971  ;;  %v970_v20 = vpop.permute.xlu0 %969  ;;  %v1031_v34 = vmul.f32 %v2438_v60, %v1030_v2 }
 0x156   : > { %v976_v0 = vadd.f32 %v972_v17, %v962_v11  ;;  %v975_v4 = vadd.f32 %v970_v20, %v961_v1  ;;  %v1066_v11 = vstv %s3361_s11  ;;  %v2439_v20 = vld [vmem:[%s2695_s30 + $0x52] sm:$0xff]  ;;  %s3447_s11 = sld [smem:[#allocation2 + $0x62]] }
 0x157   : > { %1643 = vrot.lane.b32.xlu1 %v1638_v7, %s2572_s4  ;;  %1641 = vrot.lane.b32.xlu0 %v1637_v9, %s2572_s4  ;;  %v1730_v9 = vstv %s3357_s10  ;;  %s3434_s10 = sld [smem:[#allocation2 + $0x85]] }
 0x158   : > { %v1732_v15 = vmul.f32 %v3197_v10, %v1730_v9  ;;  %v1731_v17 = vmul.f32 %v3201_v37, %v1730_v9 }
 0x159   : > { %v986_v35 = vpop.permute.xlu1 %985  ;;  %v984_v24 = vpop.permute.xlu0 %983 }
 0x15a   : > { %v990_v26 = vadd.f32 %v986_v35, %v976_v0  ;;  %v989_v39 = vadd.f32 %v984_v24, %v975_v4  ;;  %v1744_v4 = vstv %s3370_s18  ;;  %s3450_s18 = sld [smem:[#allocation2 + $0x51]] }
 0x15b   : > { %1665 = vrot.lane.b32.xlu1 %v1660_v40, %s2573_s5  ;;  %1663 = vrot.lane.b32.xlu0 %v1659_v23, %s2573_s5  ;;  %v1068_v40 = vmul.f32 %v2439_v20, %v1066_v11  ;;  %v1746_v24 = vmul.f32 %v3197_v10, %v1744_v4  ;;  %v1816_v20 = vstv %s3410_s6  ;;  %s3503_s6 = sld [smem:[#allocation2 + $0x89]] }
 0x15c   : > { %v998_v44 = vadd.f32 %v996_v27, %v990_v26  ;;  %v997_v45 = vadd.f32 %v995_v31, %v989_v39  ;;  %v2440_v27 = vld [vmem:[%s2695_s30 + $0x4a] sm:$0xff]  ;;  %v1745_v26 = vmul.f32 %v3201_v37, %v1744_v4 }
 0x15d   : > { %v1008_v48 = vpop.permute.xlu1 %1007  ;;  %v1006_v47 = vpop.permute.xlu0 %1005  ;;  %v1067_v0 = vmul.f32 %v2440_v27, %v1066_v11 }
 0x15e   : > { %v1012_v55 = vadd.f32 %v1008_v48, %v998_v44  ;;  %v1011_v59 = vadd.f32 %v1006_v47, %v997_v45  ;;  %v1107_v44 = vstv %s3380_s21  ;;  %v2441_v47 = vld [vmem:[%s2695_s30 + $0x8] sm:$0xff]  ;;  %s3466_s21 = sld [smem:[#allocation2 + $0x64]] }
 0x15f   : > { %1679 = vrot.lane.b32.xlu1 %v1674_v41, %s2572_s4  ;;  %1677 = vrot.lane.b32.xlu0 %v1673_v43, %s2572_s4  ;;  %v1766_v43 = vstv %s3376_s19  ;;  %s3459_s19 = sld [smem:[#allocation2 + $0x86]] }
 0x160   : > { %v1768_v2 = vmul.f32 %v3222_v32, %v1766_v43  ;;  %v1767_v48 = vmul.f32 %v3226_v62, %v1766_v43 }
 0x161   : > { %v1022_v3 = vpop.permute.xlu1 %1021  ;;  %v1020_v5 = vpop.permute.xlu0 %1019 }
 0x162   : > { %v1026_v56 = vadd.f32 %v1022_v3, %v1012_v55  ;;  %v1025_v22 = vadd.f32 %v1020_v5, %v1011_v59  ;;  %v1780_v55 = vstv %s3389_s26  ;;  %s3469_s26 = sld [smem:[#allocation2 + $0x54]] }
 0x163   : > { %1701 = vrot.lane.b32.xlu1 %v1696_v50, %s2573_s5  ;;  %1699 = vrot.lane.b32.xlu0 %v1695_v49, %s2573_s5  ;;  %v1109_v50 = vmul.f32 %v2441_v47, %v1107_v44  ;;  %v1782_v5 = vmul.f32 %v3222_v32, %v1780_v55 }
 0x164   : > { %v1034_v58 = vadd.f32 %v1032_v54, %v1026_v56  ;;  %v1033_v7 = vadd.f32 %v1031_v34, %v1025_v22  ;;  %v1108_v54 = vmul.f32 %v3121_v38, %v1107_v44  ;;  %v1103_v34 = vstv %s3391_s28  ;;  %s3478_s28 = sld [smem:[#allocation2 + $0x88]] }
 0x165   : > { %v1044_v1 = vpop.permute.xlu1 %1043  ;;  %v1042_v13 = vpop.permute.xlu0 %1041  ;;  %v1781_v56 = vmul.f32 %v3226_v62, %v1780_v55  ;;  %v1111_v38 = vadd.f32 %v1109_v50, %v1103_v34 }
 0x166   : > { %v1048_v23 = vadd.f32 %v1044_v1, %v1034_v58  ;;  %v1047_v36 = vadd.f32 %v1042_v13, %v1033_v7  ;;  %v1110_v22 = vadd.f32 %v1108_v54, %v1103_v34  ;;  %v1215_v34 = vstv %s3450_s18  ;;  %s3538_s18 = sld [smem:[#allocation2 + $0x5d]] }
 0x167   : > { %1715 = vrot.lane.b32.xlu1 %v1710_v6, %s2572_s4  ;;  %1713 = vrot.lane.b32.xlu0 %v1709_v25, %s2572_s4  ;;  %v1802_v6 = vstv %s3397_s29  ;;  %v1143_v25 = vstv %s3401_s27  ;;  %s3491_s29 = sld [smem:[#allocation2 + $0x65]] }
 0x168   : > { %v1804_v9 = vmul.f32 %v3247_v33, %v1802_v6  ;;  %v1803_v11 = vmul.f32 %v3251_v42, %v1802_v6  ;;  %v1145_v1 = vmul.f32 %v3155_v57, %v1143_v25  ;;  %v1818_v57 = vmul.f32 %v3247_v33, %v1816_v20  ;;  %s3494_s27 = sld [smem:[#allocation2 + $0x57]] }
 0x169   : > { %v1058_v30 = vpop.permute.xlu1 %1057  ;;  %v1056_v31 = vpop.permute.xlu0 %1055  ;;  %v1852_v6 = vstv %s3459_s19  ;;  %s3547_s19 = sld [smem:[#allocation2 + $0x8c]] }
 0x16a   : > { %v1062_v8 = vadd.f32 %v1058_v30, %v1048_v23  ;;  %v1061_v35 = vadd.f32 %v1056_v31, %v1047_v36  ;;  %v3441_v31 = vld [vmem:[%s2695_s30 + $0x3a] sm:$0xff] }
 0x16b   : > { %1737 = vrot.lane.b32.xlu1 %v1732_v15, %s2573_s5  ;;  %1735 = vrot.lane.b32.xlu0 %v1731_v17, %s2573_s5  ;;  %v1144_v17 = vmul.f32 %v3159_v61, %v1143_v25  ;;  %v1401_v61 = vstv %s3423_s8  ;;  %s3510_s8 = sld [smem:[#allocation2 + $0x67]] }
 0x16c   : > { %v1070_v39 = vadd.f32 %v1068_v40, %v1062_v8  ;;  %v1069_v41 = vadd.f32 %v1067_v0, %v1061_v35  ;;  %v1817_v0 = vmul.f32 %v3251_v42, %v1816_v20  ;;  %v3445_v8 = vld [vmem:[%s2695_s30 + $0x32] sm:$0xff]  ;;  %v1403_v43 = vmul.f32 %v3441_v31, %v1401_v61 }
 0x16d   : > { %v1080_v45 = vpop.permute.xlu1 %1079  ;;  %v1078_v46 = vpop.permute.xlu0 %1077  ;;  %v1402_v44 = vmul.f32 %v3445_v8, %v1401_v61  ;;  %v1874_v61 = vstv %s3478_s28  ;;  %s2271_s28 = sld [smem:[#allocation2 + $0x6b]] }
 0x16e   : > { %v1084_v49 = vadd.f32 %v1080_v45, %v1070_v39  ;;  %v1083_v52 = vadd.f32 %v1078_v46, %v1069_v41 }
 0x16f   : > { %1751 = vrot.lane.b32.xlu1 %v1746_v24, %s2572_s4  ;;  %1749 = vrot.lane.b32.xlu0 %v1745_v26, %s2572_s4  ;;  %v1179_v26 = vstv %s3425_s9  ;;  %s3513_s9 = sld [smem:[#allocation2 + $0x5a]] }
 0x170   : > { %v1181_v45 = vmul.f32 %v1179_v26, %v3104_v28  ;;  %v1180_v46 = vmul.f32 %v1179_v26, %v3108_v29  ;;  %v1415_v29 = vstv %s3447_s11  ;;  %s3535_s11 = sld [smem:[#allocation2 + $0x68]] }
 0x171   : > { %v1094_v59 = vpop.permute.xlu1 %1093  ;;  %v1092_v60 = vpop.permute.xlu0 %1091 }
 0x172   : > { %v1098_v63 = vadd.f32 %v1094_v59, %v1084_v49  ;;  %v1097_v3 = vadd.f32 %v1092_v60, %v1083_v52 }
 0x173   : > { %1773 = vrot.lane.b32.xlu1 %v1768_v2, %s2573_s5  ;;  %1771 = vrot.lane.b32.xlu0 %v1767_v48, %s2573_s5  ;;  %v1838_v2 = vstv %s3434_s10  ;;  %s3522_s10 = sld [smem:[#allocation2 + $0x8b]] }
 0x174   : > { %2216 = vst.msk [vmem:[%s3134_s7 + $0x18] sm:$0xff] %vm662_vm0, %v1098_v63  ;;  %2215 = vst.msk [vmem:[%s3134_s7 + $0x10] sm:$0xff] %vm662_vm0, %v1097_v3  ;;  %v1840_v52 = vmul.f32 %v3441_v31, %v1838_v2  ;;  %v1839_v54 = vmul.f32 %v3445_v8, %v1838_v2  ;;  %v1287_v2 = vstv %s3494_s27  ;;  %s2275_s27 = sld [smem:[#allocation2 + $0x6c]] }
 0x175   : > { %v1121_v58 = vpop.permute.xlu1 %1120  ;;  %v1119_v7 = vpop.permute.xlu0 %1118 }
 0x176   : > { %v1125_v13 = vadd.f32 %v1121_v58, %v1111_v38  ;;  %v1124_v15 = vadd.f32 %v1119_v7, %v1110_v22  ;;  %v1217_v38 = vmul.f32 %v3141_v12, %v1215_v34  ;;  %v1216_v22 = vmul.f32 %v3145_v14, %v1215_v34 }
 0x177   : > { %1787 = vrot.lane.b32.xlu1 %v1782_v5, %s2572_s4  ;;  %1785 = vrot.lane.b32.xlu0 %v1781_v56, %s2572_s4  ;;  %v1417_v5 = vmul.f32 %v3441_v31, %v1415_v29  ;;  %v1416_v56 = vmul.f32 %v3445_v8, %v1415_v29  ;;  %v1437_v14 = vstv %s3466_s21  ;;  %s3554_s21 = sld [smem:[#allocation2 + $0x6a]] }
 0x179   : > { %v1135_v40 = vpop.permute.xlu1 %1134  ;;  %v1133_v23 = vpop.permute.xlu0 %1132 }
 0x17a   : > { %v1139_v36 = vadd.f32 %v1135_v40, %v1125_v13  ;;  %v1138_v27 = vadd.f32 %v1133_v23, %v1124_v15  ;;  %v3485_v15 = vld [vmem:[%s2695_s30 + $0x50] sm:$0xff]  ;;  %v1251_v23 = vstv %s3469_s26  ;;  %s3564_s26 = sld [smem:[#allocation2 + $0x8e]] }
 0x17b   : > { %1809 = vrot.lane.b32.xlu1 %v1804_v9, %s2573_s5  ;;  %1807 = vrot.lane.b32.xlu0 %v1803_v11, %s2573_s5  ;;  %v1854_v11 = vmul.f32 %v3441_v31, %v1852_v6 }
 0x17c   : > { %v1147_v4 = vadd.f32 %v1145_v1, %v1139_v36  ;;  %v1146_v30 = vadd.f32 %v1144_v17, %v1138_v27  ;;  %v1853_v1 = vmul.f32 %v3445_v8, %v1852_v6  ;;  %v3489_v17 = vld [vmem:[%s2695_s30 + $0x48] sm:$0xff]  ;;  %v1323_v6 = vstv %s3513_s9  ;;  %s2291_s9 = sld [smem:[#allocation2 + $0x78]] }
 0x17d   : > { %v1157_v35 = vpop.permute.xlu1 %1156  ;;  %v1155_v24 = vpop.permute.xlu0 %1154 }
 0x17e   : > { %v1161_v39 = vadd.f32 %v1157_v35, %v1147_v4  ;;  %v1160_v41 = vadd.f32 %v1155_v24, %v1146_v30  ;;  %v1253_v4 = vmul.f32 %v3172_v16, %v1251_v23  ;;  %v1252_v30 = vmul.f32 %v3176_v18, %v1251_v23 }
 0x17f   : > { %1823 = vrot.lane.b32.xlu1 %v1818_v57, %s2572_s4  ;;  %1821 = vrot.lane.b32.xlu0 %v1817_v0, %s2572_s4  ;;  %v1439_v57 = vmul.f32 %v3485_v15, %v1437_v14  ;;  %v1438_v0 = vmul.f32 %v3489_v17, %v1437_v14  ;;  %v1451_v18 = vstv %s3491_s29  ;;  %s2328_s29 = sld [smem:[#allocation2 + $0x8f]] }
 0x181   : > { %v1171_v48 = vpop.permute.xlu1 %1170  ;;  %v1169_v47 = vpop.permute.xlu0 %1168 }
 0x182   : > { %v1175_v50 = vadd.f32 %v1171_v48, %v1161_v39  ;;  %v1174_v49 = vadd.f32 %v1169_v47, %v1160_v41  ;;  %v1876_v41 = vmul.f32 %v3485_v15, %v1874_v61 }
 0x183   : > { %1408 = vrot.lane.b32.xlu1 %v1403_v43, %s2573_s5  ;;  %1406 = vrot.lane.b32.xlu0 %v1402_v44, %s2573_s5  ;;  %v1875_v43 = vmul.f32 %v3489_v17, %v1874_v61 }
 0x184   : > { %v1183_v55 = vadd.f32 %v1181_v45, %v1175_v50  ;;  %v1182_v28 = vadd.f32 %v1180_v46, %v1174_v49  ;;  %v1453_v50 = vmul.f32 %v3485_v15, %v1451_v18  ;;  %v1452_v49 = vmul.f32 %v3489_v17, %v1451_v18 }
 0x185   : > { %v1193_v59 = vpop.permute.xlu1 %1192  ;;  %v1191_v60 = vpop.permute.xlu0 %1190 }
 0x186   : > { %v1197_v63 = vadd.f32 %v1193_v59, %v1183_v55  ;;  %v1196_v3 = vadd.f32 %v1191_v60, %v1182_v28  ;;  %v1888_v55 = vstv %s3503_s6  ;;  %s2274_s6 = sld [smem:[#allocation5 + $0x3]] }
 0x187   : > { %1845 = vrot.lane.b32.xlu1 %v1840_v52, %s2573_s5  ;;  %1843 = vrot.lane.b32.xlu0 %v1839_v54, %s2573_s5  ;;  %v1289_v52 = vmul.f32 %v3197_v10, %v1287_v2  ;;  %v1288_v54 = vmul.f32 %v3201_v37, %v1287_v2  ;;  %v1890_v34 = vmul.f32 %v3485_v15, %v1888_v55  ;;  %v1473_v37 = vstv %s3510_s8  ;;  %s2281_s8 = sld [smem:[#allocation2 + $0x72]] }
 0x189   : > { %v1207_v25 = vpop.permute.xlu1 %1206  ;;  %v1205_v58 = vpop.permute.xlu0 %1204 }
 0x18a   : > { %v1211_v7 = vadd.f32 %v1207_v25, %v1197_v63  ;;  %v1210_v9 = vadd.f32 %v1205_v58, %v1196_v3  ;;  %v1889_v63 = vmul.f32 %v3489_v17, %v1888_v55 }
 0x18b   : > { %1422 = vrot.lane.b32.xlu1 %v1417_v5, %s2572_s4  ;;  %1420 = vrot.lane.b32.xlu0 %v1416_v56, %s2572_s4  ;;  %v3529_v5 = vld [vmem:[%s2695_s30 + $0x51] sm:$0xff]  ;;  %v3533_v56 = vld [vmem:[%s2695_s30 + $0x49] sm:$0xff] }
 0x18c   : > { %v1219_v12 = vadd.f32 %v1217_v38, %v1211_v7  ;;  %v1218_v13 = vadd.f32 %v1216_v22, %v1210_v9  ;;  %v1475_v7 = vmul.f32 %v3529_v5, %v1473_v37  ;;  %v1474_v9 = vmul.f32 %v3533_v56, %v1473_v37 }
 0x18d   : > { %v1229_v20 = vpop.permute.xlu1 %1228  ;;  %v1227_v40 = vpop.permute.xlu0 %1226  ;;  %v1523_v37 = vstv %s2271_s28  ;;  %s3628_s28 = sld [smem:[#allocation2 + $0x87]] }
 0x18e   : > { %v1233_v36 = vadd.f32 %v1229_v20, %v1219_v12  ;;  %v1232_v27 = vadd.f32 %v1227_v40, %v1218_v13  ;;  %v1910_v12 = vstv %s3522_s10  ;;  %s2296_s10 = sld [smem:[#allocation2 + $0x7b]] }
 0x18f   : > { %1859 = vrot.lane.b32.xlu1 %v1854_v11, %s2572_s4  ;;  %1857 = vrot.lane.b32.xlu0 %v1853_v1, %s2572_s4  ;;  %v1325_v11 = vmul.f32 %v3222_v32, %v1323_v6  ;;  %v1324_v1 = vmul.f32 %v3226_v62, %v1323_v6  ;;  %v1912_v23 = vmul.f32 %v3529_v5, %v1910_v12  ;;  %v1487_v62 = vstv %s3535_s11  ;;  %s2301_s11 = sld [smem:[#allocation2 + $0x7e]] }
 0x191   : > { %v1243_v35 = vpop.permute.xlu1 %1242  ;;  %v1241_v24 = vpop.permute.xlu0 %1240 }
 0x192   : > { %v1247_v26 = vadd.f32 %v1243_v35, %v1233_v36  ;;  %v1246_v39 = vadd.f32 %v1241_v24, %v1232_v27  ;;  %v1911_v36 = vmul.f32 %v3533_v56, %v1910_v12  ;;  %v1489_v35 = vmul.f32 %v3529_v5, %v1487_v62 }
 0x193   : > { %1444 = vrot.lane.b32.xlu1 %v1439_v57, %s2573_s5  ;;  %1442 = vrot.lane.b32.xlu0 %v1438_v0, %s2573_s5  ;;  %v1488_v24 = vmul.f32 %v3533_v56, %v1487_v62 }
 0x194   : > { %v1255_v44 = vadd.f32 %v1253_v4, %v1247_v26  ;;  %v1254_v16 = vadd.f32 %v1252_v30, %v1246_v39  ;;  %v1359_v4 = vstv %s3538_s18  ;;  %s2306_s18 = sld [smem:[#allocation2 + $0x81]] }
 0x195   : > { %v1265_v45 = vpop.permute.xlu1 %1264  ;;  %v1263_v46 = vpop.permute.xlu0 %1262  ;;  %v1361_v26 = vmul.f32 %v3247_v33, %v1359_v4  ;;  %v1360_v39 = vmul.f32 %v3251_v42, %v1359_v4  ;;  %v1509_v42 = vstv %s3554_s21  ;;  %s2311_s21 = sld [smem:[#allocation2 + $0x84]] }
 0x196   : > { %v1269_v48 = vadd.f32 %v1265_v45, %v1255_v44  ;;  %v1268_v47 = vadd.f32 %v1263_v46, %v1254_v16 }
 0x197   : > { %1881 = vrot.lane.b32.xlu1 %v1876_v41, %s2573_s5  ;;  %1879 = vrot.lane.b32.xlu0 %v1875_v43, %s2573_s5  ;;  %v1924_v41 = vstv %s3547_s19  ;;  %s2254_s19 = sld [smem:[#allocation2 + $0x60]] }
 0x198   : > { %v1926_v45 = vmul.f32 %v3529_v5, %v1924_v41  ;;  %v1925_v46 = vmul.f32 %v3533_v56, %v1924_v41 }
 0x199   : > { %v1279_v28 = vpop.permute.xlu1 %1278  ;;  %v1277_v29 = vpop.permute.xlu0 %1276 }
 0x19a   : > { %v1283_v59 = vadd.f32 %v1279_v28, %v1269_v48  ;;  %v1282_v60 = vadd.f32 %v1277_v29, %v1268_v47  ;;  %v3571_v48 = vld [vmem:[%s2695_s30 + $0x52] sm:$0xff]  ;;  %v3575_v47 = vld [vmem:[%s2695_s30 + $0x4a] sm:$0xff]  ;;  %v1946_v29 = vstv %s3564_s26  ;;  %s2259_s26 = sld [smem:[#allocation2 + $0x63]] }
 0x19b   : > { %1458 = vrot.lane.b32.xlu1 %v1453_v50, %s2572_s4  ;;  %1456 = vrot.lane.b32.xlu0 %v1452_v49, %s2572_s4  ;;  %v1511_v55 = vmul.f32 %v3571_v48, %v1509_v42  ;;  %v1510_v28 = vmul.f32 %v3575_v47, %v1509_v42  ;;  %v1525_v6 = vmul.f32 %v3571_v48, %v1523_v37 }
 0x19c   : > { %v1291_v10 = vadd.f32 %v1289_v52, %v1283_v59  ;;  %v1290_v3 = vadd.f32 %v1288_v54, %v1282_v60 }
 0x19d   : > { %v1301_v38 = vpop.permute.xlu1 %1300  ;;  %v1299_v22 = vpop.permute.xlu0 %1298 }
 0x19e   : > { %v1305_v25 = vadd.f32 %v1301_v38, %v1291_v10  ;;  %v1304_v58 = vadd.f32 %v1299_v22, %v1290_v3  ;;  %v1948_v10 = vmul.f32 %v3571_v48, %v1946_v29  ;;  %v1947_v3 = vmul.f32 %v3575_v47, %v1946_v29 }
 0x19f   : > { %1895 = vrot.lane.b32.xlu1 %v1890_v34, %s2572_s4  ;;  %1893 = vrot.lane.b32.xlu0 %v1889_v63, %s2572_s4 }
 0x1a1   : > { %v1315_v13 = vpop.permute.xlu1 %1314  ;;  %v1313_v14 = vpop.permute.xlu0 %1312 }
 0x1a2   : > { %v1319_v20 = vadd.f32 %v1315_v13, %v1305_v25  ;;  %v1318_v40 = vadd.f32 %v1313_v14, %v1304_v58  ;;  %v1524_v25 = vmul.f32 %v3575_v47, %v1523_v37  ;;  %v1960_v58 = vstv %s2328_s29  ;;  %s3645_s29 = sld [smem:[#allocation2 + $0x8a]] }
 0x1a3   : > { %1480 = vrot.lane.b32.xlu1 %v1475_v7, %s2573_s5  ;;  %1478 = vrot.lane.b32.xlu0 %v1474_v9, %s2573_s5  ;;  %v1544_v14 = vstv %s2275_s27  ;;  %s3652_s27 = sld [smem:[#allocation2 + $0x69]] }
 0x1a4   : > { %v1327_v32 = vadd.f32 %v1325_v11, %v1319_v20  ;;  %v1326_v27 = vadd.f32 %v1324_v1, %v1318_v40  ;;  %v1962_v11 = vmul.f32 %v3571_v48, %v1960_v58  ;;  %v1961_v1 = vmul.f32 %v3575_v47, %v1960_v58  ;;  %v2444_v58 = vld [vmem:[%s2695_s30 + $0x20] sm:$0xff] }
 0x1a5   : > { %v1337_v57 = vpop.permute.xlu1 %1336  ;;  %v1335_v0 = vpop.permute.xlu0 %1334 }
 0x1a6   : > { %v1341_v30 = vadd.f32 %v1337_v57, %v1327_v32  ;;  %v1340_v61 = vadd.f32 %v1335_v0, %v1326_v27  ;;  %v1540_v32 = vstv %s2274_s6  ;;  %s3657_s6 = sld [smem:[#allocation2 + $0x8d]] }
 0x1a7   : > { %1917 = vrot.lane.b32.xlu1 %v1912_v23, %s2573_s5  ;;  %1915 = vrot.lane.b32.xlu0 %v1911_v36, %s2573_s5  ;;  %v1546_v23 = vmul.f32 %v1544_v14, %v3272_v51  ;;  %v1545_v36 = vmul.f32 %v1544_v14, %v3276_v53 }
 0x1a9   : > { %v1351_v43 = vpop.permute.xlu1 %1350  ;;  %v1349_v44 = vpop.permute.xlu0 %1348  ;;  %v1548_v57 = vadd.f32 %v1546_v23, %v1540_v32  ;;  %v1547_v0 = vadd.f32 %v1545_v36, %v1540_v32  ;;  %v1688_v23 = vstv %s2291_s9 }
 0x1aa   : > { %v1355_v16 = vadd.f32 %v1351_v43, %v1341_v30  ;;  %v1354_v18 = vadd.f32 %v1349_v44, %v1340_v61 }
 0x1ab   : > { %1494 = vrot.lane.b32.xlu1 %v1489_v35, %s2572_s4  ;;  %1492 = vrot.lane.b32.xlu0 %v1488_v24, %s2572_s4 }
 0x1ac   : > { %v1363_v33 = vadd.f32 %v1361_v26, %v1355_v16  ;;  %v1362_v2 = vadd.f32 %v1360_v39, %v1354_v18 }
 0x1ad   : > { %v1373_v50 = vpop.permute.xlu1 %1372  ;;  %v1371_v49 = vpop.permute.xlu0 %1370 }
 0x1ae   : > { %v1377_v52 = vadd.f32 %v1373_v50, %v1363_v33  ;;  %v1376_v54 = vadd.f32 %v1371_v49, %v1362_v2 }
 0x1af   : > { %1931 = vrot.lane.b32.xlu1 %v1926_v45, %s2572_s4  ;;  %1929 = vrot.lane.b32.xlu0 %v1925_v46, %s2572_s4  ;;  %v1616_v46 = vstv %s2281_s8  ;;  %s1992_s8 = sshll.u32 %s3134_s7, 4  ;;  %s3678_s8 = int_to_ptr.vmem [resolvable:$true] %s1992_s8 }
 0x1b1   : > { %v1387_v59 = vpop.permute.xlu1 %1386  ;;  %v1385_v60 = vpop.permute.xlu0 %1384 }
 0x1b2   : > { %v3582_v34 = vadd.f32 %v1387_v59, %v1377_v52  ;;  %v3584_v63 = vadd.f32 %v1385_v60, %v1376_v54  ;;  %v2442_v54 = vld [vmem:[%s2695_s30 + $0xa] sm:$0xff] }
 0x1b3   : > { %1516 = vrot.lane.b32.xlu1 %v1511_v55, %s2573_s5  ;;  %1514 = vrot.lane.b32.xlu0 %v1510_v28, %s2573_s5  ;;  %v2443_v55 = vld [vmem:[%s2695_s30 + $0x2] sm:$0xff] }
 0x1b5   : > { %v1558_v38 = vpop.permute.xlu1 %1557  ;;  %v1556_v22 = vpop.permute.xlu0 %1555 }
 0x1b6   : > { %v1562_v35 = vadd.f32 %v1558_v38, %v1548_v57  ;;  %v1561_v24 = vadd.f32 %v1556_v22, %v1547_v0 }
 0x1b7   : > { %1953 = vrot.lane.b32.xlu1 %v1948_v10, %s2573_s5  ;;  %1951 = vrot.lane.b32.xlu0 %v1947_v3, %s2573_s5  ;;  %s2278_s5 = sld [smem:[#allocation2 + $0x6f]] }
 0x1b9   : > { %v1572_v7 = vpop.permute.xlu1 %1571  ;;  %v1570_v9 = vpop.permute.xlu0 %1569 }
 0x1ba   : > { %v1576_v26 = vadd.f32 %v1572_v7, %v1562_v35  ;;  %v1575_v39 = vadd.f32 %v1570_v9, %v1561_v24  ;;  %v2445_v9 = vld [vmem:[%s2695_s30 + $0x18] sm:$0xff] }
 0x1bb   : > { %1530 = vrot.lane.b32.xlu1 %v1525_v6, %s2572_s4  ;;  %1528 = vrot.lane.b32.xlu0 %v1524_v25, %s2572_s4 }
 0x1bd   : > { %v1594_v12 = vpop.permute.xlu1 %1593  ;;  %v1592_v13 = vpop.permute.xlu0 %1591  ;;  %v1580_v4 = vstv %s2278_s5  ;;  %s2336_s5 = sshll.u32 %s2560_s15, 10  ;;  %s3686_s15 = scalar_lea.sflag [#allocation3], %s212_s23 }
 0x1be   : > { %v1582_v41 = vmul.f32 %v1580_v4, %v3297_v19  ;;  %v1581_v51 = vmul.f32 %v1580_v4, %v3301_v21  ;;  %v1618_v19 = vmul.f32 %v2442_v54, %v1616_v46  ;;  %v1617_v21 = vmul.f32 %v2443_v55, %v1616_v46  ;;  %v2446_v4 = vld [vmem:[%s2695_s30 + $0x21] sm:$0xff] }
 0x1bf   : > { %1967 = vrot.lane.b32.xlu1 %v1962_v11, %s2572_s4  ;;  %1965 = vrot.lane.b32.xlu0 %v1961_v1, %s2572_s4  ;;  %s2286_s4 = sld [smem:[#allocation2 + $0x75]]  ;;  %v2448_v46 = vld [vmem:[%s2695_s30 + $0x22] sm:$0xff] }
 0x1c0   : > { %v1584_v44 = vadd.f32 %v1582_v41, %v1576_v26  ;;  %v1583_v16 = vadd.f32 %v1581_v51, %v1575_v39  ;;  %v1724_v51 = vstv %s2296_s10  ;;  %s3676_s10 = scalar_lea.hbm %s3734_s3, %s2336_s5 }
 0x1c1   : > { %v1608_v20 = vpop.permute.xlu1 %1607  ;;  %v1606_v40 = vpop.permute.xlu0 %1605 }
 0x1c2   : > { %v1598_v33 = vadd.f32 %v1594_v12, %v1584_v44  ;;  %v1597_v2 = vadd.f32 %v1592_v13, %v1583_v16 }
 0x1c4   : > { %v1612_v49 = vadd.f32 %v1608_v20, %v1598_v33  ;;  %v1611_v52 = vadd.f32 %v1606_v40, %v1597_v2  ;;  %v1726_v33 = vmul.f32 %v2448_v46, %v1724_v51  ;;  %v2449_v2 = vld [vmem:[%s2695_s30 + $0x1a] sm:$0xff]  ;;  %v1431_v46 = vstv %s2259_s26 }
 0x1c5   : > { %v1630_v27 = vpop.permute.xlu1 %1629  ;;  %v1628_v62 = vpop.permute.xlu0 %1627  ;;  %v1652_v10 = vstv %s2286_s4 }
 0x1c6   : > { %v1620_v59 = vadd.f32 %v1618_v19, %v1612_v49  ;;  %v1619_v60 = vadd.f32 %v1617_v21, %v1611_v52  ;;  %v1654_v7 = vmul.f32 %v2444_v58, %v1652_v10  ;;  %v1653_v11 = vmul.f32 %v2445_v9, %v1652_v10 }
 0x1c7   : > { %v1725_v49 = vmul.f32 %v2449_v2, %v1724_v51 }
 0x1c8   : > { %v1634_v38 = vadd.f32 %v1630_v27, %v1620_v59  ;;  %v1633_v22 = vadd.f32 %v1628_v62, %v1619_v60  ;;  %v1760_v60 = vstv %s2301_s11  ;;  %s2484_s11 = scalar_lea.vmem %s3678_s8, 1024 }
 0x1c9   : > { %v1644_v30 = vpop.permute.xlu1 %1643  ;;  %v1642_v61 = vpop.permute.xlu0 %1641  ;;  %p2485_p8 = scmp.ne.s32.totalorder %s3678_s8, %s2484_s11 }
 0x1ca   : > { %v1648_v6 = vadd.f32 %v1644_v30, %v1634_v38  ;;  %v1647_v25 = vadd.f32 %v1642_v61, %v1633_v22  ;;  %v1690_v30 = vmul.f32 %v2446_v4, %v1688_v23  ;;  %v2447_v61 = vld [vmem:[%s2695_s30 + $0x19] sm:$0xff] }
 0x1cb   : > { %v1689_v35 = vmul.f32 %v2447_v61, %v1688_v23  ;;  %v2450_v22 = vld [vmem:[%s2695_s30 + $0x38] sm:$0xff]  ;;  %p2486_p11 = pnand %p2485_p8, %p3746_p10 }
 0x1cc   : > { %v1656_v13 = vadd.f32 %v1654_v7, %v1648_v6  ;;  %v1655_v14 = vadd.f32 %v1653_v11, %v1647_v25  ;;  %v1762_v6 = vmul.f32 %v2450_v22, %v1760_v60  ;;  %v2451_v25 = vld [vmem:[%s2695_s30 + $0x30] sm:$0xff] }
 0x1cd   : > { %v1666_v43 = vpop.permute.xlu1 %1665  ;;  %v1664_v53 = vpop.permute.xlu0 %1663  ;;  %v1761_v58 = vmul.f32 %v2451_v25, %v1760_v60  ;;  %p2487_p13 = pneg %p2486_p11 }
 0x1ce   : > { %v1670_v36 = vadd.f32 %v1666_v43, %v1656_v13  ;;  %v1669_v32 = vadd.f32 %v1664_v53, %v1655_v14  ;;  %v1796_v14 = vstv %s2306_s18  ;;  %s2574_s18 = smov [#allocation7]  }
 0x1d1   : > { %v1680_v18 = vpop.permute.xlu1 %1679  ;;  %v1678_v45 = vpop.permute.xlu0 %1677 }
 0x1d2   : > { %v1684_v57 = vadd.f32 %v1680_v18, %v1670_v36  ;;  %v1683_v0 = vadd.f32 %v1678_v45, %v1669_v32 }
 0x1d4   : > { %v1692_v39 = vadd.f32 %v1690_v30, %v1684_v57  ;;  %v1691_v41 = vadd.f32 %v1689_v35, %v1683_v0  ;;  %v2453_v0 = vld [vmem:[%s2695_s30 + $0x31] sm:$0xff]  ;;  %v1395_v35 = vstv %s2254_s19  ;;  %s2488_s19 = sshll.u32 %s2574_s18, 4  ;;  %s2489_s19 = int_to_ptr.vmem [resolvable:$false] %s2488_s19 }
 0x1d5   : > { %v1702_v42 = vpop.permute.xlu1 %1701  ;;  %v1700_v50 = vpop.permute.xlu0 %1699  ;;  %v1797_v4 = vmul.f32 %v2453_v0, %v1796_v14  ;;  %p2491_p1 = scmp.lt.s32.totalorder %s3678_s8, %s2489_s19 }
 0x1d6   : > { %v1706_v44 = vadd.f32 %v1702_v42, %v1692_v39  ;;  %v1705_v16 = vadd.f32 %v1700_v50, %v1691_v41 }
 0x1d9   : > { %v1716_v28 = vpop.permute.xlu1 %1715  ;;  %v1714_v29 = vpop.permute.xlu0 %1713 }
 0x1da   : > { %v1720_v18 = vadd.f32 %v1716_v28, %v1706_v44  ;;  %v1719_v45 = vadd.f32 %v1714_v29, %v1705_v16 }
 0x1dc   : > { %v1728_v19 = vadd.f32 %v1726_v33, %v1720_v18  ;;  %v1727_v55 = vadd.f32 %v1725_v49, %v1719_v45 }
 0x1dd   : > { %v1738_v3 = vpop.permute.xlu1 %1737  ;;  %v1736_v37 = vpop.permute.xlu0 %1735 }
 0x1de   : > { %v1742_v42 = vadd.f32 %v1738_v3, %v1728_v19  ;;  %v1741_v50 = vadd.f32 %v1736_v37, %v1727_v55 }
 0x1e1   : > { %v1752_v1 = vpop.permute.xlu1 %1751  ;;  %v1750_v12 = vpop.permute.xlu0 %1749 }
 0x1e2   : > { %v1756_v10 = vadd.f32 %v1752_v1, %v1742_v42  ;;  %v1755_v38 = vadd.f32 %v1750_v12, %v1741_v50  ;;  %v2452_v12 = vld [vmem:[%s2695_s30 + $0x39] sm:$0xff]  ;;  %s3636_s30 = sld [smem:[#allocation2 + $0x66]]  ;;  %v1868_v42 = vstv %s3628_s28 }
 0x1e3   : > { %v1798_v57 = vmul.f32 %v2452_v12, %v1796_v14 }
 0x1e4   : > { %v1764_v11 = vadd.f32 %v1762_v6, %v1756_v10  ;;  %v1763_v13 = vadd.f32 %v1761_v58, %v1755_v38 }
 0x1e5   : > { %v1774_v20 = vpop.permute.xlu1 %1773  ;;  %v1772_v40 = vpop.permute.xlu0 %1771 }
 0x1e6   : > { %v1778_v37 = vadd.f32 %v1774_v20, %v1764_v11  ;;  %v1777_v36 = vadd.f32 %v1772_v40, %v1763_v13  ;;  %v1397_v20 = vmul.f32 %v3441_v31, %v1395_v35  ;;  %v1396_v40 = vmul.f32 %v3445_v8, %v1395_v35 }
 0x1e7   : > { %v1503_v35 = vstv %s3652_s27 }
 0x1e8   : > { %v1399_v55 = vadd.f32 %v1397_v20, %v3582_v34  ;;  %v1467_v6 = vstv %s3636_s30 }
 0x1e9   : > { %v1788_v27 = vpop.permute.xlu1 %1787  ;;  %v1786_v62 = vpop.permute.xlu0 %1785 }
 0x1ea   : > { %v1792_v32 = vadd.f32 %v1788_v27, %v1778_v37  ;;  %v1791_v1 = vadd.f32 %v1786_v62, %v1777_v36  ;;  %v1832_v27 = vstv %s2311_s21  ;;  %v1904_v36 = vstv %s3645_s29  ;;  %s2490_s21 = scalar_lea.vmem %s2489_s19, 2048 }
 0x1eb   : > { %v1834_v18 = vmul.f32 %v3441_v31, %v1832_v27  ;;  %v1833_v45 = vmul.f32 %v3445_v8, %v1832_v27  ;;  %v1433_v31 = vmul.f32 %v3485_v15, %v1431_v46  ;;  %v1432_v8 = vmul.f32 %v3489_v17, %v1431_v46  ;;  %p2492_p6 = scmp.lt.s32.totalorder %s2490_s21, %s2484_s11 }
 0x1ec   : > { %v1800_v39 = vadd.f32 %v1798_v57, %v1792_v32  ;;  %v1799_v41 = vadd.f32 %v1797_v4, %v1791_v1 }
 0x1ed   : > { %v3610_v24 = vpop.permute.xlu1 %1809  ;;  %v3612_v26 = vpop.permute.xlu0 %1807  ;;  %p2493_p7 = por %p2492_p6, %p2491_p1 }
 0x1ee   : > { %v1814_v62 = vadd.f32 %v3610_v24, %v1800_v39  ;;  %v1813_v16 = vadd.f32 %v3612_v26, %v1799_v41  ;;  %v1398_v24 = vadd.f32 %v1396_v40, %v3584_v63 }
 0x1ef   : > { %p2494_p9 = pnand %p2493_p7, %p2487_p13 }
 0x1f1   : > { %v3614_v43 = vpop.permute.xlu1 %1823  ;;  %v3616_v53 = vpop.permute.xlu0 %1821 }
 0x1f2   : > { %v1828_v49 = vadd.f32 %v3614_v43, %v1814_v62  ;;  %v1827_v19 = vadd.f32 %v3616_v53, %v1813_v16  ;;  %v1505_v16 = vmul.f32 %v3571_v48, %v1503_v35 }
 0x1f4   : > { %v1836_v38 = vadd.f32 %v1834_v18, %v1828_v49  ;;  %v1835_v43 = vadd.f32 %v1833_v45, %v1827_v19 }
 0x1f5   : > { %v1409_v52 = vpop.permute.xlu1 %1408  ;;  %v1407_v54 = vpop.permute.xlu0 %1406 }
 0x1f6   : > { %v1413_v60 = vadd.f32 %v1409_v52, %v1399_v55  ;;  %v1412_v26 = vadd.f32 %v1407_v54, %v1398_v24  ;;  %v1870_v52 = vmul.f32 %v3485_v15, %v1868_v42  ;;  %v1869_v54 = vmul.f32 %v3489_v17, %v1868_v42 }
 0x1f9   : > { %v3620_v21 = vpop.permute.xlu1 %1845  ;;  %v3622_v59 = vpop.permute.xlu0 %1843 }
 0x1fa   : > { %v1850_v34 = vadd.f32 %v3620_v21, %v1836_v38  ;;  %v1849_v63 = vadd.f32 %v3622_v59, %v1835_v43  ;;  %v1469_v21 = vmul.f32 %v3529_v5, %v1467_v6  ;;  %v1468_v59 = vmul.f32 %v3533_v56, %v1467_v6 }
 0x1fd   : > { %v1423_v28 = vpop.permute.xlu1 %1422  ;;  %v1421_v29 = vpop.permute.xlu0 %1420 }
 0x1fe   : > { %v1427_v22 = vadd.f32 %v1423_v28, %v1413_v60  ;;  %v1426_v53 = vadd.f32 %v1421_v29, %v1412_v26 }
 0x200   : > { %v1435_v14 = vadd.f32 %v1433_v31, %v1427_v22  ;;  %v1434_v37 = vadd.f32 %v1432_v8, %v1426_v53 }
 0x201   : > { %v1860_v7 = vpop.permute.xlu1 %1859  ;;  %v1858_v9 = vpop.permute.xlu0 %1857 }
 0x202   : > { %v1864_v11 = vadd.f32 %v1860_v7, %v1850_v34  ;;  %v1863_v13 = vadd.f32 %v1858_v9, %v1849_v63 }
 0x204   : > { %v1872_v17 = vadd.f32 %v1870_v52, %v1864_v11  ;;  %v1871_v1 = vadd.f32 %v1869_v54, %v1863_v13 }
 0x205   : > { %v1445_v23 = vpop.permute.xlu1 %1444  ;;  %v1443_v3 = vpop.permute.xlu0 %1442 }
 0x206   : > { %v1449_v28 = vadd.f32 %v1445_v23, %v1435_v14  ;;  %v1448_v29 = vadd.f32 %v1443_v3, %v1434_v37  ;;  %v1906_v23 = vmul.f32 %v3529_v5, %v1904_v36  ;;  %v1905_v3 = vmul.f32 %v3533_v56, %v1904_v36 }
 0x209   : > { %v1882_v30 = vpop.permute.xlu1 %1881  ;;  %v1880_v61 = vpop.permute.xlu0 %1879 }
 0x20a   : > { %v1886_v7 = vadd.f32 %v1882_v30, %v1872_v17  ;;  %v1885_v9 = vadd.f32 %v1880_v61, %v1871_v1  ;;  %v1504_v30 = vmul.f32 %v3575_v47, %v1503_v35 }
 0x20d   : > { %v1459_v51 = vpop.permute.xlu1 %1458  ;;  %v1457_v44 = vpop.permute.xlu0 %1456 }
 0x20e   : > { %v1463_v12 = vadd.f32 %v1459_v51, %v1449_v28  ;;  %v1462_v57 = vadd.f32 %v1457_v44, %v1448_v29  ;;  %v1940_v44 = vstv %s3657_s6 }
 0x20f   : > { %v1941_v19 = vmul.f32 %v3575_v47, %v1940_v44 }
 0x210   : > { %v1471_v20 = vadd.f32 %v1469_v21, %v1463_v12  ;;  %v1470_v40 = vadd.f32 %v1468_v59, %v1462_v57 }
 0x211   : > { %v1896_v33 = vpop.permute.xlu1 %1895  ;;  %v1894_v2 = vpop.permute.xlu0 %1893 }
 0x212   : > { %v1900_v39 = vadd.f32 %v1896_v33, %v1886_v7  ;;  %v1899_v41 = vadd.f32 %v1894_v2, %v1885_v9  ;;  %v1942_v33 = vmul.f32 %v3571_v48, %v1940_v44 }
 0x214   : > { %v1908_v18 = vadd.f32 %v1906_v23, %v1900_v39  ;;  %v1907_v5 = vadd.f32 %v1905_v3, %v1899_v41 }
 0x215   : > { %v1481_v50 = vpop.permute.xlu1 %1480  ;;  %v1479_v10 = vpop.permute.xlu0 %1478 }
 0x216   : > { %v1485_v27 = vadd.f32 %v1481_v50, %v1471_v20  ;;  %v1484_v62 = vadd.f32 %v1479_v10, %v1470_v40 }
 0x219   : > { %v1918_v25 = vpop.permute.xlu1 %1917  ;;  %v1916_v58 = vpop.permute.xlu0 %1915 }
 0x21a   : > { %v1922_v46 = vadd.f32 %v1918_v25, %v1908_v18  ;;  %v1921_v49 = vadd.f32 %v1916_v58, %v1907_v5 }
 0x21d   : > { %v1495_v15 = vpop.permute.xlu1 %1494  ;;  %v1493_v32 = vpop.permute.xlu0 %1492 }
 0x21e   : > { %v1499_v45 = vadd.f32 %v1495_v15, %v1485_v27  ;;  %v1498_v56 = vadd.f32 %v1493_v32, %v1484_v62 }
 0x220   : > { %v1507_v26 = vadd.f32 %v1505_v16, %v1499_v45  ;;  %v1506_v31 = vadd.f32 %v1504_v30, %v1498_v56 }
 0x221   : > { %v1932_v0 = vpop.permute.xlu1 %1931  ;;  %v1930_v4 = vpop.permute.xlu0 %1929 }
 0x222   : > { %v1936_v24 = vadd.f32 %v1932_v0, %v1922_v46  ;;  %v1935_v60 = vadd.f32 %v1930_v4, %v1921_v49 }
 0x224   : > { %v1944_v38 = vadd.f32 %v1942_v33, %v1936_v24  ;;  %v1943_v43 = vadd.f32 %v1941_v19, %v1935_v60 }
 0x225   : > { %v1517_v51 = vpop.permute.xlu1 %1516  ;;  %v1515_v61 = vpop.permute.xlu0 %1514 }
 0x226   : > { %v1521_v8 = vadd.f32 %v1517_v51, %v1507_v26  ;;  %v1520_v42 = vadd.f32 %v1515_v61, %v1506_v31 }
 0x229   : > { %v1954_v2 = vpop.permute.xlu1 %1953  ;;  %v1952_v55 = vpop.permute.xlu0 %1951 }
 0x22a   : > { %v1958_v47 = vadd.f32 %v1954_v2, %v1944_v38  ;;  %v1957_v53 = vadd.f32 %v1952_v55, %v1943_v43 }
 0x22d   : > { %v1531_v50 = vpop.permute.xlu1 %1530  ;;  %v1529_v10 = vpop.permute.xlu0 %1528 }
 0x22e   : > { %v1535_v48 = vadd.f32 %v1531_v50, %v1521_v8  ;;  %v1534_v22 = vadd.f32 %v1529_v10, %v1520_v42 }
 0x230   : > { %2273 = vst.msk [vmem:[%s3134_s7 + $0x28] sm:$0xff] %vm662_vm0, %v1535_v48  ;;  %2272 = vst.msk [vmem:[%s3134_s7 + $0x20] sm:$0xff] %vm662_vm0, %v1534_v22 }
 0x231   : > { %v1968_v34 = vpop.permute.xlu1 %1967  ;;  %v1966_v63 = vpop.permute.xlu0 %1965 }
 0x232   : > { %v1972_v52 = vadd.f32 %v1968_v34, %v1958_v47  ;;  %v1971_v54 = vadd.f32 %v1966_v63, %v1957_v53 }
 0x234   : > { %2330 = vst.msk [vmem:[%s3134_s7 + $0x38] sm:$0xff] %vm662_vm0, %v1972_v52  ;;  %2329 = vst.msk [vmem:[%s3134_s7 + $0x30] sm:$0xff] %vm662_vm0, %v1971_v54 }
 0x235   : > { %2497 = shalt.err (!%p2494_p9)
}
 0x236   : > { %s2498_s23 = scalar_lea.hbm %s3676_s10, 1024  ;;  %s2502_s28 = scalar_lea.hbm %s3734_s3, 2048 }
 0x237   : > { %p2499_p12 = scmp.ne.s32.totalorder %s3676_s10, %s2498_s23  ;;  %p2503_p3 = scmp.lt.s32.totalorder %s3676_s10, %s3734_s3 }
 0x238   : > { %p2504_p5 = scmp.lt.s32.totalorder %s2502_s28, %s2498_s23 }
 0x239   : > { %p2500_p0 = pnand %p2499_p12, %p3746_p10 }
 0x23a   : > { %p2505_p4 = por %p2504_p5, %p2503_p3 }
 0x23b   : > { %p2501_p2 = pneg %p2500_p0 }
 0x23d   : > { %p2506_p8 = pnand %p2505_p4, %p2501_p2 }
 0x23f   : > { %2509 = shalt.err (!%p2506_p8)
}
 0x240   : > { %s2575_s27 = smov 128   ;;  %s2576_s6 = smov 8  }
 0x241   : > { %2346 = dma.vmem_to_hbm [thread:$0]  (%p3746_p10), %s3678_s8, 1024, %s3676_s10, %s3686_s15, %s2575_s27, %s2575_s27, %s2576_s6  }
 0x242 PF: > { %p2363_p11 = scmp.ge.s32.totalorder %s2568_s17, 2  ;;  %s2007_s5 = sand.u32 1, %s2548_s12  }
 0x243   : > { %p3747_p13 = scmp.ne.s32.totalorder %s3740_s24, 0  ;;  %s2008_s4 = scalar_lea.sflag [#allocation3], %s2007_s5 }
 0x245   : > { %p2356_p1 = pnand %p2363_p11, %p3747_p13 }
 0x247   : > { %p2357_p6 = pneg %p2356_p1 }
 0x249   : > { %2543 = dma.done.wait (%p2357_p6), %s2008_s4, 1024  }
 0x24a   : > { %2545 = vsyncadd (%p2357_p6), %s2008_s4, 4294966272  ;;  %s18_s17 = sadd.s32 1, %s2568_s17   ;;  %s3748_s12 = smov %s2552_s13 }
 0x24b   : > { %p15_p7 = scmp.ge.s32.totalorder %s18_s17, 4   ;;  %s3749_s13 = smov %s2556_s14 }
 0x24c   : > { %s3750_s14 = smov %s2650_s25  ;;  %s3751_s15 = smov %s2564_s16 }
 0x24d   : > { %s3752_s16 = smov %s3754_s20  ;;  %17 = sbr.rel (!%p15_p7) target bundleno = 6 (0x6), region = 82 }
 0x252   :  { %2013 = vsyncpa [#allocation3], 1 }
 0x253   :  { %2015 = vsyncpa [#allocation3 + $0x1], 1 }
 0x254   :  { %2016 = vsyncpa [#allocation4], 1 }
 0x255   :  { %2018 = vsyncpa [#allocation4 + $0x1], 1 }
 0x256   :  { %2019 = vsyncpa [#allocation6], 1 }

</bundles_post_ra>
